<compile_context>
chip_gen: v5e
topology: v5e:2x2
jax: 0.10.0
libtpu: 0.0.40
codegen_flags: <defaults>
</compile_context>

<pallas_src>
import jax
import jax.numpy as jnp
from jax.experimental import pallas as pl
from jax.experimental.pallas import tpu as pltpu


def _upconv_kernel(xm_ref, xh_ref, w_ref, b_ref, o_ref):
    """Fused nearest-2x-upsample + 3x3 conv, one (cout-tile, batch, row-tile) step.

    xm_ref: (1, TH,  W+2, Cin)    main rows of the 1-px zero-padded NHWC input (bf16)
    xh_ref: (1, 2,   W+2, Cin)    2-row halo directly below the main rows       (bf16)
    w_ref : (16, Cin, TCout)      effective weights, index = ((a*2+b)*2+r)*2+s  (bf16)
    b_ref : (1, TCout)            bias (f32)
    o_ref : (1, 4, TH, W, TCout)  phase-separated output (phase p = a*2+b)
    """
    th = xm_ref.shape[1]
    wp = xm_ref.shape[2]
    cin = xm_ref.shape[3]
    wo = wp - 2
    tcout = o_ref.shape[4]

    xm = xm_ref[0]                                   # (TH, W+2, Cin)
    xh = xh_ref[0]                                   # (2,  W+2, Cin)

    # Bias folded into the accumulator init (hoisted broadcast, reused by all phases).
    bias_acc = jnp.broadcast_to(b_ref[...].astype(jnp.float32), (th * wo, tcout))

    # The 3 distinct column-shifted slabs (the only sublane-misaligned copies needed),
    # flattened so every row tap below is a cheap, aligned leading-dim slice.
    cols = []
    for c in range(3):
        slab = jnp.concatenate([xm[:, c:c + wo, :], xh[:, c:c + wo, :]], axis=0)
        cols.append(slab.reshape((th + 2) * wo, cin))     # ((TH+2)*W, Cin)

    for pa in range(2):               # output row phase: oy = 2*i + pa
        for pb in range(2):           # output col phase: ox = 2*j + pb
            acc = bias_acc
            for r in range(2):        # effective 2x2 kernel row tap
                for s in range(2):    # effective 2x2 kernel col tap
                    k = ((pa * 2 + pb) * 2 + r) * 2 + s
                    xs = cols[pb + s][(pa + r) * wo:(pa + r + th) * wo, :]
                    acc = acc + jnp.dot(xs, w_ref[k],
                                        preferred_element_type=jnp.float32)
            o_ref[0, pa * 2 + pb] = acc.reshape(th, wo, tcout).astype(o_ref.dtype)


def _phase_weights(weight_oihw):
    """(Cout, Cin, 3, 3) PyTorch weights -> (16, Cin, Cout) phase-effective weights.

    Computed in the weight dtype (f32); cast to bf16 only afterwards so the tap sums
    are exact relative to the f32 conv reference.
    """
    w = jnp.transpose(weight_oihw, (2, 3, 1, 0))                 # (3, 3, Cin, Cout)
    # R[a, r, dy] = 1 iff original row-tap dy feeds effective row-tap r of phase a.
    R = jnp.array([[[1., 0., 0.], [0., 1., 1.]],
                   [[1., 1., 0.], [0., 0., 1.]]], w.dtype)       # (2, 2, 3)
    w_eff = jnp.einsum('ard,bse,defg->abrsfg', R, R, w)          # (2,2,2,2,Cin,Cout)
    return w_eff.reshape(16, w.shape[2], w.shape[3])


def _pick_tiles(H, Cout, max_tile_h=16, max_tile_c=256):
    th = None
    for d in range(min(max_tile_h, H), 1, -1):
        if H % d == 0 and d % 2 == 0:
            th = d
            break
    if th is None:
        # TODO(synk): masked tail row-tile (grid=pl.cdiv + pl.when) for awkward heights.
        raise NotImplementedError("Upsample kernel requires an even input height")
    tc = Cout
    if Cout > max_tile_c:
        for d in range(max_tile_c, 0, -1):
            if Cout % d == 0:
                tc = d
                break
    return th, tc


def _vmem_limit_bytes():
    # ~3/4 of physical VMEM: ~96 MiB on v5e/v6e (128 MiB), ~48 MiB on v7x (64 MiB).
    try:
        cap = int(pltpu.get_tpu_info().vmem_capacity_bytes)
    except Exception:
        cap = 64 * 1024 * 1024
    return max(32 * 1024 * 1024, min(cap * 3 // 4, 96 * 1024 * 1024))


def _upsample_conv(x_nchw, w_eff_f32, bias, compute_dtype=jnp.bfloat16):
    N, Cin, H, W = x_nchw.shape
    Cout = w_eff_f32.shape[-1]
    TH, TC = _pick_tiles(H, Cout)
    th_half = TH // 2

    # Cast to compute dtype first (halves pad/transpose traffic), NHWC, 1-px border.
    x = jnp.transpose(x_nchw.astype(compute_dtype), (0, 2, 3, 1))
    x_pad = jnp.pad(x, ((0, 0), (1, 1), (1, 1), (0, 0)))
    # TODO(synk): handle the zero border in-kernel to remove this input HBM pass.
    w_eff = w_eff_f32.astype(compute_dtype)
    bias2d = bias.reshape(1, Cout).astype(jnp.float32)

    phases = pl.pallas_call(
        _upconv_kernel,
        out_shape=jax.ShapeDtypeStruct((N, 4, H, W, Cout), x_nchw.dtype),
        # Cout-tile axis OUTERMOST: weight block index changes slowest, so the
        # (16, Cin, TC) weight tile is fetched Cout/TC times total (usually once).
        grid=(Cout // TC, N, H // TH),
        in_specs=[
            # main TH rows of this tile
            pl.BlockSpec((1, TH, W + 2, Cin), lambda c, n, h: (n, h, 0, 0)),
            # 2-row halo just below them (TH even -> valid block index)
            pl.BlockSpec((1, 2, W + 2, Cin),
                         lambda c, n, h: (n, (h + 1) * th_half, 0, 0)),
            # weights resident in VMEM, tiled over Cout only
            # TODO(synk): pipeline_mode=pl.Buffered(1) here to drop the idle 2nd buffer.
            pl.BlockSpec((16, Cin, TC), lambda c, n, h: (0, 0, c)),
            pl.BlockSpec((1, TC), lambda c, n, h: (0, c)),
        ],
        out_specs=pl.BlockSpec((1, 4, TH, W, TC),
                               lambda c, n, h: (n, 0, h, 0, c)),
        compiler_params=pltpu.CompilerParams(
            dimension_semantics=("parallel", "parallel", "parallel"),
            vmem_limit_bytes=_vmem_limit_bytes(),
        ),
    )(x_pad, x_pad, w_eff, bias2d)

    # Single XLA pass: de-interleave phases AND return to the NCHW interface layout
    # (a layout change back to NCHW is required anyway).
    y = phases.reshape(N, 2, 2, H, W, Cout)
    y = jnp.transpose(y, (0, 5, 3, 1, 4, 2))          # (N, Cout, H, 2, W, 2)
    return y.reshape(N, Cout, 2 * H, 2 * W)


class Upsample:
    """JAX/Pallas port of ecoNet.Upsample (NCHW interface, like PyTorch)."""

    def __init__(self, in_channels, with_conv, *, key=None,
                 compute_dtype=jnp.bfloat16):
        self.in_channels = in_channels
        self.with_conv = with_conv
        self.compute_dtype = compute_dtype
        if self.with_conv:
            if key is None:
                key = jax.random.PRNGKey(1)
            kw, kb = jax.random.split(key)
            fan_in = in_channels * 3 * 3
            bound = float(1.0 / (fan_in ** 0.5))       # PyTorch Conv2d default init
            self.weight = jax.random.uniform(
                kw, (in_channels, in_channels, 3, 3), jnp.float32, -bound, bound)
            self.bias = jax.random.uniform(
                kb, (in_channels,), jnp.float32, -bound, bound)
            # Effective phase weights precomputed once, in f32.
            self.w_eff = _phase_weights(self.weight)   # (16, Cin, Cout)

    def __call__(self, x):
        if not self.with_conv:
            # nearest 2x upsample only: pure data movement, no compute hot path.
            return jnp.repeat(jnp.repeat(x, 2, axis=2), 2, axis=3)
        return _upsample_conv(x, self.w_eff, self.bias, self.compute_dtype)


if __name__ == "__main__":
    key = jax.random.PRNGKey(0)
    x = jax.random.normal(key, (2, 4, 16, 16), jnp.float32)      # NCHW

    mod = Upsample(in_channels=4, with_conv=True)                # bf16 compute (default)
    y = jax.block_until_ready(mod(x))
    assert y.shape == (2, 4, 32, 32), y.shape

    # Reference: XLA f32 conv on the explicitly upsampled input.
    up = jnp.repeat(jnp.repeat(x, 2, axis=2), 2, axis=3)
    ref = jax.lax.conv_general_dilated(
        up, mod.weight, window_strides=(1, 1), padding=((1, 1), (1, 1)),
        dimension_numbers=("NCHW", "OIHW", "NCHW"),
        precision=jax.lax.Precision.HIGHEST,
    ) + mod.bias[None, :, None, None]

    # bf16 production path: loose check against the f32 reference.
    err_bf16 = float(jnp.max(jnp.abs(y - ref)))
    assert jnp.allclose(y, ref, atol=1e-1, rtol=1e-1), err_bf16

    # f32 path of the same kernel: tight check.
    y32 = jax.block_until_ready(
        _upsample_conv(x, mod.w_eff, mod.bias, compute_dtype=jnp.float32))
    err_f32 = float(jnp.max(jnp.abs(y32 - ref)))
    assert jnp.allclose(y32, ref, atol=1e-3, rtol=1e-3), err_f32

    # with_conv=False path.
    y2 = jax.block_until_ready(Upsample(4, False)(x))
    assert y2.shape == (2, 4, 32, 32)
    assert jnp.allclose(y2, up)

    print("KERNEL_OK")
</pallas_src>

<mosaic_0001>
module attributes {stable_mosaic.version = 11 : i64} {
  func.func @_upconv_kernel(%arg0: i32, %arg1: i32, %arg2: i32, %arg3: memref<1x16x18x4xbf16, #tpu.memory_space<vmem>>, %arg4: memref<1x2x18x4xbf16, #tpu.memory_space<vmem>>, %arg5: memref<16x4x4xbf16, #tpu.memory_space<vmem>>, %arg6: memref<1x4xf32, #tpu.memory_space<vmem>>, %arg7: memref<1x4x16x16x4xf32, #tpu.memory_space<vmem>>) attributes {dimension_semantics = [#tpu.dimension_semantics<parallel>, #tpu.dimension_semantics<parallel>, #tpu.dimension_semantics<parallel>], iteration_bounds = array<i64: 1, 2, 1>, scalar_prefetch = 0 : i64, scratch_operands = 0 : i64, tpu.core_type = #tpu.core_type<tc>, window_params = [{transform_indices = @transform_0, window_bounds = array<i64: 1, 16, 18, 4>}, {transform_indices = @transform_1, window_bounds = array<i64: 1, 2, 18, 4>}, {transform_indices = @transform_2, window_bounds = array<i64: 16, 4, 4>}, {transform_indices = @transform_3, window_bounds = array<i64: 1, 4>}, {transform_indices = @transform_4, window_bounds = array<i64: 1, 4, 16, 16, 4>}]} {
    %c0 = arith.constant 0 : index
    %c0_0 = arith.constant 0 : index
    %c0_1 = arith.constant 0 : index
    %c0_2 = arith.constant 0 : index
    %0 = vector.load %arg3[%c0, %c0_0, %c0_1, %c0_2] : memref<1x16x18x4xbf16, #tpu.memory_space<vmem>>, vector<1x16x18x4xbf16>
    %1 = vector.shape_cast %0 : vector<1x16x18x4xbf16> to vector<16x18x4xbf16>
    %c0_3 = arith.constant 0 : index
    %c0_4 = arith.constant 0 : index
    %c0_5 = arith.constant 0 : index
    %c0_6 = arith.constant 0 : index
    %2 = vector.load %arg4[%c0_3, %c0_4, %c0_5, %c0_6] : memref<1x2x18x4xbf16, #tpu.memory_space<vmem>>, vector<1x2x18x4xbf16>
    %3 = vector.shape_cast %2 : vector<1x2x18x4xbf16> to vector<2x18x4xbf16>
    %c0_7 = arith.constant 0 : index
    %c0_8 = arith.constant 0 : index
    %4 = vector.load %arg6[%c0_7, %c0_8] : memref<1x4xf32, #tpu.memory_space<vmem>>, vector<1x4xf32>
    %5 = vector.shape_cast %4 : vector<1x4xf32> to vector<1x4xf32>
    %6 = vector.broadcast %5 : vector<1x4xf32> to vector<256x4xf32>
    %7 = vector.extract_strided_slice %1 {offsets = [0, 0, 0], sizes = [16, 16, 4], strides = [1, 1, 1]} : vector<16x18x4xbf16> to vector<16x16x4xbf16>
    %8 = vector.extract_strided_slice %3 {offsets = [0, 0, 0], sizes = [2, 16, 4], strides = [1, 1, 1]} : vector<2x18x4xbf16> to vector<2x16x4xbf16>
    %9 = tpu.concatenate %7, %8 in 0 : vector<16x16x4xbf16>, vector<2x16x4xbf16> -> vector<18x16x4xbf16>
    %10 = vector.shape_cast %9 : vector<18x16x4xbf16> to vector<288x4xbf16>
    %11 = vector.extract_strided_slice %1 {offsets = [0, 1, 0], sizes = [16, 16, 4], strides = [1, 1, 1]} : vector<16x18x4xbf16> to vector<16x16x4xbf16>
    %12 = vector.extract_strided_slice %3 {offsets = [0, 1, 0], sizes = [2, 16, 4], strides = [1, 1, 1]} : vector<2x18x4xbf16> to vector<2x16x4xbf16>
    %13 = tpu.concatenate %11, %12 in 0 : vector<16x16x4xbf16>, vector<2x16x4xbf16> -> vector<18x16x4xbf16>
    %14 = vector.shape_cast %13 : vector<18x16x4xbf16> to vector<288x4xbf16>
    %15 = vector.extract_strided_slice %1 {offsets = [0, 2, 0], sizes = [16, 16, 4], strides = [1, 1, 1]} : vector<16x18x4xbf16> to vector<16x16x4xbf16>
    %16 = vector.extract_strided_slice %3 {offsets = [0, 2, 0], sizes = [2, 16, 4], strides = [1, 1, 1]} : vector<2x18x4xbf16> to vector<2x16x4xbf16>
    %17 = tpu.concatenate %15, %16 in 0 : vector<16x16x4xbf16>, vector<2x16x4xbf16> -> vector<18x16x4xbf16>
    %18 = vector.shape_cast %17 : vector<18x16x4xbf16> to vector<288x4xbf16>
    %19 = vector.extract_strided_slice %10 {offsets = [0, 0], sizes = [256, 4], strides = [1, 1]} : vector<288x4xbf16> to vector<256x4xbf16>
    %c0_9 = arith.constant 0 : index
    %c0_10 = arith.constant 0 : index
    %c0_11 = arith.constant 0 : index
    %20 = vector.load %arg5[%c0_9, %c0_10, %c0_11] : memref<16x4x4xbf16, #tpu.memory_space<vmem>>, vector<1x4x4xbf16>
    %21 = vector.shape_cast %20 : vector<1x4x4xbf16> to vector<4x4xbf16>
    %cst = arith.constant dense<0.000000e+00> : vector<256x4xf32>
    %22 = tpu.matmul %19, %21, %cst {dimension_numbers = #tpu.dot_dimension_numbers<[1], [0], [0], [1], [0, 0, 1, 1], [], []>} : vector<256x4xbf16>, vector<4x4xbf16>, vector<256x4xf32> -> vector<256x4xf32>
    %23 = arith.addf %6, %22 : vector<256x4xf32>
    %24 = vector.extract_strided_slice %14 {offsets = [0, 0], sizes = [256, 4], strides = [1, 1]} : vector<288x4xbf16> to vector<256x4xbf16>
    %c1 = arith.constant 1 : index
    %c0_12 = arith.constant 0 : index
    %c0_13 = arith.constant 0 : index
    %25 = vector.load %arg5[%c1, %c0_12, %c0_13] : memref<16x4x4xbf16, #tpu.memory_space<vmem>>, vector<1x4x4xbf16>
    %26 = vector.shape_cast %25 : vector<1x4x4xbf16> to vector<4x4xbf16>
    %cst_14 = arith.constant dense<0.000000e+00> : vector<256x4xf32>
    %27 = tpu.matmul %24, %26, %cst_14 {dimension_numbers = #tpu.dot_dimension_numbers<[1], [0], [0], [1], [0, 0, 1, 1], [], []>} : vector<256x4xbf16>, vector<4x4xbf16>, vector<256x4xf32> -> vector<256x4xf32>
    %28 = arith.addf %23, %27 : vector<256x4xf32>
    %29 = vector.extract_strided_slice %10 {offsets = [16, 0], sizes = [256, 4], strides = [1, 1]} : vector<288x4xbf16> to vector<256x4xbf16>
    %c2 = arith.constant 2 : index
    %c0_15 = arith.constant 0 : index
    %c0_16 = arith.constant 0 : index
    %30 = vector.load %arg5[%c2, %c0_15, %c0_16] : memref<16x4x4xbf16, #tpu.memory_space<vmem>>, vector<1x4x4xbf16>
    %31 = vector.shape_cast %30 : vector<1x4x4xbf16> to vector<4x4xbf16>
    %cst_17 = arith.constant dense<0.000000e+00> : vector<256x4xf32>
    %32 = tpu.matmul %29, %31, %cst_17 {dimension_numbers = #tpu.dot_dimension_numbers<[1], [0], [0], [1], [0, 0, 1, 1], [], []>} : vector<256x4xbf16>, vector<4x4xbf16>, vector<256x4xf32> -> vector<256x4xf32>
    %33 = arith.addf %28, %32 : vector<256x4xf32>
    %34 = vector.extract_strided_slice %14 {offsets = [16, 0], sizes = [256, 4], strides = [1, 1]} : vector<288x4xbf16> to vector<256x4xbf16>
    %c3 = arith.constant 3 : index
    %c0_18 = arith.constant 0 : index
    %c0_19 = arith.constant 0 : index
    %35 = vector.load %arg5[%c3, %c0_18, %c0_19] : memref<16x4x4xbf16, #tpu.memory_space<vmem>>, vector<1x4x4xbf16>
    %36 = vector.shape_cast %35 : vector<1x4x4xbf16> to vector<4x4xbf16>
    %cst_20 = arith.constant dense<0.000000e+00> : vector<256x4xf32>
    %37 = tpu.matmul %34, %36, %cst_20 {dimension_numbers = #tpu.dot_dimension_numbers<[1], [0], [0], [1], [0, 0, 1, 1], [], []>} : vector<256x4xbf16>, vector<4x4xbf16>, vector<256x4xf32> -> vector<256x4xf32>
    %38 = arith.addf %33, %37 : vector<256x4xf32>
    %39 = vector.shape_cast %38 : vector<256x4xf32> to vector<16x16x4xf32>
    %c0_21 = arith.constant 0 : index
    %c0_22 = arith.constant 0 : index
    %c0_23 = arith.constant 0 : index
    %c0_24 = arith.constant 0 : index
    %c0_25 = arith.constant 0 : index
    %40 = vector.load %arg7[%c0_21, %c0_22, %c0_23, %c0_24, %c0_25] : memref<1x4x16x16x4xf32, #tpu.memory_space<vmem>>, vector<1x1x16x16x4xf32>
    %41 = vector.shape_cast %40 : vector<1x1x16x16x4xf32> to vector<16x16x4xf32>
    %42 = vector.shape_cast %39 : vector<16x16x4xf32> to vector<1x1x16x16x4xf32>
    tpu.vector_store %arg7[%c0_21, %c0_22, %c0_23, %c0_24, %c0_25], %42 {strides = array<i32>} : memref<1x4x16x16x4xf32, #tpu.memory_space<vmem>>, vector<1x1x16x16x4xf32>,
    %43 = vector.extract_strided_slice %14 {offsets = [0, 0], sizes = [256, 4], strides = [1, 1]} : vector<288x4xbf16> to vector<256x4xbf16>
    %c4 = arith.constant 4 : index
    %c0_26 = arith.constant 0 : index
    %c0_27 = arith.constant 0 : index
    %44 = vector.load %arg5[%c4, %c0_26, %c0_27] : memref<16x4x4xbf16, #tpu.memory_space<vmem>>, vector<1x4x4xbf16>
    %45 = vector.shape_cast %44 : vector<1x4x4xbf16> to vector<4x4xbf16>
    %cst_28 = arith.constant dense<0.000000e+00> : vector<256x4xf32>
    %46 = tpu.matmul %43, %45, %cst_28 {dimension_numbers = #tpu.dot_dimension_numbers<[1], [0], [0], [1], [0, 0, 1, 1], [], []>} : vector<256x4xbf16>, vector<4x4xbf16>, vector<256x4xf32> -> vector<256x4xf32>
    %47 = arith.addf %6, %46 : vector<256x4xf32>
    %48 = vector.extract_strided_slice %18 {offsets = [0, 0], sizes = [256, 4], strides = [1, 1]} : vector<288x4xbf16> to vector<256x4xbf16>
    %c5 = arith.constant 5 : index
    %c0_29 = arith.constant 0 : index
    %c0_30 = arith.constant 0 : index
    %49 = vector.load %arg5[%c5, %c0_29, %c0_30] : memref<16x4x4xbf16, #tpu.memory_space<vmem>>, vector<1x4x4xbf16>
    %50 = vector.shape_cast %49 : vector<1x4x4xbf16> to vector<4x4xbf16>
    %cst_31 = arith.constant dense<0.000000e+00> : vector<256x4xf32>
    %51 = tpu.matmul %48, %50, %cst_31 {dimension_numbers = #tpu.dot_dimension_numbers<[1], [0], [0], [1], [0, 0, 1, 1], [], []>} : vector<256x4xbf16>, vector<4x4xbf16>, vector<256x4xf32> -> vector<256x4xf32>
    %52 = arith.addf %47, %51 : vector<256x4xf32>
    %53 = vector.extract_strided_slice %14 {offsets = [16, 0], sizes = [256, 4], strides = [1, 1]} : vector<288x4xbf16> to vector<256x4xbf16>
    %c6 = arith.constant 6 : index
    %c0_32 = arith.constant 0 : index
    %c0_33 = arith.constant 0 : index
    %54 = vector.load %arg5[%c6, %c0_32, %c0_33] : memref<16x4x4xbf16, #tpu.memory_space<vmem>>, vector<1x4x4xbf16>
    %55 = vector.shape_cast %54 : vector<1x4x4xbf16> to vector<4x4xbf16>
    %cst_34 = arith.constant dense<0.000000e+00> : vector<256x4xf32>
    %56 = tpu.matmul %53, %55, %cst_34 {dimension_numbers = #tpu.dot_dimension_numbers<[1], [0], [0], [1], [0, 0, 1, 1], [], []>} : vector<256x4xbf16>, vector<4x4xbf16>, vector<256x4xf32> -> vector<256x4xf32>
    %57 = arith.addf %52, %56 : vector<256x4xf32>
    %58 = vector.extract_strided_slice %18 {offsets = [16, 0], sizes = [256, 4], strides = [1, 1]} : vector<288x4xbf16> to vector<256x4xbf16>
    %c7 = arith.constant 7 : index
    %c0_35 = arith.constant 0 : index
    %c0_36 = arith.constant 0 : index
    %59 = vector.load %arg5[%c7, %c0_35, %c0_36] : memref<16x4x4xbf16, #tpu.memory_space<vmem>>, vector<1x4x4xbf16>
    %60 = vector.shape_cast %59 : vector<1x4x4xbf16> to vector<4x4xbf16>
    %cst_37 = arith.constant dense<0.000000e+00> : vector<256x4xf32>
    %61 = tpu.matmul %58, %60, %cst_37 {dimension_numbers = #tpu.dot_dimension_numbers<[1], [0], [0], [1], [0, 0, 1, 1], [], []>} : vector<256x4xbf16>, vector<4x4xbf16>, vector<256x4xf32> -> vector<256x4xf32>
    %62 = arith.addf %57, %61 : vector<256x4xf32>
    %63 = vector.shape_cast %62 : vector<256x4xf32> to vector<16x16x4xf32>
    %c0_38 = arith.constant 0 : index
    %c1_39 = arith.constant 1 : index
    %c0_40 = arith.constant 0 : index
    %c0_41 = arith.constant 0 : index
    %c0_42 = arith.constant 0 : index
    %64 = vector.load %arg7[%c0_38, %c1_39, %c0_40, %c0_41, %c0_42] : memref<1x4x16x16x4xf32, #tpu.memory_space<vmem>>, vector<1x1x16x16x4xf32>
    %65 = vector.shape_cast %64 : vector<1x1x16x16x4xf32> to vector<16x16x4xf32>
    %66 = vector.shape_cast %63 : vector<16x16x4xf32> to vector<1x1x16x16x4xf32>
    tpu.vector_store %arg7[%c0_38, %c1_39, %c0_40, %c0_41, %c0_42], %66 {strides = array<i32>} : memref<1x4x16x16x4xf32, #tpu.memory_space<vmem>>, vector<1x1x16x16x4xf32>,
    %67 = vector.extract_strided_slice %10 {offsets = [16, 0], sizes = [256, 4], strides = [1, 1]} : vector<288x4xbf16> to vector<256x4xbf16>
    %c8 = arith.constant 8 : index
    %c0_43 = arith.constant 0 : index
    %c0_44 = arith.constant 0 : index
    %68 = vector.load %arg5[%c8, %c0_43, %c0_44] : memref<16x4x4xbf16, #tpu.memory_space<vmem>>, vector<1x4x4xbf16>
    %69 = vector.shape_cast %68 : vector<1x4x4xbf16> to vector<4x4xbf16>
    %cst_45 = arith.constant dense<0.000000e+00> : vector<256x4xf32>
    %70 = tpu.matmul %67, %69, %cst_45 {dimension_numbers = #tpu.dot_dimension_numbers<[1], [0], [0], [1], [0, 0, 1, 1], [], []>} : vector<256x4xbf16>, vector<4x4xbf16>, vector<256x4xf32> -> vector<256x4xf32>
    %71 = arith.addf %6, %70 : vector<256x4xf32>
    %72 = vector.extract_strided_slice %14 {offsets = [16, 0], sizes = [256, 4], strides = [1, 1]} : vector<288x4xbf16> to vector<256x4xbf16>
    %c9 = arith.constant 9 : index
    %c0_46 = arith.constant 0 : index
    %c0_47 = arith.constant 0 : index
    %73 = vector.load %arg5[%c9, %c0_46, %c0_47] : memref<16x4x4xbf16, #tpu.memory_space<vmem>>, vector<1x4x4xbf16>
    %74 = vector.shape_cast %73 : vector<1x4x4xbf16> to vector<4x4xbf16>
    %cst_48 = arith.constant dense<0.000000e+00> : vector<256x4xf32>
    %75 = tpu.matmul %72, %74, %cst_48 {dimension_numbers = #tpu.dot_dimension_numbers<[1], [0], [0], [1], [0, 0, 1, 1], [], []>} : vector<256x4xbf16>, vector<4x4xbf16>, vector<256x4xf32> -> vector<256x4xf32>
    %76 = arith.addf %71, %75 : vector<256x4xf32>
    %77 = vector.extract_strided_slice %10 {offsets = [32, 0], sizes = [256, 4], strides = [1, 1]} : vector<288x4xbf16> to vector<256x4xbf16>
    %c10 = arith.constant 10 : index
    %c0_49 = arith.constant 0 : index
    %c0_50 = arith.constant 0 : index
    %78 = vector.load %arg5[%c10, %c0_49, %c0_50] : memref<16x4x4xbf16, #tpu.memory_space<vmem>>, vector<1x4x4xbf16>
    %79 = vector.shape_cast %78 : vector<1x4x4xbf16> to vector<4x4xbf16>
    %cst_51 = arith.constant dense<0.000000e+00> : vector<256x4xf32>
    %80 = tpu.matmul %77, %79, %cst_51 {dimension_numbers = #tpu.dot_dimension_numbers<[1], [0], [0], [1], [0, 0, 1, 1], [], []>} : vector<256x4xbf16>, vector<4x4xbf16>, vector<256x4xf32> -> vector<256x4xf32>
    %81 = arith.addf %76, %80 : vector<256x4xf32>
    %82 = vector.extract_strided_slice %14 {offsets = [32, 0], sizes = [256, 4], strides = [1, 1]} : vector<288x4xbf16> to vector<256x4xbf16>
    %c11 = arith.constant 11 : index
    %c0_52 = arith.constant 0 : index
    %c0_53 = arith.constant 0 : index
    %83 = vector.load %arg5[%c11, %c0_52, %c0_53] : memref<16x4x4xbf16, #tpu.memory_space<vmem>>, vector<1x4x4xbf16>
    %84 = vector.shape_cast %83 : vector<1x4x4xbf16> to vector<4x4xbf16>
    %cst_54 = arith.constant dense<0.000000e+00> : vector<256x4xf32>
    %85 = tpu.matmul %82, %84, %cst_54 {dimension_numbers = #tpu.dot_dimension_numbers<[1], [0], [0], [1], [0, 0, 1, 1], [], []>} : vector<256x4xbf16>, vector<4x4xbf16>, vector<256x4xf32> -> vector<256x4xf32>
    %86 = arith.addf %81, %85 : vector<256x4xf32>
    %87 = vector.shape_cast %86 : vector<256x4xf32> to vector<16x16x4xf32>
    %c0_55 = arith.constant 0 : index
    %c2_56 = arith.constant 2 : index
    %c0_57 = arith.constant 0 : index
    %c0_58 = arith.constant 0 : index
    %c0_59 = arith.constant 0 : index
    %88 = vector.load %arg7[%c0_55, %c2_56, %c0_57, %c0_58, %c0_59] : memref<1x4x16x16x4xf32, #tpu.memory_space<vmem>>, vector<1x1x16x16x4xf32>
    %89 = vector.shape_cast %88 : vector<1x1x16x16x4xf32> to vector<16x16x4xf32>
    %90 = vector.shape_cast %87 : vector<16x16x4xf32> to vector<1x1x16x16x4xf32>
    tpu.vector_store %arg7[%c0_55, %c2_56, %c0_57, %c0_58, %c0_59], %90 {strides = array<i32>} : memref<1x4x16x16x4xf32, #tpu.memory_space<vmem>>, vector<1x1x16x16x4xf32>,
    %91 = vector.extract_strided_slice %14 {offsets = [16, 0], sizes = [256, 4], strides = [1, 1]} : vector<288x4xbf16> to vector<256x4xbf16>
    %c12 = arith.constant 12 : index
    %c0_60 = arith.constant 0 : index
    %c0_61 = arith.constant 0 : index
    %92 = vector.load %arg5[%c12, %c0_60, %c0_61] : memref<16x4x4xbf16, #tpu.memory_space<vmem>>, vector<1x4x4xbf16>
    %93 = vector.shape_cast %92 : vector<1x4x4xbf16> to vector<4x4xbf16>
    %cst_62 = arith.constant dense<0.000000e+00> : vector<256x4xf32>
    %94 = tpu.matmul %91, %93, %cst_62 {dimension_numbers = #tpu.dot_dimension_numbers<[1], [0], [0], [1], [0, 0, 1, 1], [], []>} : vector<256x4xbf16>, vector<4x4xbf16>, vector<256x4xf32> -> vector<256x4xf32>
    %95 = arith.addf %6, %94 : vector<256x4xf32>
    %96 = vector.extract_strided_slice %18 {offsets = [16, 0], sizes = [256, 4], strides = [1, 1]} : vector<288x4xbf16> to vector<256x4xbf16>
    %c13 = arith.constant 13 : index
    %c0_63 = arith.constant 0 : index
    %c0_64 = arith.constant 0 : index
    %97 = vector.load %arg5[%c13, %c0_63, %c0_64] : memref<16x4x4xbf16, #tpu.memory_space<vmem>>, vector<1x4x4xbf16>
    %98 = vector.shape_cast %97 : vector<1x4x4xbf16> to vector<4x4xbf16>
    %cst_65 = arith.constant dense<0.000000e+00> : vector<256x4xf32>
    %99 = tpu.matmul %96, %98, %cst_65 {dimension_numbers = #tpu.dot_dimension_numbers<[1], [0], [0], [1], [0, 0, 1, 1], [], []>} : vector<256x4xbf16>, vector<4x4xbf16>, vector<256x4xf32> -> vector<256x4xf32>
    %100 = arith.addf %95, %99 : vector<256x4xf32>
    %101 = vector.extract_strided_slice %14 {offsets = [32, 0], sizes = [256, 4], strides = [1, 1]} : vector<288x4xbf16> to vector<256x4xbf16>
    %c14 = arith.constant 14 : index
    %c0_66 = arith.constant 0 : index
    %c0_67 = arith.constant 0 : index
    %102 = vector.load %arg5[%c14, %c0_66, %c0_67] : memref<16x4x4xbf16, #tpu.memory_space<vmem>>, vector<1x4x4xbf16>
    %103 = vector.shape_cast %102 : vector<1x4x4xbf16> to vector<4x4xbf16>
    %cst_68 = arith.constant dense<0.000000e+00> : vector<256x4xf32>
    %104 = tpu.matmul %101, %103, %cst_68 {dimension_numbers = #tpu.dot_dimension_numbers<[1], [0], [0], [1], [0, 0, 1, 1], [], []>} : vector<256x4xbf16>, vector<4x4xbf16>, vector<256x4xf32> -> vector<256x4xf32>
    %105 = arith.addf %100, %104 : vector<256x4xf32>
    %106 = vector.extract_strided_slice %18 {offsets = [32, 0], sizes = [256, 4], strides = [1, 1]} : vector<288x4xbf16> to vector<256x4xbf16>
    %c15 = arith.constant 15 : index
    %c0_69 = arith.constant 0 : index
    %c0_70 = arith.constant 0 : index
    %107 = vector.load %arg5[%c15, %c0_69, %c0_70] : memref<16x4x4xbf16, #tpu.memory_space<vmem>>, vector<1x4x4xbf16>
    %108 = vector.shape_cast %107 : vector<1x4x4xbf16> to vector<4x4xbf16>
    %cst_71 = arith.constant dense<0.000000e+00> : vector<256x4xf32>
    %109 = tpu.matmul %106, %108, %cst_71 {dimension_numbers = #tpu.dot_dimension_numbers<[1], [0], [0], [1], [0, 0, 1, 1], [], []>} : vector<256x4xbf16>, vector<4x4xbf16>, vector<256x4xf32> -> vector<256x4xf32>
    %110 = arith.addf %105, %109 : vector<256x4xf32>
    %111 = vector.shape_cast %110 : vector<256x4xf32> to vector<16x16x4xf32>
    %c0_72 = arith.constant 0 : index
    %c3_73 = arith.constant 3 : index
    %c0_74 = arith.constant 0 : index
    %c0_75 = arith.constant 0 : index
    %c0_76 = arith.constant 0 : index
    %112 = vector.load %arg7[%c0_72, %c3_73, %c0_74, %c0_75, %c0_76] : memref<1x4x16x16x4xf32, #tpu.memory_space<vmem>>, vector<1x1x16x16x4xf32>
    %113 = vector.shape_cast %112 : vector<1x1x16x16x4xf32> to vector<16x16x4xf32>
    %114 = vector.shape_cast %111 : vector<16x16x4xf32> to vector<1x1x16x16x4xf32>
    tpu.vector_store %arg7[%c0_72, %c3_73, %c0_74, %c0_75, %c0_76], %114 {strides = array<i32>} : memref<1x4x16x16x4xf32, #tpu.memory_space<vmem>>, vector<1x1x16x16x4xf32>,
    return
  }
  func.func @transform_0(%arg0: i32, %arg1: i32, %arg2: i32) -> (i32, i32, i32, i32) {
    %c0_i32 = arith.constant 0 : i32
    %c0_i32_0 = arith.constant 0 : i32
    %c0_i32_1 = arith.constant 0 : i32
    return %arg1, %arg2, %c0_i32, %c0_i32_0 : i32, i32, i32, i32
  }
  func.func @transform_1(%arg0: i32, %arg1: i32, %arg2: i32) -> (i32, i32, i32, i32) {
    %c1_i32 = arith.constant 1 : i32
    %0 = arith.addi %arg2, %c1_i32 : i32
    %c8_i32 = arith.constant 8 : i32
    %1 = arith.muli %0, %c8_i32 : i32
    %c0_i32 = arith.constant 0 : i32
    %c0_i32_0 = arith.constant 0 : i32
    %c0_i32_1 = arith.constant 0 : i32
    return %arg1, %1, %c0_i32, %c0_i32_0 : i32, i32, i32, i32
  }
  func.func @transform_2(%arg0: i32, %arg1: i32, %arg2: i32) -> (i32, i32, i32) {
    %c0_i32 = arith.constant 0 : i32
    %c0_i32_0 = arith.constant 0 : i32
    %c0_i32_1 = arith.constant 0 : i32
    return %c0_i32, %c0_i32_0, %arg0 : i32, i32, i32
  }
  func.func @transform_3(%arg0: i32, %arg1: i32, %arg2: i32) -> (i32, i32) {
    %c0_i32 = arith.constant 0 : i32
    %c0_i32_0 = arith.constant 0 : i32
    return %c0_i32, %arg0 : i32, i32
  }
  func.func @transform_4(%arg0: i32, %arg1: i32, %arg2: i32) -> (i32, i32, i32, i32, i32) {
    %c0_i32 = arith.constant 0 : i32
    %c0_i32_0 = arith.constant 0 : i32
    %c0_i32_1 = arith.constant 0 : i32
    return %arg1, %c0_i32, %arg2, %c0_i32_0, %arg0 : i32, i32, i32, i32, i32
  }
}

</mosaic_0001>

<bundles_post_ra>
// kernel: tpu_custom_call.1
= control target key start
LH: loop header
LB: loop body
LE: loop exit
PB: predicated region body
PF: predicated region fallthrough
CT: control target
= control target key end

     0   :  { %s4310_s15 = smov 0   ;;  %s4312_s16 = smov 0   ;;  %s5659_s0 = inlined_call_operand.vmem [shape: bf16[2,18,18,4], index: 0, kind: input, shape index: {}]   ;;  %s5660_s1 = inlined_call_operand.vmem [shape: bf16[2,18,18,4], index: 1, kind: input, shape index: {}]   ;;  %s5661_s2 = inlined_call_operand.vmem [shape: bf16[16,4,4], index: 2, kind: input, shape index: {}]   ;;  %s5662_s3 = inlined_call_operand.vmem [shape: f32[1,4], index: 3, kind: input, shape index: {}]   ;;  %s5663_s4 = inlined_call_operand.vmem [shape: f32[2,4,16,16,4], index: 4, kind: output, shape index: {}]  }
   0x1   :  { %s4314_s17 = smov 0  }
   0x2 LB: > { %s29_s18 = sadd.s32 1, %s4279_s16  ;;  %p3678_p0 = scmp.ge.s32.totalorder %s4283_s17, 1  ;;  %s4283_s17 = sphi %s4314_s17, %s14_s17   ;;  %s4279_s16 = sphi %s4312_s16, %s5669_s16   ;;  %s4275_s15 = sphi %s4310_s15, %s5668_s15  }
   0x3   : > { %p31_p1 = scmp.ge.s32.totalorder %s29_s18, 2  ;;  %p246_p2 = scmp.lt.s32.totalorder %s4283_s17, 3 }
   0x5   : > { %s5671_s18 = smov (%p31_p1, %s29_s18), 0  ;;  %p247_p3 = pnand %p3678_p0, %p246_p2 }
   0x6   : > { %p315_p4 = scmp.lt.s32.totalorder (!%p247_p3), %s4275_s15, 1 }
   0x7   : > { %250 = sbr.rel (%p247_p3) target bundleno = 1188 (0x4a4), region = 36 }
   0xc   : > { %vm1141_vm0 = vcmask 1041408   ;;  %v3798_v0 = vld [vmem:[%s5661_s2 + $0x4] sm:$0x3]  ;;  %v1043_v1 = vld [vmem:[%s5661_s2] sm:$0x3]  ;;  %s5673_s15 = smov (!%p315_p4, %s4275_s15), 1 }
   0xd   : > { %v1497_v2 = vsel %vm1141_vm0, %v3798_v0, 0  ;;  %v1143_v3 = vsel %vm1141_vm0, %v1043_v1, 0  ;;  %v3781_v4 = vld [vmem:[%s5661_s2 + $0x2] sm:$0x3]  ;;  %v3819_v6 = vld [vmem:[%s5661_s2 + $0x6] sm:$0x3] }
   0xe   : > { %1506 = vmatpush.bf16.msra.mxu2 %v1497_v2  ;;  %1152 = vmatpush.bf16.msra.mxu0 %v1143_v3  ;;  %v1365_v5 = vsel %vm1141_vm0, %v3781_v4, 0  ;;  %v3870_v7 = vld [vmem:[%s5661_s2 + $0xc] sm:$0x3]  ;;  %v1629_v8 = vsel %vm1141_vm0, %v3819_v6, 0  ;;  %s4163_s29 = smul.u32 216, %s5673_s15  ;;  %vm1092_vm1 = vcmask 31744  }
   0xf   : > { %1374 = vmatpush.bf16.msra.mxu1 %v1365_v5  ;;  %v2135_v9 = vsel %vm1141_vm0, %v3870_v7, 0  ;;  %1638 = vmatpush.bf16.msra.mxu3 %v1629_v8  ;;  %v3836_v10 = vld [vmem:[%s5661_s2 + $0x8] sm:$0x3]  ;;  %v3887_v11 = vld [vmem:[%s5661_s2 + $0xe] sm:$0x3]  ;;  %s4144_s19 = sshll.u32 %s5673_s15, 10 }
  0x10   : > { %v1787_v12 = vsel %vm1141_vm0, %v3836_v10, 0  ;;  %v2267_v13 = vsel %vm1141_vm0, %v3887_v11, 0  ;;  %v3853_v14 = vld [vmem:[%s5661_s2 + $0xa] sm:$0x3]  ;;  %s4367_s12 = scalar_lea.vmem %s5659_s0, %s4163_s29  ;;  %vm425_vm2 = vsmask.f32 3328  ;;  %s4551_s22 = scalar_lea.vmem %s5663_s4, %s4144_s19 }
  0x11   : > { %v2009_v15 = vsel %vm1141_vm0, %v3853_v14, 0  ;;  %v4371_v16 = vld [vmem:[%s4367_s12 + $0xc] sm:$0xff]  ;;  %v4145_v17 = vld [vmem:[%s4367_s12] sm:$0xff]  ;;  %v369_v20 = vld [vmem:[%s4367_s12 + $0x8] sm:$0x1]  ;;  %s4143_s23 = sadd.s32 192, %s4163_s29 }
  0x12   : > { %2144 = vmatpush.bf16.msrb.mxu2 %v2135_v9  ;;  %1796 = vmatpush.bf16.msrb.mxu0 %v1787_v12  ;;  %v367_v18 = vld [vmem:[%s4367_s12] sm:$0xf]  ;;  %v368_v19 = vld [vmem:[%s4367_s12 + $0x4] sm:$0xf]  ;;  %v448_v25 = vshll.u32 %v369_v20, 16  ;;  %v4147_v8 = vld [vmem:[%s4367_s12 + $0x18] sm:$0xff]  ;;  %s4662_s15 = scalar_lea.vmem %s5660_s1, %s4143_s23 }
  0x13   : > { %2276 = vmatpush.bf16.msrb.mxu3 %v2267_v13  ;;  %2018 = vmatpush.bf16.msrb.mxu1 %v2009_v15  ;;  %v429_v21 = vshrl.u32 %v367_v18, 16  ;;  %v432_v22 = vshll.u32 %v367_v18, 16  ;;  %v438_v23 = vshll.u32 %v368_v19, 16  ;;  %v442_v24 = vshrl.u32 %v368_v19, 16  ;;  %v370_v26 = vld [vmem:[%s4367_s12 + $0xc] sm:$0xf] }
  0x14   : > { %3803 = vmatmul.msk.bf16.vlgmr.msra.gmra.mxu2 %vm1092_vm1, %v4371_v16  ;;  %3765 = vmatmul.msk.bf16.vlgmr.msra.gmra.mxu0 %vm1092_vm1, %v4145_v17  ;;  %vm426_vm3 = vsmask.f32 7440  ;;  %v371_v29 = vld [vmem:[%s4367_s12 + $0x10] sm:$0xf]  ;;  %v372_v32 = vld [vmem:[%s4367_s12 + $0x14] sm:$0x1] }
  0x15   : > { %v431_v27 = vrot.slane %v429_v21, 4  ;;  %v434_v28 = vrot.slane %v432_v22, 5  ;;  %v440_v30 = vrot.slane %v438_v23, 5  ;;  %v444_v31 = vrot.slane %v442_v24, 4  ;;  %v373_v38 = vld [vmem:[%s4367_s12 + $0x18] sm:$0xf]  ;;  %vm4385_vm4 = vmor %vm425_vm2, %vm426_vm3 }
  0x16   : > { %v453_v33 = vshrl.u32 %v370_v26, 16  ;;  %v450_v35 = vrot.slane %v448_v25, 5  ;;  %v456_v36 = vshll.u32 %v370_v26, 16  ;;  %v462_v37 = vshll.u32 %v371_v29, 16  ;;  %v374_v44 = vld [vmem:[%s4367_s12 + $0x1c] sm:$0xf] }
  0x17   : > { %v435_v34 = vor.u32 %v434_v28, %v431_v27  ;;  %v445_v40 = vor.u32 %v444_v31, %v440_v30  ;;  %v466_v42 = vshrl.u32 %v371_v29, 16  ;;  %v472_v43 = vshll.u32 %v372_v32, 16  ;;  %v375_v4 = vld [vmem:[%s4367_s12 + $0x20] sm:$0x1]  ;;  %v376_v18 = vld [vmem:[%s4367_s12 + $0x24] sm:$0xf] }
  0x18   : > { %v455_v41 = vrot.slane %v453_v33, 4  ;;  %v458_v46 = vrot.slane %v456_v36, 5  ;;  %v464_v47 = vrot.slane %v462_v37, 5  ;;  %v477_v50 = vshrl.u32 %v373_v38, 16  ;;  %v377_v19 = vld [vmem:[%s4367_s12 + $0x28] sm:$0xf] }
  0x19   : > { %v436_v45 = vrot.slane %v435_v34, 4  ;;  %v446_v48 = vrot.slane %v445_v40, 4  ;;  %v468_v49 = vrot.slane %v466_v42, 4  ;;  %v480_v51 = vshll.u32 %v373_v38, 16  ;;  %v378_v31 = vld [vmem:[%s4367_s12 + $0x2c] sm:$0x1] }
  0x1a   : > { %v459_v53 = vor.u32 %v458_v46, %v455_v41  ;;  %v486_v54 = vshll.u32 %v374_v44, 16  ;;  %v474_v58 = vrot.slane %v472_v43, 5  ;;  %v490_v61 = vshrl.u32 %v374_v44, 16  ;;  %v4148_v32 = vld [vmem:[%s4367_s12 + $0x24] sm:$0xff]  ;;  %v379_v38 = vld [vmem:[%s4367_s12 + $0x30] sm:$0xf] }
  0x1b   : > { %v441_v52 = vsel %vm4385_vm4, %v436_v45, %v440_v30  ;;  %v451_v55 = vsel %vm4385_vm4, %v446_v48, %v450_v35  ;;  %v469_v57 = vor.u32 %v468_v49, %v464_v47  ;;  %v479_v63 = vrot.slane %v477_v50, 4  ;;  %v380_v42 = vld [vmem:[%s4367_s12 + $0x34] sm:$0xf] }
  0x1c   : > { %v1268_v56 = vunpack.c.l.b16 %v441_v52  ;;  %v1269_v59 = vunpack.c.l.b16 %v451_v55  ;;  %v460_v60 = vrot.slane %v459_v53, 4  ;;  %v482_v0 = vrot.slane %v480_v51, 5  ;;  %v381_v55 = vld [vmem:[%s4367_s12 + $0x38] sm:$0x1] }
  0x1d   : > { %v470_v62 = vrot.slane %v469_v57, 4  ;;  %v488_v1 = vrot.slane %v486_v54, 5  ;;  %v492_v5 = vrot.slane %v490_v61, 4  ;;  %v496_v12 = vshll.u32 %v375_v4, 16 }
  0x1e   : > { %v4394_v2 = vpack.c.b16 %v1269_v59, %v1268_v56  ;;  %v465_v3 = vsel %vm4385_vm4, %v460_v60, %v464_v47  ;;  %v483_v10 = vor.u32 %v482_v0, %v479_v63  ;;  %v501_v20 = vshrl.u32 %v376_v18, 16  ;;  %v4149_v56 = vld [vmem:[%s4367_s12 + $0x30] sm:$0xff]  ;;  %v382_v0 = vld [vmem:[%s4367_s12 + $0x3c] sm:$0xf] }
  0x1f   : > { %v475_v6 = vsel %vm4385_vm4, %v470_v62, %v474_v58  ;;  %v1270_v7 = vunpack.c.l.b16 %v465_v3  ;;  %v493_v11 = vor.u32 %v492_v5, %v488_v1  ;;  %v498_v17 = vrot.slane %v496_v12, 5 }
  0x20   : > { %3782 = vmatmul.msk.bf16.vlgmr.msra.gmra.mxu1 %vm1092_vm1, %v4394_v2  ;;  %v1271_v9 = vunpack.c.l.b16 %v475_v6  ;;  %v484_v14 = vrot.slane %v483_v10, 4  ;;  %v504_v21 = vshll.u32 %v376_v18, 16  ;;  %v510_v24 = vshll.u32 %v377_v19, 16  ;;  %v4150_v18 = vld [vmem:[%s4367_s12 + $0x3c] sm:$0xff] }
  0x21   : > { %v494_v15 = vrot.slane %v493_v11, 4  ;;  %v503_v27 = vrot.slane %v501_v20, 4  ;;  %v520_v36 = vshll.u32 %v378_v31, 16  ;;  %v525_v43 = vshrl.u32 %v379_v38, 16 }
  0x22   : > { %v4404_v13 = vpack.c.b16 %v1271_v9, %v1270_v7  ;;  %v489_v22 = vsel %vm4385_vm4, %v484_v14, %v488_v1  ;;  %v506_v28 = vrot.slane %v504_v21, 5  ;;  %v512_v29 = vrot.slane %v510_v24, 5  ;;  %v383_v1 = vld [vmem:[%s4367_s12 + $0x40] sm:$0xf]  ;;  %v386_v24 = vld [vmem:[%s4367_s12 + $0x4c] sm:$0xf] }
  0x23   : > { %v499_v23 = vsel %vm4385_vm4, %v494_v15, %v498_v17  ;;  %v1272_v25 = vunpack.c.l.b16 %v489_v22  ;;  %v522_v41 = vrot.slane %v520_v36, 5  ;;  %v528_v45 = vshll.u32 %v379_v38, 16  ;;  %v384_v17 = vld [vmem:[%s4367_s12 + $0x44] sm:$0x1] }
  0x24   : > { %3804 = vmatmul.msk.bf16.gmra.mxu2 %vm1092_vm1, %v4147_v8  ;;  %3766 = vmatmul.msk.bf16.gmra.mxu0 %vm1092_vm1, %v4371_v16  ;;  %v514_v16 = vshrl.u32 %v377_v19, 16  ;;  %v1273_v26 = vunpack.c.l.b16 %v499_v23  ;;  %v507_v34 = vor.u32 %v506_v28, %v503_v27  ;;  %v534_v46 = vshll.u32 %v380_v42, 16  ;;  %v385_v23 = vld [vmem:[%s4367_s12 + $0x48] sm:$0xf] }
  0x25   : > { %3820 = vmatmul.msk.bf16.vlgmr.msra.gmra.mxu3 %vm1092_vm1, %v4404_v13  ;;  %v538_v47 = vshrl.u32 %v380_v42, 16  ;;  %v527_v50 = vrot.slane %v525_v43, 4  ;;  %v530_v52 = vrot.slane %v528_v45, 5  ;;  %v544_v60 = vshll.u32 %v381_v55, 16  ;;  %v4151_v42 = vld [vmem:[%s4367_s12 + $0x48] sm:$0xff] }
  0x26   : > { %v516_v30 = vrot.slane %v514_v16, 4  ;;  %v4421_v33 = vpack.c.b16 %v1273_v26, %v1272_v25  ;;  %v508_v37 = vrot.slane %v507_v34, 4  ;;  %v536_v53 = vrot.slane %v534_v46, 5 }
  0x27   : > { %v540_v54 = vrot.slane %v538_v47, 4  ;;  %v531_v58 = vor.u32 %v530_v52, %v527_v50  ;;  %v546_v63 = vrot.slane %v544_v60, 5  ;;  %v549_v5 = vshrl.u32 %v382_v0, 16  ;;  %v388_v50 = vld [vmem:[%s4367_s12 + $0x54] sm:$0xf] }
  0x28   : > { %v517_v35 = vor.u32 %v516_v30, %v512_v29  ;;  %v513_v44 = vsel %vm4385_vm4, %v508_v37, %v512_v29  ;;  %v552_v6 = vshll.u32 %v382_v0, 16  ;;  %v558_v7 = vshll.u32 %v383_v1, 16 }
  0x29   : > { %v1274_v49 = vunpack.c.l.b16 %v513_v44  ;;  %v541_v59 = vor.u32 %v540_v54, %v536_v53  ;;  %v532_v61 = vrot.slane %v531_v58, 4  ;;  %v551_v11 = vrot.slane %v549_v5, 4 }
  0x2a   : > { %v518_v40 = vrot.slane %v517_v35, 4  ;;  %v554_v12 = vrot.slane %v552_v6, 5  ;;  %v560_v14 = vrot.slane %v558_v7, 5  ;;  %v568_v22 = vshll.u32 %v384_v17, 16 }
  0x2b   : > { %v542_v62 = vrot.slane %v541_v59, 4  ;;  %v537_v3 = vsel %vm4385_vm4, %v532_v61, %v536_v53  ;;  %v573_v27 = vshrl.u32 %v385_v23, 16  ;;  %v576_v28 = vshll.u32 %v385_v23, 16 }
  0x2c   : > { %v523_v48 = vsel %vm4385_vm4, %v518_v40, %v522_v41  ;;  %v1276_v9 = vunpack.c.l.b16 %v537_v3  ;;  %v555_v20 = vor.u32 %v554_v12, %v551_v11  ;;  %v570_v26 = vrot.slane %v568_v22, 5  ;;  %v387_v41 = vld [vmem:[%s4367_s12 + $0x50] sm:$0x1]  ;;  %v4152_v3 = vld [vmem:[%s4367_s12 + $0x54] sm:$0xff]  ;;  %v391_v11 = vld [vmem:[%s4367_s12 + $0x60] sm:$0xf] }
  0x2d   : > { %v1275_v51 = vunpack.c.l.b16 %v523_v48  ;;  %v547_v4 = vsel %vm4385_vm4, %v542_v62, %v546_v63  ;;  %v582_v29 = vshll.u32 %v386_v24, 16  ;;  %v586_v30 = vshrl.u32 %v386_v24, 16  ;;  %v392_v12 = vld [vmem:[%s4367_s12 + $0x64] sm:$0xf] }
  0x2e   : > { %v1277_v10 = vunpack.c.l.b16 %v547_v4  ;;  %v556_v16 = vrot.slane %v555_v20, 4  ;;  %v575_v34 = vrot.slane %v573_v27, 4  ;;  %v578_v35 = vrot.slane %v576_v28, 5  ;;  %v393_v27 = vld [vmem:[%s4367_s12 + $0x68] sm:$0x1]  ;;  %v4153_v28 = vld [vmem:[%s4367_s12 + $0x60] sm:$0xff] }
  0x2f   : > { %v4437_v57 = vpack.c.b16 %v1275_v51, %v1274_v49  ;;  %v584_v36 = vrot.slane %v582_v29, 5  ;;  %v588_v37 = vrot.slane %v586_v30, 4  ;;  %v592_v45 = vshll.u32 %v387_v41, 16  ;;  %v389_v51 = vld [vmem:[%s4367_s12 + $0x58] sm:$0xf] }
  0x30   : > { %3783 = vmatmul.msk.bf16.gmra.mxu1 %vm1092_vm1, %v4404_v13  ;;  %v4453_v19 = vpack.c.b16 %v1277_v10, %v1276_v9  ;;  %v561_v31 = vsel %vm4385_vm4, %v556_v16, %v560_v14  ;;  %v579_v43 = vor.u32 %v578_v35, %v575_v34  ;;  %v597_v54 = vshrl.u32 %v388_v50, 16  ;;  %v394_v34 = vld [vmem:[%s4367_s12 + $0x6c] sm:$0xf] }
  0x31   : > { %v1278_v38 = vunpack.c.l.b16 %v561_v31  ;;  %v589_v44 = vor.u32 %v588_v37, %v584_v36  ;;  %v594_v49 = vrot.slane %v592_v45, 5  ;;  %v600_v55 = vshll.u32 %v388_v50, 16 }
  0x32   : > { %v580_v47 = vrot.slane %v579_v43, 4  ;;  %v610_v58 = vshrl.u32 %v389_v51, 16  ;;  %v599_v61 = vrot.slane %v597_v54, 4  ;;  %v621_v17 = vshrl.u32 %v391_v11, 16  ;;  %v4154_v54 = vld [vmem:[%s4367_s12 + $0x6c] sm:$0xff] }
  0x33   : > { %v590_v48 = vrot.slane %v589_v44, 4  ;;  %v602_v62 = vrot.slane %v600_v55, 5  ;;  %v630_v20 = vshll.u32 %v392_v12, 16  ;;  %v648_v41 = vshll.u32 %v394_v34, 16 }
  0x34   : > { %3805 = vmatmul.msk.bf16.gmra.mxu2 %vm1092_vm1, %v4148_v32  ;;  %3767 = vmatmul.msk.bf16.gmra.mxu0 %vm1092_vm1, %v4147_v8  ;;  %v562_v8 = vshrl.u32 %v383_v1, 16  ;;  %v585_v52 = vsel %vm4385_vm4, %v580_v47, %v584_v36  ;;  %v612_v0 = vrot.slane %v610_v58, 4  ;;  %v390_v1 = vld [vmem:[%s4367_s12 + $0x5c] sm:$0x1]  ;;  %v623_v24 = vrot.slane %v621_v17, 4 }
  0x35   : > { %3821 = vmatmul.msk.bf16.gmra.mxu3 %vm1092_vm1, %v4421_v33  ;;  %v595_v53 = vsel %vm4385_vm4, %v590_v48, %v594_v49  ;;  %v1280_v59 = vunpack.c.l.b16 %v585_v52  ;;  %v603_v5 = vor.u32 %v602_v62, %v599_v61  ;;  %v616_v7 = vshll.u32 %v390_v1, 16  ;;  %v398_v1 = vld [vmem:[%s4367_s12 + $0x7c] sm:$0xf] }
  0x36   : > { %v564_v15 = vrot.slane %v562_v8, 4  ;;  %v1281_v60 = vunpack.c.l.b16 %v595_v53  ;;  %v650_v48 = vrot.slane %v648_v41, 5  ;;  %v396_v53 = vld [vmem:[%s4367_s12 + $0x74] sm:$0x1]  ;;  %v400_v41 = vld [vmem:[%s4367_s12 + $0x84] sm:$0xf] }
  0x37   : > { %v604_v8 = vrot.slane %v603_v5, 4  ;;  %v618_v10 = vrot.slane %v616_v7, 5  ;;  %v4530_v7 = vld [vmem:[%s5662_s3] ss:$0 sm:$0xff]  ;;  %vm914_vm5 = vcmask 1042432   ;;  %vm915_vm6 = vcmask 1046532  }
  0x38   : > { %v565_v21 = vor.u32 %v564_v15, %v560_v14  ;;  %v4485_v4 = vpack.c.b16 %v1281_v60, %v1280_v59  ;;  %v664_v60 = vshll.u32 %v396_v53, 16  ;;  %vm4687_vm7 = vmor %vm914_vm5, %vm915_vm6 }
  0x3a   : > { %v566_v25 = vrot.slane %v565_v21, 4  ;;  %v634_v21 = vshrl.u32 %v392_v12, 16  ;;  %v682_v12 = vshrl.u32 %v398_v1, 16 }
  0x40   : > { %3784 = vmatmul.msk.bf16.gmra.mxu1 %vm1092_vm1, %v4421_v33 }
  0x44   : > { %3806 = vmatmul.msk.bf16.gmra.mxu2 %vm1092_vm1, %v4149_v56  ;;  %3768 = vmatmul.msk.bf16.gmra.mxu0 %vm1092_vm1, %v4148_v32  ;;  %v571_v32 = vsel %vm4385_vm4, %v566_v25, %v570_v26  ;;  %v632_v25 = vrot.slane %v630_v20, 5  ;;  %v636_v26 = vrot.slane %v634_v21, 4 }
  0x45   : > { %3822 = vmatmul.msk.bf16.gmra.mxu3 %vm1092_vm1, %v4437_v57  ;;  %v1279_v40 = vunpack.c.l.b16 %v571_v32  ;;  %v640_v32 = vshll.u32 %v393_v27, 16 }
  0x46   : > { %v637_v31 = vor.u32 %v636_v26, %v632_v25  ;;  %v4155_v26 = vld [vmem:[%s4367_s12 + $0x78] sm:$0xff] }
  0x47   : > { %v4469_v46 = vpack.c.b16 %v1279_v40, %v1278_v38  ;;  %v642_v37 = vrot.slane %v640_v32, 5  ;;  %v395_v38 = vld [vmem:[%s4367_s12 + $0x70] sm:$0xf]  ;;  %v645_v40 = vshrl.u32 %v394_v34, 16 }
  0x48   : > { %v638_v36 = vrot.slane %v637_v31, 4  ;;  %v658_v43 = vshrl.u32 %v395_v38, 16 }
  0x49   : > { %v647_v47 = vrot.slane %v645_v40, 4 }
  0x4a   : > { %v643_v45 = vsel %vm4385_vm4, %v638_v36, %v642_v37  ;;  %v660_v52 = vrot.slane %v658_v43, 4 }
  0x4b   : > { %v1285_v50 = vunpack.c.l.b16 %v643_v45  ;;  %v651_v55 = vor.u32 %v650_v48, %v647_v47 }
  0x4d   : > { %v652_v61 = vrot.slane %v651_v55, 4 }
  0x50   : > { %3785 = vmatmul.msk.bf16.gmra.mxu1 %vm1092_vm1, %v4437_v57 }
  0x54   : > { %3807 = vmatmul.msk.bf16.gmra.mxu2 %vm1092_vm1, %v4150_v18  ;;  %3769 = vmatmul.msk.bf16.gmra.mxu0 %vm1092_vm1, %v4149_v56  ;;  %v606_v56 = vshll.u32 %v389_v51, 16 }
  0x55   : > { %3823 = vmatmul.msk.bf16.gmra.mxu3 %vm1092_vm1, %v4453_v19 }
  0x56   : > { %v608_v63 = vrot.slane %v606_v56, 5 }
  0x58   : > { %v613_v6 = vor.u32 %v612_v0, %v608_v63  ;;  %v609_v14 = vsel %vm4385_vm4, %v604_v8, %v608_v63  ;;  %v666_v63 = vrot.slane %v664_v60, 5  ;;  %v397_v0 = vld [vmem:[%s4367_s12 + $0x78] sm:$0xf] }
  0x59   : > { %v1282_v22 = vunpack.c.l.b16 %v609_v14 }
  0x5a   : > { %v614_v9 = vrot.slane %v613_v6, 4  ;;  %v669_v6 = vshrl.u32 %v397_v0, 16 }
  0x5c   : > { %v619_v15 = vsel %vm4385_vm4, %v614_v9, %v618_v10  ;;  %v672_v10 = vshll.u32 %v397_v0, 16  ;;  %v671_v17 = vrot.slane %v669_v6, 4 }
  0x5d   : > { %v1283_v23 = vunpack.c.l.b16 %v619_v15 }
  0x5e   : > { %v674_v20 = vrot.slane %v672_v10, 5 }
  0x5f   : > { %v4501_v29 = vpack.c.b16 %v1283_v23, %v1282_v22  ;;  %v684_v22 = vrot.slane %v682_v12, 4 }
  0x60   : > { %3786 = vmatmul.msk.bf16.gmra.mxu1 %vm1092_vm1, %v4453_v19 }
  0x64   : > { %3808 = vmatmul.msk.bf16.gmra.mxu2 %vm1092_vm1, %v4151_v42  ;;  %3770 = vmatmul.msk.bf16.gmra.mxu0 %vm1092_vm1, %v4150_v18  ;;  %v624_v18 = vshll.u32 %v391_v11, 16  ;;  %v678_v11 = vshll.u32 %v398_v1, 16 }
  0x65   : > { %3824 = vmatmul.msk.bf16.gmra.mxu3 %vm1092_vm1, %v4469_v46 }
  0x66   : > { %v626_v16 = vrot.slane %v624_v18, 5  ;;  %v680_v21 = vrot.slane %v678_v11, 5 }
  0x68   : > { %v627_v30 = vor.u32 %v626_v16, %v623_v24  ;;  %v399_v24 = vld [vmem:[%s4367_s12 + $0x80] sm:$0x1]  ;;  %v685_v31 = vor.u32 %v684_v22, %v680_v21 }
  0x69   : > { %v688_v32 = vshll.u32 %v399_v24, 16 }
  0x6a   : > { %v628_v35 = vrot.slane %v627_v30, 4  ;;  %v675_v30 = vor.u32 %v674_v20, %v671_v17  ;;  %v686_v36 = vrot.slane %v685_v31, 4  ;;  %v403_v20 = vld [vmem:[%s4367_s12 + $0x90] sm:$0xf] }
  0x6b   : > { %v690_v37 = vrot.slane %v688_v32, 5  ;;  %v720_v31 = vshll.u32 %v403_v20, 16 }
  0x6c   : > { %v633_v44 = vsel %vm4385_vm4, %v628_v35, %v632_v25  ;;  %v676_v35 = vrot.slane %v675_v30, 4  ;;  %v717_v30 = vshrl.u32 %v403_v20, 16 }
  0x6d   : > { %v1284_v49 = vunpack.c.l.b16 %v633_v44 }
  0x6e   : > { %v681_v48 = vsel %vm4385_vm4, %v676_v35, %v680_v21  ;;  %v404_v21 = vld [vmem:[%s4367_s12 + $0x94] sm:$0xf] }
  0x6f   : > { %v4517_v56 = vpack.c.b16 %v1285_v50, %v1284_v49  ;;  %v691_v49 = vsel %vm4385_vm4, %v686_v36, %v690_v37  ;;  %v693_v50 = vshrl.u32 %v400_v41, 16  ;;  %v726_v32 = vshll.u32 %v404_v21, 16 }
  0x70   : > { %3787 = vmatmul.msk.bf16.gmra.mxu1 %vm1092_vm1, %v4469_v46 }
  0x74   : > { %3809 = vmatmul.msk.bf16.gmra.mxu2 %vm1092_vm1, %v4152_v3  ;;  %3771 = vmatmul.msk.bf16.gmra.mxu0 %vm1092_vm1, %v4151_v42  ;;  %v654_v42 = vshll.u32 %v395_v38, 16 }
  0x75   : > { %3825 = vmatmul.msk.bf16.gmra.mxu3 %vm1092_vm1, %v4485_v4 }
  0x76   : > { %v656_v51 = vrot.slane %v654_v42, 5  ;;  %v401_v42 = vld [vmem:[%s4367_s12 + $0x88] sm:$0xf] }
  0x77   : > { %v706_v53 = vshrl.u32 %v401_v42, 16 }
  0x78   : > { %v661_v59 = vor.u32 %v660_v52, %v656_v51  ;;  %v657_v5 = vsel %vm4385_vm4, %v652_v61, %v656_v51  ;;  %v696_v51 = vshll.u32 %v400_v41, 16  ;;  %v702_v52 = vshll.u32 %v401_v42, 16 }
  0x79   : > { %v1286_v14 = vunpack.c.l.b16 %v657_v5  ;;  %v695_v61 = vrot.slane %v693_v50, 4  ;;  %v708_v0 = vrot.slane %v706_v53, 4  ;;  %v402_v5 = vld [vmem:[%s4367_s12 + $0x8c] sm:$0x1]  ;;  %v719_v41 = vrot.slane %v717_v30, 4 }
  0x7a   : > { %v662_v62 = vrot.slane %v661_v59, 4  ;;  %v1289_v59 = vunpack.c.l.b16 %v691_v49  ;;  %v712_v17 = vshll.u32 %v402_v5, 16  ;;  %v722_v42 = vrot.slane %v720_v31, 5  ;;  %v405_v49 = vld [vmem:[%s4367_s12 + $0x98] sm:$0x1] }
  0x7c   : > { %v667_v9 = vsel %vm4385_vm4, %v662_v62, %v666_v63  ;;  %v698_v62 = vrot.slane %v696_v51, 5  ;;  %v704_v63 = vrot.slane %v702_v52, 5 }
  0x7d   : > { %v1287_v15 = vunpack.c.l.b16 %v667_v9 }
  0x7f   : > { %v4536_v25 = vpack.c.b16 %v1287_v15, %v1286_v14  ;;  %v699_v14 = vor.u32 %v698_v62, %v695_v61  ;;  %v709_v15 = vor.u32 %v708_v0, %v704_v63 }
  0x80   : > { %3788 = vmatmul.msk.bf16.gmra.mxu1 %vm1092_vm1, %v4485_v4 }
  0x81   : > { %v710_v24 = vrot.slane %v709_v15, 4 }
  0x84   : > { %3810 = vmatmul.msk.bf16.gmra.mxu2 %vm1092_vm1, %v4153_v28  ;;  %3772 = vmatmul.msk.bf16.gmra.mxu0 %vm1092_vm1, %v4152_v3 }
  0x85   : > { %3826 = vmatmul.msk.bf16.gmra.mxu3 %vm1092_vm1, %v4501_v29 }
  0x90   : > { %3789 = vmatmul.msk.bf16.gmra.mxu1 %vm1092_vm1, %v4501_v29 }
  0x91   : > { %v1154_v58 = vpop.f32.mrf.mxu0 }
  0x92   : > { %v1234_v18 = vadd.f32 %v4530_v7, %v1154_v58  ;;  %v1288_v58 = vunpack.c.l.b16 %v681_v48 }
  0x94   : > { %3811 = vmatmul.msk.bf16.gmra.mxu2 %vm1092_vm1, %v4154_v54  ;;  %3773 = vmatmul.msk.bf16.gmra.mxu0 %vm1092_vm1, %v4153_v28  ;;  %v4565_v11 = vpack.c.b16 %v1289_v59, %v1288_v58  ;;  %v736_v59 = vshll.u32 %v405_v49, 16 }
  0x95   : > { %3827 = vmatmul.msk.bf16.gmra.mxu3 %vm1092_vm1, %v4517_v56 }
  0x97   : > { %v1508_v3 = vpop.f32.mrf.mxu2 }
  0x99   : > { %v1156_v8 = vpop.f32.mrf.mxu0 }
  0x9a   : > { %v1235_v44 = vadd.f32 %v4530_v7, %v1156_v8  ;;  %v4156_v8 = vld [vmem:[%s4367_s12 + $0x84] sm:$0xff] }
  0x9d   : > { %v1376_v23 = vpop.f32.mrf.mxu1 }
  0x9e   : > { %v1456_v27 = vadd.f32 %v1376_v23, %v1234_v18  ;;  %v700_v23 = vrot.slane %v699_v14, 4 }
  0x9f   : > { %v1510_v16 = vpop.f32.mrf.mxu2 }
  0xa0   : > { %3790 = vmatmul.msk.bf16.gmra.mxu1 %vm1092_vm1, %v4517_v56  ;;  %v1588_v34 = vadd.f32 %v1508_v3, %v1456_v27  ;;  %v705_v37 = vsel %vm4385_vm4, %v700_v23, %v704_v63 }
  0xa1   : > { %v1159_v28 = vpop.f32.mrf.mxu0  ;;  %v1290_v48 = vunpack.c.l.b16 %v705_v37  ;;  %v408_v37 = vld [vmem:[%s4367_s12 + $0xa4] sm:$0x1] }
  0xa2   : > { %v1236_v55 = vadd.f32 %v4530_v7, %v1159_v28  ;;  %v760_v49 = vshll.u32 %v408_v37, 16 }
  0xa4   : > { %3812 = vmatmul.msk.bf16.gmra.mxu2 %vm1092_vm1, %v4155_v26  ;;  %3774 = vmatmul.msk.bf16.gmra.mxu0 %vm1092_vm1, %v4154_v54 }
  0xa5   : > { %3828 = vmatmul.msk.bf16.gmra.mxu3 %vm1092_vm1, %v4536_v25  ;;  %v1378_v38 = vpop.f32.mrf.mxu1 }
  0xa6   : > { %v1457_v54 = vadd.f32 %v1378_v38, %v1235_v44 }
  0xa7   : > { %v1513_v40 = vpop.f32.mrf.mxu2 }
  0xa8   : > { %v1640_v43 = vpop.f32.mrf.mxu3  ;;  %v1589_v1 = vadd.f32 %v1510_v16, %v1457_v54  ;;  %v714_v16 = vrot.slane %v712_v17, 5  ;;  %v4157_v54 = vld [vmem:[%s4367_s12 + $0x90] sm:$0xff] }
  0xa9   : > { %v1720_v45 = vadd.f32 %v1640_v43, %v1588_v34  ;;  %v1161_v47 = vpop.f32.mrf.mxu0  ;;  %v730_v34 = vshrl.u32 %v404_v21, 16  ;;  %v728_v43 = vrot.slane %v726_v32, 5 }
  0xaa   : > { %v715_v38 = vsel %vm4385_vm4, %v710_v24, %v714_v16 }
  0xab   : > { %1752 = vst.msk [vmem:[%s4551_s22] sm:$0xff] %vm1092_vm1, %v1720_v45  ;;  %v732_v44 = vrot.slane %v730_v34, 4 }
  0xad   : > { %v1381_v60 = vpop.f32.mrf.mxu1  ;;  %v733_v58 = vor.u32 %v732_v44, %v728_v43 }
  0xae   : > { %v1458_v10 = vadd.f32 %v1381_v60, %v1236_v55  ;;  %v723_v55 = vor.u32 %v722_v42, %v719_v41  ;;  %v4158_v42 = vld [vmem:[%s4367_s12 + $0x9c] sm:$0xff] }
  0xaf   : > { %v1515_v3 = vpop.f32.mrf.mxu2 }
  0xb0   : > { %v1642_v6 = vpop.f32.mrf.mxu3  ;;  %3791 = vmatmul.msk.bf16.gmra.mxu1 %vm1092_vm1, %v4536_v25  ;;  %v1590_v18 = vadd.f32 %v1513_v40, %v1458_v10  ;;  %v724_v0 = vrot.slane %v723_v55, 4  ;;  %v407_v10 = vld [vmem:[%s4367_s12 + $0xa0] sm:$0xf] }
  0xb1   : > { %v1721_v9 = vadd.f32 %v1642_v6, %v1589_v1  ;;  %v1164_v12 = vpop.f32.mrf.mxu0  ;;  %v734_v1 = vrot.slane %v733_v58, 4  ;;  %v406_v6 = vld [vmem:[%s4367_s12 + $0x9c] sm:$0xf]  ;;  %v750_v23 = vshll.u32 %v407_v10, 16  ;;  %v754_v24 = vshrl.u32 %v407_v10, 16 }
  0xb2   : > { %v1238_v45 = vadd.f32 %v4530_v7, %v1164_v12  ;;  %v729_v15 = vsel %vm4385_vm4, %v724_v0, %v728_v43 }
  0xb3   : > { %1753 = vst.msk [vmem:[%s4551_s22 + $0x8] sm:$0xff] %vm1092_vm1, %v1721_v9  ;;  %v752_v34 = vrot.slane %v750_v23, 5 }
  0xb4   : > { %3813 = vmatmul.msk.bf16.gmra.mxu2 %vm1092_vm1, %v4156_v8  ;;  %3775 = vmatmul.msk.bf16.gmra.mxu0 %vm1092_vm1, %v4155_v26  ;;  %v1237_v26 = vadd.f32 %v4530_v7, %v1161_v47  ;;  %v1291_v47 = vunpack.c.l.b16 %v715_v38 }
  0xb5   : > { %3829 = vmatmul.msk.bf16.gmra.mxu3 %vm1092_vm1, %v4565_v11  ;;  %v1383_v22 = vpop.f32.mrf.mxu1 }
  0xb6   : > { %v1459_v40 = vadd.f32 %v1383_v22, %v1237_v26  ;;  %v4587_v62 = vpack.c.b16 %v1291_v47, %v1290_v48  ;;  %v756_v26 = vrot.slane %v754_v24, 4 }
  0xb7   : > { %v1518_v27 = vpop.f32.mrf.mxu2 }
  0xb8   : > { %v1645_v28 = vpop.f32.mrf.mxu3  ;;  %v1591_v51 = vadd.f32 %v1515_v3, %v1459_v40  ;;  %v738_v3 = vrot.slane %v736_v59, 5  ;;  %v757_v47 = vor.u32 %v756_v26, %v752_v34  ;;  %v409_v59 = vld [vmem:[%s4367_s12 + $0xa8] sm:$0xf] }
  0xb9   : > { %v1722_v35 = vadd.f32 %v1645_v28, %v1590_v18  ;;  %v1166_v36 = vpop.f32.mrf.mxu0  ;;  %v744_v18 = vshll.u32 %v406_v6, 16 }
  0xba   : > { %v739_v17 = vsel %vm4385_vm4, %v734_v1, %v738_v3  ;;  %v1239_v20 = vadd.f32 %v4530_v7, %v1166_v36 }
  0xbb   : > { %1754 = vst.msk [vmem:[%s4551_s22 + $0x10] sm:$0xff] %vm1092_vm1, %v1722_v35  ;;  %v1293_v28 = vunpack.c.l.b16 %v739_v17  ;;  %v746_v31 = vrot.slane %v744_v18, 5 }
  0xbd   : > { %v1386_v50 = vpop.f32.mrf.mxu1 }
  0xbe   : > { %v1460_v61 = vadd.f32 %v1386_v50, %v1238_v45 }
  0xbf   : > { %v1520_v52 = vpop.f32.mrf.mxu2 }
  0xc0   : > { %v1647_v53 = vpop.f32.mrf.mxu3  ;;  %3792 = vmatmul.msk.bf16.gmra.mxu1 %vm1092_vm1, %v4565_v11  ;;  %v1592_v5 = vadd.f32 %v1518_v27, %v1460_v61  ;;  %v1292_v27 = vunpack.c.l.b16 %v729_v15 }
  0xc1   : > { %v1723_v60 = vadd.f32 %v1647_v53, %v1591_v51  ;;  %v1169_v63 = vpop.f32.mrf.mxu0  ;;  %v762_v53 = vrot.slane %v760_v49, 5 }
  0xc2   : > { %v1240_v32 = vadd.f32 %v4530_v7, %v1169_v63  ;;  %v4606_v41 = vpack.c.b16 %v1293_v28, %v1292_v27  ;;  %v4159_v28 = vld [vmem:[%s4367_s12 + $0xa8] sm:$0xff] }
  0xc3   : > { %1755 = vst.msk [vmem:[%s4551_s22 + $0x18] sm:$0xff] %vm1092_vm1, %v1723_v60  ;;  %v410_v60 = vld [vmem:[%s4367_s12 + $0xac] sm:$0xf] }
  0xc4   : > { %3814 = vmatmul.msk.bf16.gmra.mxu2 %vm1092_vm1, %v4157_v54  ;;  %3776 = vmatmul.msk.bf16.gmra.mxu0 %vm1092_vm1, %v4156_v8  ;;  %v741_v8 = vshrl.u32 %v406_v6, 16  ;;  %v768_v6 = vshll.u32 %v409_v59, 16  ;;  %v778_v10 = vshrl.u32 %v410_v60, 16 }
  0xc5   : > { %3830 = vmatmul.msk.bf16.gmra.mxu3 %vm1092_vm1, %v4587_v62  ;;  %v1388_v9 = vpop.f32.mrf.mxu1 }
  0xc6   : > { %v1461_v16 = vadd.f32 %v1388_v9, %v1239_v20  ;;  %v743_v30 = vrot.slane %v741_v8, 4  ;;  %v774_v9 = vshll.u32 %v410_v60, 16  ;;  %v770_v20 = vrot.slane %v768_v6, 5 }
  0xc7   : > { %v1523_v12 = vpop.f32.mrf.mxu2 }
  0xc8   : > { %v1650_v14 = vpop.f32.mrf.mxu3  ;;  %v1593_v36 = vadd.f32 %v1520_v52, %v1461_v16  ;;  %v747_v43 = vor.u32 %v746_v31, %v743_v30  ;;  %v758_v52 = vrot.slane %v757_v47, 4  ;;  %v411_v16 = vld [vmem:[%s4367_s12 + $0xb0] sm:$0x1] }
  0xc9   : > { %v1724_v21 = vadd.f32 %v1650_v14, %v1592_v5  ;;  %v1171_v22 = vpop.f32.mrf.mxu0  ;;  %v765_v5 = vshrl.u32 %v409_v59, 16  ;;  %v784_v37 = vshll.u32 %v411_v16, 16 }
  0xca   : > { %v748_v51 = vrot.slane %v747_v43, 4  ;;  %v1241_v63 = vadd.f32 %v4530_v7, %v1171_v22  ;;  %v763_v3 = vsel %vm4385_vm4, %v758_v52, %v762_v53  ;;  %v780_v22 = vrot.slane %v778_v10, 4 }
  0xcb   : > { %1756 = vst.msk [vmem:[%s4551_s22 + $0x20] sm:$0xff] %vm1092_vm1, %v1724_v21  ;;  %v1295_v17 = vunpack.c.l.b16 %v763_v3  ;;  %v767_v18 = vrot.slane %v765_v5, 4  ;;  %v776_v21 = vrot.slane %v774_v9, 5  ;;  %v414_v9 = vld [vmem:[%s4367_s12 + $0xbc] sm:$0x1] }
  0xcd   : > { %v1391_v35 = vpop.f32.mrf.mxu1  ;;  %v771_v26 = vor.u32 %v770_v20, %v767_v18  ;;  %v808_v20 = vshll.u32 %v414_v9, 16 }
  0xce   : > { %v1462_v45 = vadd.f32 %v1391_v35, %v1240_v32  ;;  %v781_v35 = vor.u32 %v780_v22, %v776_v21 }
  0xcf   : > { %v1525_v38 = vpop.f32.mrf.mxu2 }
  0xd0   : > { %v1652_v40 = vpop.f32.mrf.mxu3  ;;  %3793 = vmatmul.msk.bf16.gmra.mxu1 %vm1092_vm1, %v4587_v62  ;;  %v1594_v50 = vadd.f32 %v1523_v12, %v1462_v45  ;;  %v782_v45 = vrot.slane %v781_v35, 4  ;;  %v4191_v35 = vld [vmem:[%s4367_s12 + $0x4] sm:$0xf] }
  0xd1   : > { %v1725_v44 = vadd.f32 %v1652_v40, %v1593_v36  ;;  %v1174_v48 = vpop.f32.mrf.mxu0  ;;  %v413_v40 = vld [vmem:[%s4367_s12 + $0xb8] sm:$0xf] }
  0xd2   : > { %v1242_v14 = vadd.f32 %v4530_v7, %v1174_v48  ;;  %v786_v48 = vrot.slane %v784_v37, 5  ;;  %v798_v52 = vshll.u32 %v413_v40, 16  ;;  %v802_v53 = vshrl.u32 %v413_v40, 16 }
  0xd3   : > { %1757 = vst.msk [vmem:[%s4551_s22 + $0x28] sm:$0xff] %vm1092_vm1, %v1725_v44  ;;  %v772_v44 = vrot.slane %v771_v26, 4  ;;  %v919_v37 = vrot.slane %v4191_v35, 5 }
  0xd4   : > { %3815 = vmatmul.msk.bf16.gmra.mxu2 %vm1092_vm1, %v4158_v42  ;;  %3777 = vmatmul.msk.bf16.gmra.mxu0 %vm1092_vm1, %v4157_v54  ;;  %v753_v54 = vsel %vm4385_vm4, %v748_v51, %v752_v34  ;;  %v787_v60 = vsel %vm4385_vm4, %v782_v45, %v786_v48  ;;  %v804_v3 = vrot.slane %v802_v53, 4 }
  0xd5   : > { %3831 = vmatmul.msk.bf16.gmra.mxu3 %vm1092_vm1, %v4606_v41  ;;  %v1393_v55 = vpop.f32.mrf.mxu1  ;;  %v1294_v15 = vunpack.c.l.b16 %v753_v54  ;;  %v800_v54 = vrot.slane %v798_v52, 5  ;;  %v1297_v6 = vunpack.c.l.b16 %v787_v60  ;;  %v4192_v52 = vld [vmem:[%s4367_s12] sm:$0xf]  ;;  %v921_v60 = vrot.slane %v919_v37, 4 }
  0xd6   : > { %v1463_v12 = vadd.f32 %v1393_v55, %v1241_v63  ;;  %v3683_v53 = vrot.slane %v4192_v52, 9 }
  0xd7   : > { %v1528_v58 = vpop.f32.mrf.mxu2  ;;  %v4631_v32 = vpack.c.b16 %v1295_v17, %v1294_v15  ;;  %v4653_v17 = vld [vmem:[%s4367_s12 + $0xb4] sm:$0xff]  ;;  %v805_v18 = vor.u32 %v804_v3, %v800_v54  ;;  %v417_v3 = vld [vmem:[%s4662_s15 + $0x8] sm:$0x1] }
  0xd8   : > { %v1655_v61 = vpop.f32.mrf.mxu3  ;;  %v1595_v23 = vadd.f32 %v1525_v38, %v1463_v12  ;;  %v412_v38 = vld [vmem:[%s4367_s12 + $0xb4] sm:$0xf] }
  0xd9   : > { %v1726_v0 = vadd.f32 %v1655_v61, %v1594_v50  ;;  %v1176_v1 = vpop.f32.mrf.mxu0  ;;  %v789_v50 = vshrl.u32 %v412_v38, 16  ;;  %v792_v51 = vshll.u32 %v412_v38, 16  ;;  %v416_v38 = vld [vmem:[%s4662_s15 + $0x4] sm:$0xf] }
  0xdb   : > { %1758 = vst.msk [vmem:[%s4551_s22 + $0x30] sm:$0xff] %vm1092_vm1, %v1726_v0  ;;  %v791_v63 = vrot.slane %v789_v50, 4  ;;  %v794_v0 = vrot.slane %v792_v51, 5  ;;  %v822_v50 = vshll.u32 %v416_v38, 16  ;;  %v826_v51 = vshrl.u32 %v416_v38, 16 }
  0xdd   : > { %v1396_v8 = vpop.f32.mrf.mxu1 }
  0xde   : > { %v1464_v31 = vadd.f32 %v1396_v8, %v1242_v14  ;;  %v795_v8 = vor.u32 %v794_v0, %v791_v63 }
  0xdf   : > { %v1530_v24 = vpop.f32.mrf.mxu2 }
  0xe0   : > { %v1657_v27 = vpop.f32.mrf.mxu3  ;;  %3794 = vmatmul.msk.bf16.gmra.mxu1 %vm1092_vm1, %v4606_v41  ;;  %v1596_v36 = vadd.f32 %v1528_v58, %v1464_v31  ;;  %v777_v58 = vsel %vm4385_vm4, %v772_v44, %v776_v21 }
  0xe1   : > { %v1727_v30 = vadd.f32 %v1657_v27, %v1595_v23  ;;  %v1179_v34 = vpop.f32.mrf.mxu0  ;;  %v806_v27 = vrot.slane %v805_v18, 4  ;;  %v4161_v18 = vld [vmem:[%s4662_s15] sm:$0xff] }
  0xe2   : > { %v1244_v5 = vadd.f32 %v4530_v7, %v1179_v34  ;;  %v415_v34 = vld [vmem:[%s4662_s15] sm:$0xf] }
  0xe3   : > { %1759 = vst.msk [vmem:[%s4551_s22 + $0x38] sm:$0xff] %vm1092_vm1, %v1727_v30  ;;  %v810_v30 = vrot.slane %v808_v20, 5  ;;  %v813_v44 = vshrl.u32 %v415_v34, 16  ;;  %v816_v45 = vshll.u32 %v415_v34, 16 }
  0xe4   : > { %3816 = vmatmul.msk.bf16.gmra.mxu2 %vm1092_vm1, %v4159_v28  ;;  %3778 = vmatmul.msk.bf16.gmra.mxu0 %vm1092_vm1, %v4158_v42  ;;  %v1243_v42 = vadd.f32 %v4530_v7, %v1176_v1  ;;  %v1296_v1 = vunpack.c.l.b16 %v777_v58 }
  0xe5   : > { %3832 = vmatmul.msk.bf16.gmra.mxu3 %vm1092_vm1, %v4631_v32  ;;  %v1398_v43 = vpop.f32.mrf.mxu1  ;;  %v815_v0 = vrot.slane %v813_v44, 4  ;;  %v3991_v44 = vld [vmem:[%s5661_s2 + $0x16] sm:$0x3] }
  0xe6   : > { %v1465_v61 = vadd.f32 %v1398_v43, %v1243_v42  ;;  %v4657_v23 = vpack.c.b16 %v1297_v6, %v1296_v1  ;;  %v824_v1 = vrot.slane %v822_v50, 5  ;;  %v828_v6 = vrot.slane %v826_v51, 4 }
  0xe7   : > { %v1533_v47 = vpop.f32.mrf.mxu2 }
  0xe8   : > { %v1660_v49 = vpop.f32.mrf.mxu3  ;;  %v1597_v12 = vadd.f32 %v1530_v24, %v1465_v61  ;;  %v796_v24 = vrot.slane %v795_v8, 4  ;;  %v4193_v61 = vld [vmem:[%s4367_s12 + $0x8] sm:$0x1]  ;;  %v829_v34 = vor.u32 %v828_v6, %v824_v1 }
  0xe9   : > { %v1728_v55 = vadd.f32 %v1660_v49, %v1596_v36  ;;  %v1181_v59 = vpop.f32.mrf.mxu0  ;;  %v922_v63 = vrot.slane %v4193_v61, 5 }
  0xea   : > { %v801_v43 = vsel %vm4385_vm4, %v796_v24, %v800_v54  ;;  %v1245_v48 = vadd.f32 %v4530_v7, %v1181_v59  ;;  %v818_v54 = vrot.slane %v816_v45, 5 }
  0xeb   : > { %1760 = vst.msk [vmem:[%s4551_s22 + $0x40] sm:$0xff] %vm1092_vm1, %v1728_v55  ;;  %v1298_v55 = vunpack.c.l.b16 %v801_v43 }
  0xec   : > { %v819_v20 = vor.u32 %v818_v54, %v815_v0 }
  0xed   : > { %v1401_v10 = vpop.f32.mrf.mxu1 }
  0xee   : > { %v1466_v22 = vadd.f32 %v1401_v10, %v1244_v5 }
  0xef   : > { %v1535_v14 = vpop.f32.mrf.mxu2 }
  0xf0   : > { %v1662_v15 = vpop.f32.mrf.mxu3  ;;  %3795 = vmatmul.msk.bf16.gmra.mxu1 %vm1092_vm1, %v4631_v32  ;;  %v1598_v31 = vadd.f32 %v1533_v47, %v1466_v22  ;;  %v920_v22 = vsel %vm4687_vm7, %v3683_v53, %v919_v37  ;;  %v820_v37 = vrot.slane %v819_v20, 4 }
  0xf1   : > { %v1729_v21 = vadd.f32 %v1662_v15, %v1597_v12  ;;  %v1184_v16 = vpop.f32.mrf.mxu0 }
  0xf2   : > { %v1246_v59 = vadd.f32 %v4530_v7, %v1184_v16  ;;  %v923_v16 = vsel %vm4687_vm7, %v921_v60, %v922_v63 }
  0xf3   : > { %1761 = vst.msk [vmem:[%s4551_s22 + $0x48] sm:$0xff] %vm1092_vm1, %v1729_v21  ;;  %v832_v21 = vshll.u32 %v417_v3, 16 }
  0xf4   : > { %3817 = vmatmul.msk.bf16.gmra.mxu2 %vm1092_vm1, %v4653_v17  ;;  %3779 = vmatmul.msk.bf16.gmra.mxu0 %vm1092_vm1, %v4159_v28  ;;  %v811_v28 = vsel %vm4385_vm4, %v806_v27, %v810_v30  ;;  %v1912_v30 = vunpack.c.l.b16 %v920_v22  ;;  %v4195_v22 = vld [vmem:[%s4367_s12 + $0xc] sm:$0xf] }
  0xf5   : > { %3833 = vmatmul.msk.bf16.gmra.mxu3 %vm1092_vm1, %v4657_v23  ;;  %v1403_v26 = vpop.f32.mrf.mxu1  ;;  %v1299_v58 = vunpack.c.l.b16 %v811_v28  ;;  %v834_v38 = vrot.slane %v832_v21, 5  ;;  %v3936_v28 = vld [vmem:[%s5661_s2 + $0x10] sm:$0x3] }
  0xf6   : > { %v1467_v42 = vadd.f32 %v1403_v26, %v1245_v48  ;;  %v3970_v26 = vld [vmem:[%s5661_s2 + $0x14] sm:$0x3]  ;;  %v830_v48 = vrot.slane %v829_v34, 4 }
  0xf7   : > { %v1538_v36 = vpop.f32.mrf.mxu2  ;;  %v4685_v10 = vpack.c.b16 %v1299_v58, %v1298_v55  ;;  %v825_v58 = vsel %vm4385_vm4, %v820_v37, %v824_v1 }
  0xf8   : > { %v1665_v40 = vpop.f32.mrf.mxu3  ;;  %v1599_v9 = vadd.f32 %v1535_v14, %v1467_v42  ;;  %v835_v60 = vsel %vm4385_vm4, %v830_v48, %v834_v38  ;;  %v1622_v0 = vunpack.c.l.b16 %v825_v58 }
  0xf9   : > { %v1730_v47 = vadd.f32 %v1665_v40, %v1598_v31  ;;  %v1186_v49 = vpop.f32.mrf.mxu0  ;;  %v1913_v31 = vunpack.c.l.b16 %v923_v16  ;;  %v2684_v40 = vsel %vm1141_vm0, %v3970_v26, 0  ;;  %v1623_v54 = vunpack.c.l.b16 %v835_v60 }
  0xfa   : > { %2693 = vmatpush.bf16.msra.mxu2 %v2684_v40  ;;  %v1247_v53 = vadd.f32 %v4530_v7, %v1186_v49  ;;  %v3684_v16 = vrot.slane %v4195_v22, 9 }
  0xfb   : > { %1762 = vst.msk [vmem:[%s4551_s22 + $0x50] sm:$0xff] %vm1092_vm1, %v1730_v47  ;;  %v4703_v35 = vpack.c.b16 %v1913_v31, %v1912_v30  ;;  %v2426_v47 = vsel %vm1141_vm0, %v3936_v28, 0 }
  0xfc   : > { %2435 = vmatpush.bf16.msra.mxu0 %v2426_v47 }
  0xfd   : > { %v1406_v5 = vpop.f32.mrf.mxu1 }
  0xfe   : > { %v1468_v14 = vadd.f32 %v1406_v5, %v1246_v59 }
  0xff   : > { %v1540_v12 = vpop.f32.mrf.mxu2 }
 0x100   : > { %v1667_v8 = vpop.f32.mrf.mxu3  ;;  %3796 = vmatmul.msk.bf16.gmra.mxu1 %vm1092_vm1, %v4657_v23  ;;  %v1600_v43 = vadd.f32 %v1538_v36, %v1468_v14  ;;  %v2816_v36 = vsel %vm1141_vm0, %v3991_v44, 0  ;;  %v4196_v14 = vld [vmem:[%s4367_s12 + $0x14] sm:$0x1] }
 0x101   : > { %v1731_v24 = vadd.f32 %v1667_v8, %v1599_v9  ;;  %v1189_v27 = vpop.f32.mrf.mxu0  ;;  %2825 = vmatpush.bf16.msra.mxu3 %v2816_v36  ;;  %v4733_v9 = vpack.c.b16 %v1623_v54, %v1622_v0 }
 0x102   : > { %v1248_v63 = vadd.f32 %v4530_v7, %v1189_v27  ;;  %v929_v27 = vrot.slane %v4196_v14, 5 }
 0x103   : > { %1763 = vst.msk [vmem:[%s4551_s22 + $0x58] sm:$0xff] %vm1092_vm1, %v1731_v24 }
 0x104   : > { %3818 = vmatmul.msk.bf16.gmra.mxu2 %vm1092_vm1, %v4161_v18  ;;  %3780 = vmatmul.msk.bf16.gmra.mxu0 %vm1092_vm1, %v4653_v17  ;;  %v3953_v17 = vld [vmem:[%s5661_s2 + $0x12] sm:$0x3] }
 0x105   : > { %3834 = vmatmul.msk.bf16.gmra.mxu3 %vm1092_vm1, %v4685_v10  ;;  %v1408_v45 = vpop.f32.mrf.mxu1  ;;  %v2552_v50 = vsel %vm1141_vm0, %v3953_v17, 0  ;;  %v4194_v18 = vld [vmem:[%s4367_s12 + $0x10] sm:$0xf] }
 0x106   : > { %2561 = vmatpush.bf16.msra.mxu1 %v2552_v50  ;;  %v1469_v61 = vadd.f32 %v1408_v45, %v1247_v53  ;;  %v926_v20 = vrot.slane %v4194_v18, 5  ;;  %v4197_v53 = vld [vmem:[%s4367_s12 + $0x1c] sm:$0xf] }
 0x107   : > { %v1543_v51 = vpop.f32.mrf.mxu2 }
 0x108   : > { %v1670_v52 = vpop.f32.mrf.mxu3  ;;  %v1601_v3 = vadd.f32 %v1540_v12, %v1469_v61  ;;  %v928_v24 = vrot.slane %v926_v20, 4 }
 0x109   : > { %v1732_v42 = vadd.f32 %v1670_v52, %v1600_v43  ;;  %v1191_v55 = vpop.f32.mrf.mxu0 }
 0x10a   : > { %v1249_v34 = vadd.f32 %v4530_v7, %v1191_v55  ;;  %v930_v38 = vsel %vm4687_vm7, %v928_v24, %v929_v27 }
 0x10b   : > { %1764 = vst.msk [vmem:[%s4551_s22 + $0x60] sm:$0xff] %vm1092_vm1, %v1732_v42  ;;  %v1915_v44 = vunpack.c.l.b16 %v930_v38  ;;  %v933_v42 = vrot.slane %v4197_v53, 5  ;;  %v4201_v38 = vld [vmem:[%s4367_s12 + $0x24] sm:$0xf] }
 0x10d   : > { %v1411_v59 = vpop.f32.mrf.mxu1  ;;  %v935_v61 = vrot.slane %v933_v42, 4 }
 0x10e   : > { %v1470_v1 = vadd.f32 %v1411_v59, %v1248_v63  ;;  %v4199_v63 = vld [vmem:[%s4367_s12 + $0x20] sm:$0x1] }
 0x10f   : > { %v1545_v49 = vpop.f32.mrf.mxu2  ;;  %v936_v0 = vrot.slane %v4199_v63, 5 }
 0x110   : > { %v1672_v5 = vpop.f32.mrf.mxu3  ;;  %3797 = vmatmul.msk.bf16.gmra.mxu1 %vm1092_vm1, %v4685_v10  ;;  %v1602_v12 = vadd.f32 %v1543_v51, %v1470_v1 }
 0x111   : > { %v1733_v6 = vadd.f32 %v1672_v5, %v1601_v3  ;;  %v1194_v8 = vpop.f32.mrf.mxu0  ;;  %v937_v1 = vsel %vm4687_vm7, %v935_v61, %v936_v0 }
 0x112   : > { %v1250_v43 = vadd.f32 %v4530_v7, %v1194_v8 }
 0x113   : > { %1765 = vst.msk [vmem:[%s4551_s22 + $0x68] sm:$0xff] %vm1092_vm1, %v1733_v6 }
 0x114   : > { %3871 = vmatmul.msk.bf16.vlgmr.msrb.gmra.mxu2 %vm1092_vm1, %v4404_v13  ;;  %3837 = vmatmul.msk.bf16.vlgmr.msrb.gmra.mxu0 %vm1092_vm1, %v4394_v2  ;;  %v927_v2 = vsel %vm4687_vm7, %v3684_v16, %v926_v20 }
 0x115   : > { %3835 = vmatmul.msk.bf16.gmra.mxu3 %vm1092_vm1, %v4733_v9  ;;  %v1413_v21 = vpop.f32.mrf.mxu1  ;;  %v1914_v28 = vunpack.c.l.b16 %v927_v2 }
 0x116   : > { %v1471_v40 = vadd.f32 %v1413_v21, %v1249_v34  ;;  %v4200_v34 = vld [vmem:[%s4367_s12 + $0x28] sm:$0xf] }
 0x117   : > { %v1548_v30 = vpop.f32.mrf.mxu2  ;;  %v4756_v51 = vpack.c.b16 %v1915_v44, %v1914_v28  ;;  %v4202_v28 = vld [vmem:[%s4367_s12 + $0x2c] sm:$0x1] }
 0x118   : > { %v1675_v31 = vpop.f32.mrf.mxu3  ;;  %v1603_v45 = vadd.f32 %v1545_v49, %v1471_v40  ;;  %v3686_v40 = vrot.slane %v4201_v38, 9  ;;  %v943_v44 = vrot.slane %v4202_v28, 5 }
 0x119   : > { %v1734_v26 = vadd.f32 %v1675_v31, %v1602_v12  ;;  %v1196_v37 = vpop.f32.mrf.mxu0  ;;  %v1917_v12 = vunpack.c.l.b16 %v937_v1 }
 0x11a   : > { %v1251_v3 = vadd.f32 %v4530_v7, %v1196_v37 }
 0x11b   : > { %1766 = vst.msk [vmem:[%s4551_s22 + $0x70] sm:$0xff] %vm1092_vm1, %v1734_v26  ;;  %v940_v26 = vrot.slane %v4200_v34, 5 }
 0x11d   : > { %v1416_v17 = vpop.f32.mrf.mxu1 }
 0x11e   : > { %v1472_v50 = vadd.f32 %v1416_v17, %v1250_v43  ;;  %v942_v43 = vrot.slane %v940_v26, 4 }
 0x11f   : > { %v1550_v48 = vpop.f32.mrf.mxu2 }
 0x120   : > { %v1677_v47 = vpop.f32.mrf.mxu3  ;;  %3854 = vmatmul.msk.bf16.vlgmr.msrb.gmra.mxu1 %vm1092_vm1, %v4703_v35  ;;  %v1604_v55 = vadd.f32 %v1548_v30, %v1472_v50  ;;  %v4198_v35 = vld [vmem:[%s4367_s12 + $0x18] sm:$0xf]  ;;  %v941_v50 = vsel %vm4687_vm7, %v3686_v40, %v940_v26 }
 0x121   : > { %v1735_v36 = vadd.f32 %v1677_v47, %v1603_v45  ;;  %v1199_v52 = vpop.f32.mrf.mxu0  ;;  %v3685_v60 = vrot.slane %v4198_v35, 9 }
 0x122   : > { %v1252_v18 = vadd.f32 %v4530_v7, %v1199_v52  ;;  %v944_v52 = vsel %vm4687_vm7, %v942_v43, %v943_v44 }
 0x123   : > { %1767 = vst.msk [vmem:[%s4551_s22 + $0x78] sm:$0xff] %vm1092_vm1, %v1735_v36  ;;  %v934_v6 = vsel %vm4687_vm7, %v3685_v60, %v933_v42 }
 0x124   : > { %3872 = vmatmul.msk.bf16.gmra.mxu2 %vm1092_vm1, %v4421_v33  ;;  %3838 = vmatmul.msk.bf16.gmra.mxu0 %vm1092_vm1, %v4404_v13  ;;  %v1916_v20 = vunpack.c.l.b16 %v934_v6 }
 0x125   : > { %3888 = vmatmul.msk.bf16.vlgmr.msrb.gmra.mxu3 %vm1092_vm1, %v4756_v51  ;;  %v1418_v58 = vpop.f32.mrf.mxu1 }
 0x126   : > { %v1473_v8 = vadd.f32 %v1418_v58, %v1251_v3  ;;  %v4779_v30 = vpack.c.b16 %v1917_v12, %v1916_v20  ;;  %v1919_v58 = vunpack.c.l.b16 %v944_v52  ;;  %v4205_v12 = vld [vmem:[%s4367_s12 + $0x38] sm:$0x1] }
 0x127   : > { %v1553_v54 = vpop.f32.mrf.mxu2 }
 0x128   : > { %v1680_v59 = vpop.f32.mrf.mxu3  ;;  %v1605_v22 = vadd.f32 %v1550_v48, %v1473_v8  ;;  %v4204_v8 = vld [vmem:[%s4367_s12 + $0x30] sm:$0xf] }
 0x129   : > { %v1736_v49 = vadd.f32 %v1680_v59, %v1604_v55  ;;  %v1201_v5 = vpop.f32.mrf.mxu0  ;;  %v1918_v55 = vunpack.c.l.b16 %v941_v50 }
 0x12a   : > { %v1253_v48 = vadd.f32 %v4530_v7, %v1201_v5 }
 0x12b   : > { %1768 = vst.msk [vmem:[%s4551_s22 + $0x80] sm:$0xff] %vm1092_vm1, %v1736_v49  ;;  %v4802_v59 = vpack.c.b16 %v1919_v58, %v1918_v55  ;;  %v4203_v49 = vld [vmem:[%s4367_s12 + $0x34] sm:$0xf] }
 0x12c   : > { %v947_v5 = vrot.slane %v4203_v49, 5 }
 0x12d   : > { %v1421_v21 = vpop.f32.mrf.mxu1 }
 0x12e   : > { %v1474_v27 = vadd.f32 %v1421_v21, %v1252_v18  ;;  %v3687_v18 = vrot.slane %v4204_v8, 9  ;;  %v949_v20 = vrot.slane %v947_v5, 4  ;;  %v950_v21 = vrot.slane %v4205_v12, 5 }
 0x12f   : > { %v1555_v16 = vpop.f32.mrf.mxu2 }
 0x130   : > { %v1682_v24 = vpop.f32.mrf.mxu3  ;;  %3855 = vmatmul.msk.bf16.gmra.mxu1 %vm1092_vm1, %v4756_v51  ;;  %v1606_v37 = vadd.f32 %v1553_v54, %v1474_v27  ;;  %v951_v34 = vsel %vm4687_vm7, %v949_v20, %v950_v21 }
 0x131   : > { %v1737_v14 = vadd.f32 %v1682_v24, %v1605_v22  ;;  %v1204_v31 = vpop.f32.mrf.mxu0  ;;  %v1921_v38 = vunpack.c.l.b16 %v951_v34 }
 0x132   : > { %v1254_v42 = vadd.f32 %v4530_v7, %v1204_v31  ;;  %v948_v31 = vsel %vm4687_vm7, %v3687_v18, %v947_v5 }
 0x133   : > { %1769 = vst.msk [vmem:[%s4551_s22 + $0x88] sm:$0xff] %vm1092_vm1, %v1737_v14 }
 0x134   : > { %3873 = vmatmul.msk.bf16.gmra.mxu2 %vm1092_vm1, %v4437_v57  ;;  %3839 = vmatmul.msk.bf16.gmra.mxu0 %vm1092_vm1, %v4421_v33 }
 0x135   : > { %3889 = vmatmul.msk.bf16.gmra.mxu3 %vm1092_vm1, %v4779_v30  ;;  %v1423_v2 = vpop.f32.mrf.mxu1 }
 0x136   : > { %v1475_v53 = vadd.f32 %v1423_v2, %v1253_v48  ;;  %v1920_v2 = vunpack.c.l.b16 %v948_v31  ;;  %v4209_v31 = vld [vmem:[%s4367_s12 + $0x4c] sm:$0xf] }
 0x137   : > { %v1558_v17 = vpop.f32.mrf.mxu2  ;;  %v961_v34 = vrot.slane %v4209_v31, 5 }
 0x138   : > { %v1685_v45 = vpop.f32.mrf.mxu3  ;;  %v1607_v60 = vadd.f32 %v1555_v16, %v1475_v53  ;;  %v4825_v48 = vpack.c.b16 %v1921_v38, %v1920_v2 }
 0x139   : > { %v1738_v47 = vadd.f32 %v1685_v45, %v1606_v37  ;;  %v1206_v36 = vpop.f32.mrf.mxu0  ;;  %v963_v38 = vrot.slane %v961_v34, 4 }
 0x13a   : > { %v1255_v24 = vadd.f32 %v4530_v7, %v1206_v36  ;;  %v4206_v36 = vld [vmem:[%s4367_s12 + $0x40] sm:$0xf] }
 0x13b   : > { %1770 = vst.msk [vmem:[%s4551_s22 + $0x90] sm:$0xff] %vm1092_vm1, %v1738_v47  ;;  %v954_v50 = vrot.slane %v4206_v36, 5 }
 0x13d   : > { %v1426_v35 = vpop.f32.mrf.mxu1  ;;  %v956_v58 = vrot.slane %v954_v50, 4 }
 0x13e   : > { %v1476_v54 = vadd.f32 %v1426_v35, %v1254_v42  ;;  %v4207_v42 = vld [vmem:[%s4367_s12 + $0x3c] sm:$0xf]  ;;  %v4208_v35 = vld [vmem:[%s4367_s12 + $0x44] sm:$0x1] }
 0x13f   : > { %v1560_v61 = vpop.f32.mrf.mxu2  ;;  %v3688_v55 = vrot.slane %v4207_v42, 9 }
 0x140   : > { %v1687_v63 = vpop.f32.mrf.mxu3  ;;  %3856 = vmatmul.msk.bf16.gmra.mxu1 %vm1092_vm1, %v4779_v30  ;;  %v1608_v6 = vadd.f32 %v1558_v17, %v1476_v54 }
 0x141   : > { %v1739_v0 = vadd.f32 %v1687_v63, %v1607_v60  ;;  %v1209_v3 = vpop.f32.mrf.mxu0  ;;  %v957_v60 = vrot.slane %v4208_v35, 5  ;;  %v955_v49 = vsel %vm4687_vm7, %v3688_v55, %v954_v50 }
 0x142   : > { %v1256_v37 = vadd.f32 %v4530_v7, %v1209_v3  ;;  %v1922_v8 = vunpack.c.l.b16 %v955_v49 }
 0x143   : > { %1771 = vst.msk [vmem:[%s4551_s22 + $0x98] sm:$0xff] %vm1092_vm1, %v1739_v0  ;;  %v958_v5 = vsel %vm4687_vm7, %v956_v58, %v957_v60 }
 0x144   : > { %3874 = vmatmul.msk.bf16.gmra.mxu2 %vm1092_vm1, %v4453_v19  ;;  %3840 = vmatmul.msk.bf16.gmra.mxu0 %vm1092_vm1, %v4437_v57  ;;  %v1923_v18 = vunpack.c.l.b16 %v958_v5  ;;  %v4213_v5 = vld [vmem:[%s4367_s12 + $0x58] sm:$0xf] }
 0x145   : > { %3890 = vmatmul.msk.bf16.gmra.mxu3 %vm1092_vm1, %v4802_v59  ;;  %v1428_v1 = vpop.f32.mrf.mxu1 }
 0x146   : > { %v1477_v26 = vadd.f32 %v1428_v1, %v1255_v24 }
 0x147   : > { %v1563_v22 = vpop.f32.mrf.mxu2 }
 0x148   : > { %v1690_v16 = vpop.f32.mrf.mxu3  ;;  %v1609_v43 = vadd.f32 %v1560_v61, %v1477_v26 }
 0x149   : > { %v1740_v14 = vadd.f32 %v1690_v16, %v1608_v6  ;;  %v1211_v27 = vpop.f32.mrf.mxu0 }
 0x14a   : > { %v1257_v0 = vadd.f32 %v4530_v7, %v1211_v27 }
 0x14b   : > { %1772 = vst.msk [vmem:[%s4551_s22 + $0xa0] sm:$0xff] %vm1092_vm1, %v1740_v14  ;;  %v4848_v14 = vpack.c.b16 %v1923_v18, %v1922_v8  ;;  %v4214_v18 = vld [vmem:[%s4367_s12 + $0x54] sm:$0xf] }
 0x14d   : > { %v1431_v40 = vpop.f32.mrf.mxu1 }
 0x14e   : > { %v1478_v45 = vadd.f32 %v1431_v40, %v1256_v37  ;;  %v4210_v37 = vld [vmem:[%s4367_s12 + $0x48] sm:$0xf]  ;;  %v4211_v40 = vld [vmem:[%s4367_s12 + $0x50] sm:$0x1] }
 0x14f   : > { %v1565_v28 = vpop.f32.mrf.mxu2  ;;  %v3689_v2 = vrot.slane %v4210_v37, 9 }
 0x150   : > { %v1692_v44 = vpop.f32.mrf.mxu3  ;;  %3857 = vmatmul.msk.bf16.gmra.mxu1 %vm1092_vm1, %v4802_v59  ;;  %v1610_v52 = vadd.f32 %v1563_v22, %v1478_v45 }
 0x151   : > { %v1741_v17 = vadd.f32 %v1692_v44, %v1609_v43  ;;  %v1214_v47 = vpop.f32.mrf.mxu0  ;;  %v964_v43 = vrot.slane %v4211_v40, 5  ;;  %v962_v50 = vsel %vm4687_vm7, %v3689_v2, %v961_v34 }
 0x152   : > { %v1258_v1 = vadd.f32 %v4530_v7, %v1214_v47  ;;  %v1924_v55 = vunpack.c.l.b16 %v962_v50 }
 0x153   : > { %1773 = vst.msk [vmem:[%s4551_s22 + $0xa8] sm:$0xff] %vm1092_vm1, %v1741_v17  ;;  %v4864_v17 = vld [vmem:[%s5662_s3] ss:$0 sm:$0xff] }
 0x154   : > { %3875 = vmatmul.msk.bf16.gmra.mxu2 %vm1092_vm1, %v4469_v46  ;;  %3841 = vmatmul.msk.bf16.gmra.mxu0 %vm1092_vm1, %v4453_v19 }
 0x155   : > { %3891 = vmatmul.msk.bf16.gmra.mxu3 %vm1092_vm1, %v4825_v48  ;;  %v1433_v53 = vpop.f32.mrf.mxu1 }
 0x156   : > { %v1479_v6 = vadd.f32 %v1433_v53, %v1257_v0 }
 0x157   : > { %v1568_v61 = vpop.f32.mrf.mxu2 }
 0x158   : > { %v1695_v63 = vpop.f32.mrf.mxu3  ;;  %v1611_v12 = vadd.f32 %v1565_v28, %v1479_v6  ;;  %v968_v6 = vrot.slane %v4213_v5, 5 }
 0x159   : > { %v1742_v54 = vadd.f32 %v1695_v63, %v1610_v52  ;;  %v1216_v3 = vpop.f32.mrf.mxu0  ;;  %v965_v52 = vsel %vm4687_vm7, %v963_v38, %v964_v43 }
 0x15a   : > { %v1259_v45 = vadd.f32 %v4864_v17, %v1216_v3  ;;  %v1925_v58 = vunpack.c.l.b16 %v965_v52 }
 0x15b   : > { %1774 = vst.msk [vmem:[%s4551_s22 + $0xb0] sm:$0xff] %vm1092_vm1, %v1742_v54 }
 0x15c   : > { %v4876_v3 = vpack.c.b16 %v1925_v58, %v1924_v55 }
 0x15d   : > { %v1436_v20 = vpop.f32.mrf.mxu1 }
 0x15e   : > { %v1480_v24 = vadd.f32 %v1436_v20, %v1258_v1  ;;  %v3690_v20 = vrot.slane %v4214_v18, 9 }
 0x15f   : > { %v1570_v21 = vpop.f32.mrf.mxu2 }
 0x160   : > { %v1697_v22 = vpop.f32.mrf.mxu3  ;;  %3858 = vmatmul.msk.bf16.gmra.mxu1 %vm1092_vm1, %v4825_v48  ;;  %v1612_v7 = vadd.f32 %v1568_v61, %v1480_v24 }
 0x161   : > { %v1743_v16 = vadd.f32 %v1697_v22, %v1611_v12  ;;  %v1219_v27 = vpop.f32.mrf.mxu0  ;;  %v970_v12 = vrot.slane %v968_v6, 4 }
 0x162   : > { %v1260_v42 = vadd.f32 %v4864_v17, %v1219_v27 }
 0x163   : > { %1775 = vst.msk [vmem:[%s4551_s22 + $0xb8] sm:$0xff] %vm1092_vm1, %v1743_v16 }
 0x164   : > { %3876 = vmatmul.msk.bf16.gmra.mxu2 %vm1092_vm1, %v4485_v4  ;;  %3842 = vmatmul.msk.bf16.gmra.mxu0 %vm1092_vm1, %v4469_v46 }
 0x165   : > { %3892 = vmatmul.msk.bf16.gmra.mxu3 %vm1092_vm1, %v4848_v14  ;;  %v1438_v26 = vpop.f32.mrf.mxu1 }
 0x166   : > { %v1481_v53 = vadd.f32 %v1438_v26, %v1259_v45 }
 0x167   : > { %v1573_v28 = vpop.f32.mrf.mxu2 }
 0x168   : > { %v1700_v44 = vpop.f32.mrf.mxu3  ;;  %v1613_v60 = vadd.f32 %v1570_v21, %v1481_v53  ;;  %v4215_v21 = vld [vmem:[%s4367_s12 + $0x5c] sm:$0x1]  ;;  %v4216_v53 = vld [vmem:[%s4367_s12 + $0x64] sm:$0xf] }
 0x169   : > { %v1744_v47 = vadd.f32 %v1700_v44, %v1612_v7  ;;  %v1221_v36 = vpop.f32.mrf.mxu0  ;;  %v971_v22 = vrot.slane %v4215_v21, 5  ;;  %v969_v7 = vsel %vm4687_vm7, %v3690_v20, %v968_v6 }
 0x16a   : > { %v1261_v27 = vadd.f32 %v4864_v17, %v1221_v36  ;;  %v1926_v38 = vunpack.c.l.b16 %v969_v7 }
 0x16b   : > { %1776 = vst.msk [vmem:[%s4551_s22 + $0xc0] sm:$0xff] %vm1092_vm1, %v1744_v47  ;;  %v972_v26 = vsel %vm4687_vm7, %v970_v12, %v971_v22 }
 0x16c   : > { %v1927_v40 = vunpack.c.l.b16 %v972_v26 }
 0x16d   : > { %v1441_v35 = vpop.f32.mrf.mxu1 }
 0x16e   : > { %v1482_v54 = vadd.f32 %v1441_v35, %v1260_v42  ;;  %v4899_v50 = vpack.c.b16 %v1927_v40, %v1926_v38  ;;  %v975_v42 = vrot.slane %v4216_v53, 5  ;;  %v4217_v35 = vld [vmem:[%s4367_s12 + $0x60] sm:$0xf] }
 0x16f   : > { %v1575_v61 = vpop.f32.mrf.mxu2 }
 0x170   : > { %v1702_v63 = vpop.f32.mrf.mxu3  ;;  %3859 = vmatmul.msk.bf16.gmra.mxu1 %vm1092_vm1, %v4848_v14  ;;  %v1614_v1 = vadd.f32 %v1573_v28, %v1482_v54 }
 0x171   : > { %v1745_v0 = vadd.f32 %v1702_v63, %v1613_v60  ;;  %v1224_v49 = vpop.f32.mrf.mxu0  ;;  %v3691_v60 = vrot.slane %v4217_v35, 9  ;;  %v4218_v63 = vld [vmem:[%s4367_s12 + $0x68] sm:$0x1] }
 0x172   : > { %v1262_v2 = vadd.f32 %v4864_v17, %v1224_v49 }
 0x173   : > { %1777 = vst.msk [vmem:[%s4551_s22 + $0xc8] sm:$0xff] %vm1092_vm1, %v1745_v0  ;;  %v978_v0 = vrot.slane %v4218_v63, 5 }
 0x174   : > { %3877 = vmatmul.msk.bf16.gmra.mxu2 %vm1092_vm1, %v4501_v29  ;;  %3843 = vmatmul.msk.bf16.gmra.mxu0 %vm1092_vm1, %v4485_v4 }
 0x175   : > { %3893 = vmatmul.msk.bf16.gmra.mxu3 %vm1092_vm1, %v4876_v3  ;;  %v1443_v8 = vpop.f32.mrf.mxu1 }
 0x176   : > { %v1483_v37 = vadd.f32 %v1443_v8, %v1261_v27  ;;  %v976_v8 = vsel %vm4687_vm7, %v3691_v60, %v975_v42 }
 0x177   : > { %v1578_v16 = vpop.f32.mrf.mxu2  ;;  %v1928_v21 = vunpack.c.l.b16 %v976_v8 }
 0x178   : > { %v1705_v24 = vpop.f32.mrf.mxu3  ;;  %v1615_v28 = vadd.f32 %v1575_v61, %v1483_v37  ;;  %v977_v61 = vrot.slane %v975_v42, 4 }
 0x179   : > { %v1746_v31 = vadd.f32 %v1705_v24, %v1614_v1  ;;  %v1226_v34 = vpop.f32.mrf.mxu0 }
 0x17a   : > { %v1263_v5 = vadd.f32 %v4864_v17, %v1226_v34  ;;  %v979_v18 = vsel %vm4687_vm7, %v977_v61, %v978_v0 }
 0x17b   : > { %1778 = vst.msk [vmem:[%s4551_s22 + $0xd0] sm:$0xff] %vm1092_vm1, %v1746_v31  ;;  %v1929_v22 = vunpack.c.l.b16 %v979_v18 }
 0x17d   : > { %v1446_v43 = vpop.f32.mrf.mxu1  ;;  %v4922_v26 = vpack.c.b16 %v1929_v22, %v1928_v21  ;;  %v4222_v21 = vld [vmem:[%s4367_s12 + $0x7c] sm:$0xf] }
 0x17e   : > { %v1484_v36 = vadd.f32 %v1446_v43, %v1262_v2  ;;  %v4219_v2 = vld [vmem:[%s4367_s12 + $0x70] sm:$0xf]  ;;  %v989_v22 = vrot.slane %v4222_v21, 5 }
 0x17f   : > { %v1580_v44 = vpop.f32.mrf.mxu2  ;;  %v982_v38 = vrot.slane %v4219_v2, 5 }
 0x180   : > { %v1707_v45 = vpop.f32.mrf.mxu3  ;;  %3860 = vmatmul.msk.bf16.gmra.mxu1 %vm1092_vm1, %v4876_v3  ;;  %v1616_v55 = vadd.f32 %v1578_v16, %v1484_v36 }
 0x181   : > { %v1747_v47 = vadd.f32 %v1707_v45, %v1615_v28  ;;  %v1229_v52 = vpop.f32.mrf.mxu0  ;;  %v4220_v28 = vld [vmem:[%s4367_s12 + $0x6c] sm:$0xf]  ;;  %v984_v45 = vrot.slane %v982_v38, 4 }
 0x182   : > { %v1264_v12 = vadd.f32 %v4864_v17, %v1229_v52 }
 0x183   : > { %1779 = vst.msk [vmem:[%s4551_s22 + $0xd8] sm:$0xff] %vm1092_vm1, %v1747_v47  ;;  %v4221_v47 = vld [vmem:[%s4367_s12 + $0x74] sm:$0x1] }
 0x184   : > { %3878 = vmatmul.msk.bf16.gmra.mxu2 %vm1092_vm1, %v4517_v56  ;;  %3844 = vmatmul.msk.bf16.gmra.mxu0 %vm1092_vm1, %v4501_v29  ;;  %v985_v36 = vrot.slane %v4221_v47, 5 }
 0x185   : > { %3894 = vmatmul.msk.bf16.gmra.mxu3 %vm1092_vm1, %v4899_v50  ;;  %v1448_v58 = vpop.f32.mrf.mxu1 }
 0x186   : > { %v1485_v20 = vadd.f32 %v1448_v58, %v1263_v5  ;;  %v986_v60 = vsel %vm4687_vm7, %v984_v45, %v985_v36 }
 0x187   : > { %v1583_v54 = vpop.f32.mrf.mxu2 }
 0x188   : > { %v1710_v49 = vpop.f32.mrf.mxu3  ;;  %v1617_v24 = vadd.f32 %v1580_v44, %v1485_v20  ;;  %v3692_v44 = vrot.slane %v4220_v28, 9 }
 0x189   : > { %v1748_v6 = vadd.f32 %v1710_v49, %v1616_v55  ;;  %v1231_v1 = vpop.f32.mrf.mxu0 }
 0x18a   : > { %v1265_v42 = vadd.f32 %v4864_v17, %v1231_v1  ;;  %v983_v35 = vsel %vm4687_vm7, %v3692_v44, %v982_v38 }
 0x18b   : > { %1780 = vst.msk [vmem:[%s4551_s22 + $0xe0] sm:$0xff] %vm1092_vm1, %v1748_v6  ;;  %v1930_v0 = vunpack.c.l.b16 %v983_v35 }
 0x18d   : > { %v1451_v16 = vpop.f32.mrf.mxu1 }
 0x18e   : > { %v1486_v7 = vadd.f32 %v1451_v16, %v1264_v12 }
 0x18f   : > { %v1585_v27 = vpop.f32.mrf.mxu2 }
 0x190   : > { %v1712_v31 = vpop.f32.mrf.mxu3  ;;  %3861 = vmatmul.msk.bf16.gmra.mxu1 %vm1092_vm1, %v4899_v50  ;;  %v1618_v40 = vadd.f32 %v1583_v54, %v1486_v7  ;;  %v1931_v54 = vunpack.c.l.b16 %v986_v60  ;;  %v4224_v7 = vld [vmem:[%s4367_s12 + $0x80] sm:$0x1] }
 0x191   : > { %v1749_v34 = vadd.f32 %v1712_v31, %v1617_v24  ;;  %v1798_v37 = vpop.f32.mrf.mxu0 }
 0x192   : > { %v1878_v63 = vadd.f32 %v4864_v17, %v1798_v37  ;;  %v4945_v20 = vpack.c.b16 %v1931_v54, %v1930_v0  ;;  %v992_v37 = vrot.slane %v4224_v7, 5  ;;  %v4225_v54 = vld [vmem:[%s4367_s12 + $0x88] sm:$0xf] }
 0x193   : > { %1781 = vst.msk [vmem:[%s4551_s22 + $0xe8] sm:$0xff] %vm1092_vm1, %v1749_v34  ;;  %v991_v34 = vrot.slane %v989_v22, 4 }
 0x194   : > { %3879 = vmatmul.msk.bf16.gmra.mxu2 %vm1092_vm1, %v4536_v25  ;;  %3845 = vmatmul.msk.bf16.gmra.mxu0 %vm1092_vm1, %v4517_v56 }
 0x195   : > { %3895 = vmatmul.msk.bf16.gmra.mxu3 %vm1092_vm1, %v4922_v26  ;;  %v1453_v43 = vpop.f32.mrf.mxu1  ;;  %v993_v45 = vsel %vm4687_vm7, %v991_v34, %v992_v37 }
 0x196   : > { %v1487_v61 = vadd.f32 %v1453_v43, %v1265_v42 }
 0x197   : > { %v2146_v52 = vpop.f32.mrf.mxu2 }
 0x198   : > { %v1715_v53 = vpop.f32.mrf.mxu3  ;;  %v1619_v5 = vadd.f32 %v1585_v27, %v1487_v61  ;;  %v4223_v27 = vld [vmem:[%s4367_s12 + $0x78] sm:$0xf] }
 0x199   : > { %v1750_v55 = vadd.f32 %v1715_v53, %v1618_v40  ;;  %v1800_v58 = vpop.f32.mrf.mxu0  ;;  %v3693_v31 = vrot.slane %v4223_v27, 9  ;;  %v1933_v53 = vunpack.c.l.b16 %v993_v45 }
 0x19a   : > { %v1879_v40 = vadd.f32 %v4864_v17, %v1800_v58 }
 0x19b   : > { %1782 = vst.msk [vmem:[%s4551_s22 + $0xf0] sm:$0xff] %vm1092_vm1, %v1750_v55  ;;  %v990_v44 = vsel %vm4687_vm7, %v3693_v31, %v989_v22 }
 0x19d   : > { %v2020_v49 = vpop.f32.mrf.mxu1 }
 0x19e   : > { %v2100_v18 = vadd.f32 %v2020_v49, %v1878_v63  ;;  %v996_v49 = vrot.slane %v4225_v54, 5  ;;  %v4230_v54 = vld [vmem:[%s4367_s12 + $0x98] sm:$0x1] }
 0x19f   : > { %v2148_v6 = vpop.f32.mrf.mxu2 }
 0x1a0   : > { %v1717_v1 = vpop.f32.mrf.mxu3  ;;  %3862 = vmatmul.msk.bf16.gmra.mxu1 %vm1092_vm1, %v4922_v26  ;;  %v2226_v16 = vadd.f32 %v2146_v52, %v2100_v18  ;;  %v1932_v52 = vunpack.c.l.b16 %v990_v44  ;;  %v998_v18 = vrot.slane %v996_v49, 4 }
 0x1a1   : > { %v1751_v8 = vadd.f32 %v1717_v1, %v1619_v5  ;;  %v1803_v12 = vpop.f32.mrf.mxu0  ;;  %v4226_v1 = vld [vmem:[%s4367_s12 + $0x84] sm:$0xf] }
 0x1a2   : > { %v1880_v36 = vadd.f32 %v4864_v17, %v1803_v12  ;;  %v4968_v63 = vpack.c.b16 %v1933_v53, %v1932_v52  ;;  %v4227_v12 = vld [vmem:[%s4367_s12 + $0x8c] sm:$0x1] }
 0x1a3   : > { %1783 = vst.msk [vmem:[%s4551_s22 + $0xf8] sm:$0xff] %vm1092_vm1, %v1751_v8  ;;  %v3694_v8 = vrot.slane %v4226_v1, 9  ;;  %v999_v21 = vrot.slane %v4227_v12, 5 }
 0x1a4   : > { %3880 = vmatmul.msk.bf16.gmra.mxu2 %vm1092_vm1, %v4565_v11  ;;  %3846 = vmatmul.msk.bf16.gmra.mxu0 %vm1092_vm1, %v4536_v25 }
 0x1a5   : > { %3896 = vmatmul.msk.bf16.gmra.mxu3 %vm1092_vm1, %v4945_v20  ;;  %v2022_v24 = vpop.f32.mrf.mxu1  ;;  %v997_v34 = vsel %vm4687_vm7, %v3694_v8, %v996_v49  ;;  %v1000_v7 = vsel %vm4687_vm7, %v998_v18, %v999_v21  ;;  %v1006_v49 = vrot.slane %v4230_v54, 5 }
 0x1a6   : > { %v2101_v47 = vadd.f32 %v2022_v24, %v1879_v40  ;;  %v1935_v40 = vunpack.c.l.b16 %v1000_v7 }
 0x1a7   : > { %v2151_v2 = vpop.f32.mrf.mxu2 }
 0x1a8   : > { %v2278_v38 = vpop.f32.mrf.mxu3  ;;  %v2227_v55 = vadd.f32 %v2148_v6, %v2101_v47 }
 0x1a9   : > { %v2358_v43 = vadd.f32 %v2278_v38, %v2226_v16  ;;  %v1805_v28 = vpop.f32.mrf.mxu0  ;;  %v1934_v38 = vunpack.c.l.b16 %v997_v34 }
 0x1aa   : > { %v1881_v24 = vadd.f32 %v4864_v17, %v1805_v28 }
 0x1ab   : > { %3904 = vst.msk [vmem:[%s4551_s22 + $0x100] sm:$0xff] %vm1092_vm1, %v2358_v43  ;;  %v4991_v52 = vpack.c.b16 %v1935_v40, %v1934_v38 }
 0x1ad   : > { %v2025_v42 = vpop.f32.mrf.mxu1 }
 0x1ae   : > { %v2102_v61 = vadd.f32 %v2025_v42, %v1880_v36  ;;  %v4228_v42 = vld [vmem:[%s4367_s12 + $0x94] sm:$0xf] }
 0x1af   : > { %v2153_v58 = vpop.f32.mrf.mxu2 }
 0x1b0   : > { %v2280_v35 = vpop.f32.mrf.mxu3  ;;  %3863 = vmatmul.msk.bf16.gmra.mxu1 %vm1092_vm1, %v4945_v20  ;;  %v2228_v5 = vadd.f32 %v2151_v2, %v2102_v61 }
 0x1b1   : > { %v2359_v60 = vadd.f32 %v2280_v35, %v2227_v55  ;;  %v1808_v0 = vpop.f32.mrf.mxu0  ;;  %v1003_v55 = vrot.slane %v4228_v42, 5 }
 0x1b2   : > { %v1882_v2 = vadd.f32 %v4864_v17, %v1808_v0 }
 0x1b3   : > { %3905 = vst.msk [vmem:[%s4551_s22 + $0x108] sm:$0xff] %vm1092_vm1, %v2359_v60  ;;  %v4229_v60 = vld [vmem:[%s4367_s12 + $0x90] sm:$0xf]  ;;  %v1005_v0 = vrot.slane %v1003_v55, 4 }
 0x1b4   : > { %3881 = vmatmul.msk.bf16.gmra.mxu2 %vm1092_vm1, %v4587_v62  ;;  %3847 = vmatmul.msk.bf16.gmra.mxu0 %vm1092_vm1, %v4565_v11  ;;  %v3695_v61 = vrot.slane %v4229_v60, 9 }
 0x1b5   : > { %3897 = vmatmul.msk.bf16.gmra.mxu3 %vm1092_vm1, %v4968_v63  ;;  %v2027_v6 = vpop.f32.mrf.mxu1  ;;  %v1007_v21 = vsel %vm4687_vm7, %v1005_v0, %v1006_v49 }
 0x1b6   : > { %v2103_v37 = vadd.f32 %v2027_v6, %v1881_v24  ;;  %v1004_v12 = vsel %vm4687_vm7, %v3695_v61, %v1003_v55  ;;  %v4233_v55 = vld [vmem:[%s4367_s12 + $0xa4] sm:$0x1] }
 0x1b7   : > { %v2156_v22 = vpop.f32.mrf.mxu2  ;;  %v1936_v24 = vunpack.c.l.b16 %v1004_v12 }
 0x1b8   : > { %v2283_v16 = vpop.f32.mrf.mxu3  ;;  %v2229_v44 = vadd.f32 %v2153_v58, %v2103_v37 }
 0x1b9   : > { %v2360_v27 = vadd.f32 %v2283_v16, %v2228_v5  ;;  %v1810_v31 = vpop.f32.mrf.mxu0 }
 0x1ba   : > { %v1883_v1 = vadd.f32 %v4864_v17, %v1810_v31 }
 0x1bb   : > { %3906 = vst.msk [vmem:[%s4551_s22 + $0x110] sm:$0xff] %vm1092_vm1, %v2360_v27  ;;  %v1937_v27 = vunpack.c.l.b16 %v1007_v21 }
 0x1bd   : > { %v2030_v43 = vpop.f32.mrf.mxu1  ;;  %v5014_v40 = vpack.c.b16 %v1937_v27, %v1936_v24 }
 0x1be   : > { %v2104_v36 = vadd.f32 %v2030_v43, %v1882_v2 }
 0x1bf   : > { %v2158_v28 = vpop.f32.mrf.mxu2 }
 0x1c0   : > { %v2285_v45 = vpop.f32.mrf.mxu3  ;;  %3864 = vmatmul.msk.bf16.gmra.mxu1 %vm1092_vm1, %v4968_v63  ;;  %v2230_v58 = vadd.f32 %v2156_v22, %v2104_v36  ;;  %v4232_v36 = vld [vmem:[%s4367_s12 + $0x9c] sm:$0xf] }
 0x1c1   : > { %v2361_v47 = vadd.f32 %v2285_v45, %v2229_v44  ;;  %v1813_v53 = vpop.f32.mrf.mxu0  ;;  %v4231_v44 = vld [vmem:[%s4367_s12 + $0xa0] sm:$0xf] }
 0x1c2   : > { %v1884_v16 = vadd.f32 %v4864_v17, %v1813_v53  ;;  %v1010_v45 = vrot.slane %v4231_v44, 5  ;;  %v3696_v53 = vrot.slane %v4232_v36, 9 }
 0x1c3   : > { %3907 = vst.msk [vmem:[%s4551_s22 + $0x118] sm:$0xff] %vm1092_vm1, %v2361_v47 }
 0x1c4   : > { %3882 = vmatmul.msk.bf16.gmra.mxu2 %vm1092_vm1, %v4606_v41  ;;  %3848 = vmatmul.msk.bf16.gmra.mxu0 %vm1092_vm1, %v4587_v62  ;;  %v1012_v42 = vrot.slane %v1010_v45, 4  ;;  %v1011_v49 = vsel %vm4687_vm7, %v3696_v53, %v1010_v45 }
 0x1c5   : > { %3898 = vmatmul.msk.bf16.gmra.mxu3 %vm1092_vm1, %v4991_v52  ;;  %v2032_v35 = vpop.f32.mrf.mxu1 }
 0x1c6   : > { %v2105_v22 = vadd.f32 %v2032_v35, %v1883_v1 }
 0x1c7   : > { %v2161_v5 = vpop.f32.mrf.mxu2 }
 0x1c8   : > { %v2288_v6 = vpop.f32.mrf.mxu3  ;;  %v2231_v7 = vadd.f32 %v2158_v28, %v2105_v22 }
 0x1c9   : > { %v2362_v8 = vadd.f32 %v2288_v6, %v2230_v58  ;;  %v1815_v18 = vpop.f32.mrf.mxu0  ;;  %v1013_v58 = vrot.slane %v4233_v55, 5 }
 0x1ca   : > { %v1885_v61 = vadd.f32 %v4864_v17, %v1815_v18 }
 0x1cb   : > { %3908 = vst.msk [vmem:[%s4551_s22 + $0x120] sm:$0xff] %vm1092_vm1, %v2362_v8  ;;  %v1014_v6 = vsel %vm4687_vm7, %v1012_v42, %v1013_v58  ;;  %v1938_v8 = vunpack.c.l.b16 %v1011_v49 }
 0x1cc   : > { %v1939_v12 = vunpack.c.l.b16 %v1014_v6 }
 0x1cd   : > { %v2035_v34 = vpop.f32.mrf.mxu1 }
 0x1ce   : > { %v2106_v38 = vadd.f32 %v2035_v34, %v1884_v16  ;;  %v5037_v34 = vpack.c.b16 %v1939_v12, %v1938_v8 }
 0x1cf   : > { %v2163_v31 = vpop.f32.mrf.mxu2 }
 0x1d0   : > { %v2290_v37 = vpop.f32.mrf.mxu3  ;;  %3865 = vmatmul.msk.bf16.gmra.mxu1 %vm1092_vm1, %v4991_v52  ;;  %v2232_v28 = vadd.f32 %v2161_v5, %v2106_v38 }
 0x1d1   : > { %v2363_v2 = vadd.f32 %v2290_v37, %v2231_v7  ;;  %v1818_v43 = vpop.f32.mrf.mxu0  ;;  %v4234_v37 = vld [vmem:[%s4367_s12 + $0xac] sm:$0xf] }
 0x1d2   : > { %v1886_v1 = vadd.f32 %v4864_v17, %v1818_v43  ;;  %v4235_v43 = vld [vmem:[%s4367_s12 + $0xa8] sm:$0xf] }
 0x1d3   : > { %3909 = vst.msk [vmem:[%s4551_s22 + $0x128] sm:$0xff] %vm1092_vm1, %v2363_v2  ;;  %v1017_v2 = vrot.slane %v4234_v37, 5  ;;  %v3697_v44 = vrot.slane %v4235_v43, 9  ;;  %v4238_v37 = vld [vmem:[%s4367_s12 + $0xb4] sm:$0xf] }
 0x1d4   : > { %3883 = vmatmul.msk.bf16.gmra.mxu2 %vm1092_vm1, %v4631_v32  ;;  %3849 = vmatmul.msk.bf16.gmra.mxu0 %vm1092_vm1, %v4606_v41 }
 0x1d5   : > { %3899 = vmatmul.msk.bf16.gmra.mxu3 %vm1092_vm1, %v5014_v40  ;;  %v2037_v47 = vpop.f32.mrf.mxu1  ;;  %v1019_v45 = vrot.slane %v1017_v2, 4 }
 0x1d6   : > { %v2107_v5 = vadd.f32 %v2037_v47, %v1885_v61 }
 0x1d7   : > { %v2166_v35 = vpop.f32.mrf.mxu2 }
 0x1d8   : > { %v2293_v60 = vpop.f32.mrf.mxu3  ;;  %v2233_v22 = vadd.f32 %v2163_v31, %v2107_v5 }
 0x1d9   : > { %v2364_v0 = vadd.f32 %v2293_v60, %v2232_v28  ;;  %v1820_v54 = vpop.f32.mrf.mxu0  ;;  %v4236_v28 = vld [vmem:[%s4367_s12 + $0xb0] sm:$0x1]  ;;  %v1018_v60 = vsel %vm4687_vm7, %v3697_v44, %v1017_v2  ;;  %v3698_v2 = vrot.slane %v4238_v37, 9 }
 0x1da   : > { %v1020_v47 = vrot.slane %v4236_v28, 5  ;;  %v1887_v42 = vadd.f32 %v4864_v17, %v1820_v54  ;;  %v1940_v49 = vunpack.c.l.b16 %v1018_v60 }
 0x1db   : > { %3910 = vst.msk [vmem:[%s4551_s22 + $0x130] sm:$0xff] %vm1092_vm1, %v2364_v0 }
 0x1dc   : > { %v1021_v61 = vsel %vm4687_vm7, %v1019_v45, %v1020_v47 }
 0x1dd   : > { %v2040_v21 = vpop.f32.mrf.mxu1  ;;  %v1941_v6 = vunpack.c.l.b16 %v1021_v61 }
 0x1de   : > { %v2108_v27 = vadd.f32 %v2040_v21, %v1886_v1 }
 0x1df   : > { %v2168_v18 = vpop.f32.mrf.mxu2 }
 0x1e0   : > { %v2295_v16 = vpop.f32.mrf.mxu3  ;;  %3866 = vmatmul.msk.bf16.gmra.mxu1 %vm1092_vm1, %v5014_v40  ;;  %v2234_v31 = vadd.f32 %v2166_v35, %v2108_v27 }
 0x1e1   : > { %v2365_v24 = vadd.f32 %v2295_v16, %v2233_v22  ;;  %v1823_v7 = vpop.f32.mrf.mxu0  ;;  %v5060_v22 = vpack.c.b16 %v1941_v6, %v1940_v49 }
 0x1e2   : > { %v1888_v0 = vadd.f32 %v4864_v17, %v1823_v7 }
 0x1e3   : > { %3911 = vst.msk [vmem:[%s4551_s22 + $0x138] sm:$0xff] %vm1092_vm1, %v2365_v24  ;;  %v4237_v24 = vld [vmem:[%s4367_s12 + $0xb8] sm:$0xf] }
 0x1e4   : > { %3884 = vmatmul.msk.bf16.gmra.mxu2 %vm1092_vm1, %v4657_v23  ;;  %3850 = vmatmul.msk.bf16.gmra.mxu0 %vm1092_vm1, %v4631_v32  ;;  %v1024_v27 = vrot.slane %v4237_v24, 5 }
 0x1e5   : > { %3900 = vmatmul.msk.bf16.gmra.mxu3 %vm1092_vm1, %v5037_v34  ;;  %v2042_v38 = vpop.f32.mrf.mxu1 }
 0x1e6   : > { %v2109_v35 = vadd.f32 %v2042_v38, %v1887_v42  ;;  %v4239_v38 = vld [vmem:[%s4367_s12 + $0xbc] sm:$0x1]  ;;  %v1025_v42 = vsel %vm4687_vm7, %v3698_v2, %v1024_v27  ;;  %v4040_v2 = vld [vmem:[%s5661_s2 + $0x18] sm:$0x3] }
 0x1e7   : > { %v2171_v36 = vpop.f32.mrf.mxu2  ;;  %v1027_v43 = vrot.slane %v4239_v38, 5  ;;  %v1942_v61 = vunpack.c.l.b16 %v1025_v42  ;;  %v4057_v38 = vld [vmem:[%s5661_s2 + $0x1a] sm:$0x3] }
 0x1e8   : > { %v2298_v53 = vpop.f32.mrf.mxu3  ;;  %v2235_v1 = vadd.f32 %v2168_v18, %v2109_v35  ;;  %v3101_v42 = vsel %vm1141_vm0, %v4057_v38, 0 }
 0x1e9   : > { %v2366_v55 = vadd.f32 %v2298_v53, %v2234_v31  ;;  %v1825_v58 = vpop.f32.mrf.mxu0  ;;  %v1026_v31 = vrot.slane %v1024_v27, 4  ;;  %3110 = vmatpush.bf16.msrb.mxu1 %v3101_v42 }
 0x1ea   : > { %v1889_v28 = vadd.f32 %v4864_v17, %v1825_v58 }
 0x1eb   : > { %3912 = vst.msk [vmem:[%s4551_s22 + $0x140] sm:$0xff] %vm1092_vm1, %v2366_v55  ;;  %v1028_v55 = vsel %vm4687_vm7, %v1026_v31, %v1027_v43  ;;  %v4091_v31 = vld [vmem:[%s5661_s2 + $0x1e] sm:$0x3] }
 0x1ec   : > { %v1943_v35 = vunpack.c.l.b16 %v1028_v55 }
 0x1ed   : > { %v2045_v5 = vpop.f32.mrf.mxu1 }
 0x1ee   : > { %v2110_v21 = vadd.f32 %v2045_v5, %v1888_v0  ;;  %v4240_v5 = vld [vmem:[%s4662_s15 + $0x4] sm:$0xf] }
 0x1ef   : > { %v2173_v54 = vpop.f32.mrf.mxu2 }
 0x1f0   : > { %v2300_v8 = vpop.f32.mrf.mxu3  ;;  %3867 = vmatmul.msk.bf16.gmra.mxu1 %vm1092_vm1, %v5037_v34  ;;  %v2236_v18 = vadd.f32 %v2171_v36, %v2110_v21  ;;  %v5084_v21 = vpack.c.b16 %v1943_v35, %v1942_v61 }
 0x1f1   : > { %v2367_v12 = vadd.f32 %v2300_v8, %v2235_v1  ;;  %v1828_v16 = vpop.f32.mrf.mxu0  ;;  %v1031_v1 = vrot.slane %v4240_v5, 5 }
 0x1f2   : > { %v1890_v60 = vadd.f32 %v4864_v17, %v1828_v16  ;;  %v4074_v16 = vld [vmem:[%s5661_s2 + $0x1c] sm:$0x3] }
 0x1f3   : > { %3913 = vst.msk [vmem:[%s4551_s22 + $0x148] sm:$0xff] %vm1092_vm1, %v2367_v12 }
 0x1f4   : > { %3885 = vmatmul.msk.bf16.gmra.mxu2 %vm1092_vm1, %v4685_v10  ;;  %3851 = vmatmul.msk.bf16.gmra.mxu0 %vm1092_vm1, %v4657_v23 }
 0x1f5   : > { %3901 = vmatmul.msk.bf16.gmra.mxu3 %vm1092_vm1, %v5060_v22  ;;  %v2047_v7 = vpop.f32.mrf.mxu1 }
 0x1f6   : > { %v2111_v36 = vadd.f32 %v2047_v7, %v1889_v28  ;;  %v3227_v7 = vsel %vm1141_vm0, %v4074_v16, 0 }
 0x1f7   : > { %v2176_v44 = vpop.f32.mrf.mxu2  ;;  %3236 = vmatpush.bf16.msrb.mxu2 %v3227_v7 }
 0x1f8   : > { %v2303_v45 = vpop.f32.mrf.mxu3  ;;  %v2237_v49 = vadd.f32 %v2173_v54, %v2111_v36  ;;  %v4241_v54 = vld [vmem:[%s4662_s15] sm:$0xf] }
 0x1f9   : > { %v2368_v47 = vadd.f32 %v2303_v45, %v2236_v18  ;;  %v1830_v53 = vpop.f32.mrf.mxu0  ;;  %v3699_v27 = vrot.slane %v4241_v54, 9  ;;  %v1033_v18 = vrot.slane %v1031_v1, 4  ;;  %v4242_v45 = vld [vmem:[%s4662_s15 + $0x8] sm:$0x1] }
 0x1fa   : > { %v1034_v28 = vrot.slane %v4242_v45, 5 }
 0x1fb   : > { %3914 = vst.msk [vmem:[%s4551_s22 + $0x150] sm:$0xff] %vm1092_vm1, %v2368_v47  ;;  %v2975_v47 = vsel %vm1141_vm0, %v4040_v2, 0 }
 0x1fc   : > { %2984 = vmatpush.bf16.msrb.mxu0 %v2975_v47 }
 0x1fd   : > { %v2050_v0 = vpop.f32.mrf.mxu1 }
 0x1fe   : > { %v2112_v12 = vadd.f32 %v2050_v0, %v1890_v60  ;;  %v1891_v60 = vadd.f32 %v4864_v17, %v1830_v53  ;;  %v1032_v0 = vsel %vm4687_vm7, %v3699_v27, %v1031_v1 }
 0x1ff   : > { %v2178_v58 = vpop.f32.mrf.mxu2 }
 0x200   : > { %v2305_v6 = vpop.f32.mrf.mxu3  ;;  %3868 = vmatmul.msk.bf16.gmra.mxu1 %vm1092_vm1, %v5060_v22  ;;  %v2238_v37 = vadd.f32 %v2176_v44, %v2112_v12  ;;  %v3359_v44 = vsel %vm1141_vm0, %v4091_v31, 0 }
 0x201   : > { %v2369_v8 = vadd.f32 %v2305_v6, %v2237_v49  ;;  %v1833_v24 = vpop.f32.mrf.mxu0  ;;  %3368 = vmatpush.bf16.msrb.mxu3 %v3359_v44  ;;  %v1035_v49 = vsel %vm4687_vm7, %v1033_v18, %v1034_v28  ;;  %v4243_v18 = vld [vmem:[%s4367_s12 + $0x18] sm:$0xff] }
 0x202   : > { %v1892_v5 = vadd.f32 %v4864_v17, %v1833_v24  ;;  %v2261_v12 = vunpack.c.l.b16 %v1035_v49  ;;  %v4244_v24 = vld [vmem:[%s4367_s12 + $0xc] sm:$0xff] }
 0x203   : > { %3915 = vst.msk [vmem:[%s4551_s22 + $0x158] sm:$0xff] %vm1092_vm1, %v2369_v8  ;;  %v2260_v8 = vunpack.c.l.b16 %v1032_v0 }
 0x204   : > { %3886 = vmatmul.msk.bf16.gmra.mxu2 %vm1092_vm1, %v4733_v9  ;;  %3852 = vmatmul.msk.bf16.gmra.mxu0 %vm1092_vm1, %v4685_v10 }
 0x205   : > { %3902 = vmatmul.msk.bf16.gmra.mxu3 %vm1092_vm1, %v5084_v21  ;;  %v2052_v43 = vpop.f32.mrf.mxu1  ;;  %v5122_v1 = vpack.c.b16 %v2261_v12, %v2260_v8 }
 0x206   : > { %v2113_v6 = vadd.f32 %v2052_v43, %v1891_v60 }
 0x207   : > { %v2181_v55 = vpop.f32.mrf.mxu2 }
 0x208   : > { %v2308_v36 = vpop.f32.mrf.mxu3  ;;  %v2239_v53 = vadd.f32 %v2178_v58, %v2113_v6 }
 0x209   : > { %v2370_v61 = vadd.f32 %v2308_v36, %v2238_v37  ;;  %v1835_v35 = vpop.f32.mrf.mxu0 }
 0x20a   : > { %v1893_v45 = vadd.f32 %v4864_v17, %v1835_v35  ;;  %v4245_v35 = vld [vmem:[%s4367_s12 + $0x24] sm:$0xff] }
 0x20b   : > { %3916 = vst.msk [vmem:[%s4551_s22 + $0x160] sm:$0xff] %vm1092_vm1, %v2370_v61 }
 0x20d   : > { %v2055_v16 = vpop.f32.mrf.mxu1 }
 0x20e   : > { %v2114_v2 = vadd.f32 %v2055_v16, %v1892_v5 }
 0x20f   : > { %v2183_v54 = vpop.f32.mrf.mxu2 }
 0x210   : > { %v2310_v7 = vpop.f32.mrf.mxu3  ;;  %3869 = vmatmul.msk.bf16.gmra.mxu1 %vm1092_vm1, %v5084_v21  ;;  %v2240_v58 = vadd.f32 %v2181_v55, %v2114_v2 }
 0x211   : > { %v2371_v37 = vadd.f32 %v2310_v7, %v2239_v53  ;;  %v1838_v27 = vpop.f32.mrf.mxu0 }
 0x212   : > { %v1894_v42 = vadd.f32 %v4864_v17, %v1838_v27 }
 0x213   : > { %3917 = vst.msk [vmem:[%s4551_s22 + $0x168] sm:$0xff] %vm1092_vm1, %v2371_v37 }
 0x214   : > { %3975 = vmatmul.msk.bf16.vlgmr.msra.gmra.mxu2 %vm1092_vm1, %v4243_v18  ;;  %3937 = vmatmul.msk.bf16.vlgmr.msra.gmra.mxu0 %vm1092_vm1, %v4244_v24 }
 0x215   : > { %3903 = vmatmul.msk.bf16.gmra.mxu3 %vm1092_vm1, %v5122_v1  ;;  %v2057_v31 = vpop.f32.mrf.mxu1 }
 0x216   : > { %v2115_v44 = vadd.f32 %v2057_v31, %v1893_v45  ;;  %v4246_v45 = vld [vmem:[%s4367_s12 + $0x30] sm:$0xff] }
 0x217   : > { %v2186_v38 = vpop.f32.mrf.mxu2 }
 0x218   : > { %v2313_v43 = vpop.f32.mrf.mxu3  ;;  %v2241_v60 = vadd.f32 %v2183_v54, %v2115_v44 }
 0x219   : > { %v2372_v28 = vadd.f32 %v2313_v43, %v2240_v58  ;;  %v1840_v47 = vpop.f32.mrf.mxu0 }
 0x21a   : > { %v1895_v53 = vadd.f32 %v4864_v17, %v1840_v47 }
 0x21b   : > { %3918 = vst.msk [vmem:[%s4551_s22 + $0x170] sm:$0xff] %vm1092_vm1, %v2372_v28 }
 0x21d   : > { %v2060_v36 = vpop.f32.mrf.mxu1 }
 0x21e   : > { %v2116_v55 = vadd.f32 %v2060_v36, %v1894_v42 }
 0x21f   : > { %v2188_v61 = vpop.f32.mrf.mxu2 }
 0x220   : > { %v2315_v0 = vpop.f32.mrf.mxu3  ;;  %3954 = vmatmul.msk.bf16.vlgmr.msra.gmra.mxu1 %vm1092_vm1, %v4404_v13  ;;  %v2242_v5 = vadd.f32 %v2186_v38, %v2116_v55 }
 0x221   : > { %v2373_v49 = vadd.f32 %v2315_v0, %v2241_v60  ;;  %v1843_v6 = vpop.f32.mrf.mxu0 }
 0x222   : > { %v1896_v2 = vadd.f32 %v4864_v17, %v1843_v6 }
 0x223   : > { %3919 = vst.msk [vmem:[%s4551_s22 + $0x178] sm:$0xff] %vm1092_vm1, %v2373_v49 }
 0x224   : > { %3976 = vmatmul.msk.bf16.gmra.mxu2 %vm1092_vm1, %v4245_v35  ;;  %3938 = vmatmul.msk.bf16.gmra.mxu0 %vm1092_vm1, %v4243_v18 }
 0x225   : > { %3992 = vmatmul.msk.bf16.vlgmr.msra.gmra.mxu3 %vm1092_vm1, %v4421_v33  ;;  %v2062_v8 = vpop.f32.mrf.mxu1 }
 0x226   : > { %v2117_v37 = vadd.f32 %v2062_v8, %v1895_v53  ;;  %v4247_v53 = vld [vmem:[%s4367_s12 + $0x3c] sm:$0xff] }
 0x227   : > { %v2191_v12 = vpop.f32.mrf.mxu2 }
 0x228   : > { %v2318_v16 = vpop.f32.mrf.mxu3  ;;  %v2243_v18 = vadd.f32 %v2188_v61, %v2117_v37 }
 0x229   : > { %v2374_v54 = vadd.f32 %v2318_v16, %v2242_v5  ;;  %v1845_v7 = vpop.f32.mrf.mxu0 }
 0x22a   : > { %v1897_v36 = vadd.f32 %v4864_v17, %v1845_v7 }
 0x22b   : > { %3920 = vst.msk [vmem:[%s4551_s22 + $0x180] sm:$0xff] %vm1092_vm1, %v2374_v54 }
 0x22d   : > { %v2065_v27 = vpop.f32.mrf.mxu1 }
 0x22e   : > { %v2118_v38 = vadd.f32 %v2065_v27, %v1896_v2 }
 0x22f   : > { %v2193_v24 = vpop.f32.mrf.mxu2 }
 0x230   : > { %v2320_v58 = vpop.f32.mrf.mxu3  ;;  %3955 = vmatmul.msk.bf16.gmra.mxu1 %vm1092_vm1, %v4421_v33  ;;  %v2244_v28 = vadd.f32 %v2191_v12, %v2118_v38 }
 0x231   : > { %v2375_v31 = vadd.f32 %v2320_v58, %v2243_v18  ;;  %v1848_v43 = vpop.f32.mrf.mxu0 }
 0x232   : > { %v1898_v49 = vadd.f32 %v4864_v17, %v1848_v43 }
 0x233   : > { %3921 = vst.msk [vmem:[%s4551_s22 + $0x188] sm:$0xff] %vm1092_vm1, %v2375_v31 }
 0x234   : > { %3977 = vmatmul.msk.bf16.gmra.mxu2 %vm1092_vm1, %v4246_v45  ;;  %3939 = vmatmul.msk.bf16.gmra.mxu0 %vm1092_vm1, %v4245_v35 }
 0x235   : > { %3993 = vmatmul.msk.bf16.gmra.mxu3 %vm1092_vm1, %v4437_v57  ;;  %v2067_v47 = vpop.f32.mrf.mxu1 }
 0x236   : > { %v2119_v0 = vadd.f32 %v2067_v47, %v1897_v36  ;;  %v4248_v36 = vld [vmem:[%s4367_s12 + $0x48] sm:$0xff] }
 0x237   : > { %v2196_v44 = vpop.f32.mrf.mxu2 }
 0x238   : > { %v2323_v42 = vpop.f32.mrf.mxu3  ;;  %v2245_v6 = vadd.f32 %v2193_v24, %v2119_v0 }
 0x239   : > { %v2376_v60 = vadd.f32 %v2323_v42, %v2244_v28  ;;  %v1850_v61 = vpop.f32.mrf.mxu0 }
 0x23a   : > { %v1899_v27 = vadd.f32 %v4864_v17, %v1850_v61 }
 0x23b   : > { %3922 = vst.msk [vmem:[%s4551_s22 + $0x190] sm:$0xff] %vm1092_vm1, %v2376_v60 }
 0x23d   : > { %v2070_v55 = vpop.f32.mrf.mxu1 }
 0x23e   : > { %v2120_v12 = vadd.f32 %v2070_v55, %v1898_v49 }
 0x23f   : > { %v2198_v35 = vpop.f32.mrf.mxu2 }
 0x240   : > { %v2325_v5 = vpop.f32.mrf.mxu3  ;;  %3956 = vmatmul.msk.bf16.gmra.mxu1 %vm1092_vm1, %v4437_v57  ;;  %v2246_v54 = vadd.f32 %v2196_v44, %v2120_v12 }
 0x241   : > { %v2377_v8 = vadd.f32 %v2325_v5, %v2245_v6  ;;  %v1853_v16 = vpop.f32.mrf.mxu0 }
 0x242   : > { %v1900_v31 = vadd.f32 %v4864_v17, %v1853_v16 }
 0x243   : > { %3923 = vst.msk [vmem:[%s4551_s22 + $0x198] sm:$0xff] %vm1092_vm1, %v2377_v8 }
 0x244   : > { %3978 = vmatmul.msk.bf16.gmra.mxu2 %vm1092_vm1, %v4247_v53  ;;  %3940 = vmatmul.msk.bf16.gmra.mxu0 %vm1092_vm1, %v4246_v45 }
 0x245   : > { %3994 = vmatmul.msk.bf16.gmra.mxu3 %vm1092_vm1, %v4453_v19  ;;  %v2072_v7 = vpop.f32.mrf.mxu1 }
 0x246   : > { %v2121_v58 = vadd.f32 %v2072_v7, %v1899_v27  ;;  %v4249_v27 = vld [vmem:[%s4367_s12 + $0x54] sm:$0xff] }
 0x247   : > { %v2201_v37 = vpop.f32.mrf.mxu2 }
 0x248   : > { %v2328_v2 = vpop.f32.mrf.mxu3  ;;  %v2247_v43 = vadd.f32 %v2198_v35, %v2121_v58 }
 0x249   : > { %v2378_v18 = vadd.f32 %v2328_v2, %v2246_v54  ;;  %v1855_v24 = vpop.f32.mrf.mxu0 }
 0x24a   : > { %v1901_v55 = vadd.f32 %v4864_v17, %v1855_v24 }
 0x24b   : > { %3924 = vst.msk [vmem:[%s4551_s22 + $0x1a0] sm:$0xff] %vm1092_vm1, %v2378_v18 }
 0x24d   : > { %v2075_v38 = vpop.f32.mrf.mxu1 }
 0x24e   : > { %v2122_v44 = vadd.f32 %v2075_v38, %v1900_v31 }
 0x24f   : > { %v2203_v45 = vpop.f32.mrf.mxu2 }
 0x250   : > { %v2330_v28 = vpop.f32.mrf.mxu3  ;;  %3957 = vmatmul.msk.bf16.gmra.mxu1 %vm1092_vm1, %v4453_v19  ;;  %v2248_v60 = vadd.f32 %v2201_v37, %v2122_v44 }
 0x251   : > { %v2379_v47 = vadd.f32 %v2330_v28, %v2247_v43  ;;  %v1858_v42 = vpop.f32.mrf.mxu0 }
 0x252   : > { %v1902_v8 = vadd.f32 %v4864_v17, %v1858_v42 }
 0x253   : > { %3925 = vst.msk [vmem:[%s4551_s22 + $0x1a8] sm:$0xff] %vm1092_vm1, %v2379_v47 }
 0x254   : > { %3979 = vmatmul.msk.bf16.gmra.mxu2 %vm1092_vm1, %v4248_v36  ;;  %3941 = vmatmul.msk.bf16.gmra.mxu0 %vm1092_vm1, %v4247_v53 }
 0x255   : > { %3995 = vmatmul.msk.bf16.gmra.mxu3 %vm1092_vm1, %v4469_v46  ;;  %v2077_v61 = vpop.f32.mrf.mxu1 }
 0x256   : > { %v2123_v5 = vadd.f32 %v2077_v61, %v1901_v55  ;;  %v4250_v55 = vld [vmem:[%s4367_s12 + $0x60] sm:$0xff] }
 0x257   : > { %v2206_v0 = vpop.f32.mrf.mxu2 }
 0x258   : > { %v2333_v49 = vpop.f32.mrf.mxu3  ;;  %v2249_v16 = vadd.f32 %v2203_v45, %v2123_v5 }
 0x259   : > { %v2380_v6 = vadd.f32 %v2333_v49, %v2248_v60  ;;  %v1860_v35 = vpop.f32.mrf.mxu0 }
 0x25a   : > { %v1903_v38 = vadd.f32 %v4864_v17, %v1860_v35 }
 0x25b   : > { %3926 = vst.msk [vmem:[%s4551_s22 + $0x1b0] sm:$0xff] %vm1092_vm1, %v2380_v6 }
 0x25d   : > { %v2080_v12 = vpop.f32.mrf.mxu1 }
 0x25e   : > { %v2124_v37 = vadd.f32 %v2080_v12, %v1902_v8 }
 0x25f   : > { %v2208_v53 = vpop.f32.mrf.mxu2 }
 0x260   : > { %v2335_v54 = vpop.f32.mrf.mxu3  ;;  %3958 = vmatmul.msk.bf16.gmra.mxu1 %vm1092_vm1, %v4469_v46  ;;  %v2250_v18 = vadd.f32 %v2206_v0, %v2124_v37 }
 0x261   : > { %v2381_v7 = vadd.f32 %v2335_v54, %v2249_v16  ;;  %v1863_v2 = vpop.f32.mrf.mxu0 }
 0x262   : > { %v1904_v47 = vadd.f32 %v4864_v17, %v1863_v2 }
 0x263   : > { %3927 = vst.msk [vmem:[%s4551_s22 + $0x1b8] sm:$0xff] %vm1092_vm1, %v2381_v7 }
 0x264   : > { %3980 = vmatmul.msk.bf16.gmra.mxu2 %vm1092_vm1, %v4249_v27  ;;  %3942 = vmatmul.msk.bf16.gmra.mxu0 %vm1092_vm1, %v4248_v36 }
 0x265   : > { %3996 = vmatmul.msk.bf16.gmra.mxu3 %vm1092_vm1, %v4485_v4  ;;  %v2082_v24 = vpop.f32.mrf.mxu1 }
 0x266   : > { %v2125_v28 = vadd.f32 %v2082_v24, %v1903_v38  ;;  %v4251_v38 = vld [vmem:[%s4367_s12 + $0x6c] sm:$0xff] }
 0x267   : > { %v2211_v58 = vpop.f32.mrf.mxu2 }
 0x268   : > { %v2338_v31 = vpop.f32.mrf.mxu3  ;;  %v2251_v42 = vadd.f32 %v2208_v53, %v2125_v28 }
 0x269   : > { %v2382_v43 = vadd.f32 %v2338_v31, %v2250_v18  ;;  %v1865_v45 = vpop.f32.mrf.mxu0 }
 0x26a   : > { %v1905_v12 = vadd.f32 %v4864_v17, %v1865_v45 }
 0x26b   : > { %3928 = vst.msk [vmem:[%s4551_s22 + $0x1c0] sm:$0xff] %vm1092_vm1, %v2382_v43 }
 0x26d   : > { %v2085_v44 = vpop.f32.mrf.mxu1 }
 0x26e   : > { %v2126_v0 = vadd.f32 %v2085_v44, %v1904_v47 }
 0x26f   : > { %v2213_v36 = vpop.f32.mrf.mxu2 }
 0x270   : > { %v2340_v60 = vpop.f32.mrf.mxu3  ;;  %3959 = vmatmul.msk.bf16.gmra.mxu1 %vm1092_vm1, %v4485_v4  ;;  %v2252_v6 = vadd.f32 %v2211_v58, %v2126_v0 }
 0x271   : > { %v2383_v61 = vadd.f32 %v2340_v60, %v2251_v42  ;;  %v1868_v49 = vpop.f32.mrf.mxu0 }
 0x272   : > { %v1906_v7 = vadd.f32 %v4864_v17, %v1868_v49 }
 0x273   : > { %3929 = vst.msk [vmem:[%s4551_s22 + $0x1c8] sm:$0xff] %vm1092_vm1, %v2383_v61 }
 0x274   : > { %3981 = vmatmul.msk.bf16.gmra.mxu2 %vm1092_vm1, %v4250_v55  ;;  %3943 = vmatmul.msk.bf16.gmra.mxu0 %vm1092_vm1, %v4249_v27 }
 0x275   : > { %3997 = vmatmul.msk.bf16.gmra.mxu3 %vm1092_vm1, %v4501_v29  ;;  %v2087_v35 = vpop.f32.mrf.mxu1 }
 0x276   : > { %v2127_v54 = vadd.f32 %v2087_v35, %v1905_v12  ;;  %v4252_v12 = vld [vmem:[%s4367_s12 + $0x78] sm:$0xff] }
 0x277   : > { %v2216_v5 = vpop.f32.mrf.mxu2 }
 0x278   : > { %v2343_v8 = vpop.f32.mrf.mxu3  ;;  %v2253_v2 = vadd.f32 %v2213_v36, %v2127_v54 }
 0x279   : > { %v2384_v16 = vadd.f32 %v2343_v8, %v2252_v6  ;;  %v1870_v53 = vpop.f32.mrf.mxu0 }
 0x27a   : > { %v1907_v44 = vadd.f32 %v4864_v17, %v1870_v53 }
 0x27b   : > { %3930 = vst.msk [vmem:[%s4551_s22 + $0x1d0] sm:$0xff] %vm1092_vm1, %v2384_v16 }
 0x27d   : > { %v2090_v37 = vpop.f32.mrf.mxu1 }
 0x27e   : > { %v2128_v58 = vadd.f32 %v2090_v37, %v1906_v7  ;;  %v5239_v7 = vld [vmem:[%s5662_s3] ss:$0 sm:$0xff] }
 0x27f   : > { %v2218_v27 = vpop.f32.mrf.mxu2 }
 0x280   : > { %v2345_v18 = vpop.f32.mrf.mxu3  ;;  %3960 = vmatmul.msk.bf16.gmra.mxu1 %vm1092_vm1, %v4501_v29  ;;  %v2254_v43 = vadd.f32 %v2216_v5, %v2128_v58 }
 0x281   : > { %v2385_v24 = vadd.f32 %v2345_v18, %v2253_v2  ;;  %v1873_v31 = vpop.f32.mrf.mxu0 }
 0x282   : > { %v1908_v61 = vadd.f32 %v4864_v17, %v1873_v31 }
 0x283   : > { %3931 = vst.msk [vmem:[%s4551_s22 + $0x1d8] sm:$0xff] %vm1092_vm1, %v2385_v24 }
 0x284   : > { %3982 = vmatmul.msk.bf16.gmra.mxu2 %vm1092_vm1, %v4251_v38  ;;  %3944 = vmatmul.msk.bf16.gmra.mxu0 %vm1092_vm1, %v4250_v55 }
 0x285   : > { %3998 = vmatmul.msk.bf16.gmra.mxu3 %vm1092_vm1, %v4517_v56  ;;  %v2092_v45 = vpop.f32.mrf.mxu1 }
 0x286   : > { %v2129_v60 = vadd.f32 %v2092_v45, %v1907_v44  ;;  %v4254_v44 = vld [vmem:[%s4367_s12 + $0x84] sm:$0xff] }
 0x287   : > { %v2221_v28 = vpop.f32.mrf.mxu2 }
 0x288   : > { %v2348_v47 = vpop.f32.mrf.mxu3  ;;  %v2255_v49 = vadd.f32 %v2218_v27, %v2129_v60 }
 0x289   : > { %v2386_v42 = vadd.f32 %v2348_v47, %v2254_v43  ;;  %v1875_v36 = vpop.f32.mrf.mxu0 }
 0x28a   : > { %v1909_v37 = vadd.f32 %v5239_v7, %v1875_v36 }
 0x28b   : > { %3932 = vst.msk [vmem:[%s4551_s22 + $0x1e0] sm:$0xff] %vm1092_vm1, %v2386_v42 }
 0x28d   : > { %v2095_v0 = vpop.f32.mrf.mxu1 }
 0x28e   : > { %v2130_v5 = vadd.f32 %v2095_v0, %v1908_v61 }
 0x28f   : > { %v2223_v55 = vpop.f32.mrf.mxu2 }
 0x290   : > { %v2350_v6 = vpop.f32.mrf.mxu3  ;;  %3961 = vmatmul.msk.bf16.gmra.mxu1 %vm1092_vm1, %v4517_v56  ;;  %v2256_v17 = vadd.f32 %v2221_v28, %v2130_v5 }
 0x291   : > { %v2387_v35 = vadd.f32 %v2350_v6, %v2255_v49  ;;  %v2437_v8 = vpop.f32.mrf.mxu0 }
 0x292   : > { %v2517_v24 = vadd.f32 %v5239_v7, %v2437_v8 }
 0x293   : > { %3933 = vst.msk [vmem:[%s4551_s22 + $0x1e8] sm:$0xff] %vm1092_vm1, %v2387_v35 }
 0x294   : > { %3983 = vmatmul.msk.bf16.gmra.mxu2 %vm1092_vm1, %v4252_v12  ;;  %3945 = vmatmul.msk.bf16.gmra.mxu0 %vm1092_vm1, %v4251_v38 }
 0x295   : > { %3999 = vmatmul.msk.bf16.gmra.mxu3 %vm1092_vm1, %v4536_v25  ;;  %v2097_v16 = vpop.f32.mrf.mxu1 }
 0x296   : > { %v2131_v18 = vadd.f32 %v2097_v16, %v1909_v37  ;;  %v4255_v37 = vld [vmem:[%s4367_s12 + $0x90] sm:$0xff] }
 0x297   : > { %v2695_v53 = vpop.f32.mrf.mxu2 }
 0x298   : > { %v2353_v54 = vpop.f32.mrf.mxu3  ;;  %v2257_v31 = vadd.f32 %v2223_v55, %v2131_v18 }
 0x299   : > { %v2388_v2 = vadd.f32 %v2353_v54, %v2256_v17  ;;  %v2439_v27 = vpop.f32.mrf.mxu0 }
 0x29a   : > { %v2518_v0 = vadd.f32 %v5239_v7, %v2439_v27 }
 0x29b   : > { %3934 = vst.msk [vmem:[%s4551_s22 + $0x1f0] sm:$0xff] %vm1092_vm1, %v2388_v2 }
 0x29d   : > { %v2563_v58 = vpop.f32.mrf.mxu1 }
 0x29e   : > { %v2643_v28 = vadd.f32 %v2563_v58, %v2517_v24 }
 0x29f   : > { %v2697_v38 = vpop.f32.mrf.mxu2 }
 0x2a0   : > { %v2355_v43 = vpop.f32.mrf.mxu3  ;;  %3962 = vmatmul.msk.bf16.gmra.mxu1 %vm1092_vm1, %v4536_v25  ;;  %v2775_v42 = vadd.f32 %v2695_v53, %v2643_v28 }
 0x2a1   : > { %v2389_v45 = vadd.f32 %v2355_v43, %v2257_v31  ;;  %v2442_v47 = vpop.f32.mrf.mxu0 }
 0x2a2   : > { %v2519_v35 = vadd.f32 %v5239_v7, %v2442_v47 }
 0x2a3   : > { %3935 = vst.msk [vmem:[%s4551_s22 + $0x1f8] sm:$0xff] %vm1092_vm1, %v2389_v45 }
 0x2a4   : > { %3984 = vmatmul.msk.bf16.gmra.mxu2 %vm1092_vm1, %v4254_v44  ;;  %3946 = vmatmul.msk.bf16.gmra.mxu0 %vm1092_vm1, %v4252_v12 }
 0x2a5   : > { %4000 = vmatmul.msk.bf16.gmra.mxu3 %vm1092_vm1, %v4565_v11  ;;  %v2565_v36 = vpop.f32.mrf.mxu1 }
 0x2a6   : > { %v2644_v6 = vadd.f32 %v2565_v36, %v2518_v0  ;;  %v4256_v0 = vld [vmem:[%s4367_s12 + $0x9c] sm:$0xff] }
 0x2a7   : > { %v2700_v60 = vpop.f32.mrf.mxu2 }
 0x2a8   : > { %v2827_v61 = vpop.f32.mrf.mxu3  ;;  %v2776_v8 = vadd.f32 %v2697_v38, %v2644_v6 }
 0x2a9   : > { %v2907_v49 = vadd.f32 %v2827_v61, %v2775_v42  ;;  %v2444_v55 = vpop.f32.mrf.mxu0 }
 0x2aa   : > { %v2520_v58 = vadd.f32 %v5239_v7, %v2444_v55 }
 0x2ab   : > { %4008 = vst.msk [vmem:[%s4551_s22 + $0x200] sm:$0xff] %vm1092_vm1, %v2907_v49 }
 0x2ad   : > { %v2568_v5 = vpop.f32.mrf.mxu1 }
 0x2ae   : > { %v2645_v53 = vadd.f32 %v2568_v5, %v2519_v35 }
 0x2af   : > { %v2702_v12 = vpop.f32.mrf.mxu2 }
 0x2b0   : > { %v2829_v17 = vpop.f32.mrf.mxu3  ;;  %3963 = vmatmul.msk.bf16.gmra.mxu1 %vm1092_vm1, %v4565_v11  ;;  %v2777_v2 = vadd.f32 %v2700_v60, %v2645_v53 }
 0x2b1   : > { %v2908_v16 = vadd.f32 %v2829_v17, %v2776_v8  ;;  %v2447_v54 = vpop.f32.mrf.mxu0 }
 0x2b2   : > { %v2521_v45 = vadd.f32 %v5239_v7, %v2447_v54 }
 0x2b3   : > { %4009 = vst.msk [vmem:[%s4551_s22 + $0x208] sm:$0xff] %vm1092_vm1, %v2908_v16 }
 0x2b4   : > { %3985 = vmatmul.msk.bf16.gmra.mxu2 %vm1092_vm1, %v4255_v37  ;;  %3947 = vmatmul.msk.bf16.gmra.mxu0 %vm1092_vm1, %v4254_v44 }
 0x2b5   : > { %4001 = vmatmul.msk.bf16.gmra.mxu3 %vm1092_vm1, %v4587_v62  ;;  %v2570_v27 = vpop.f32.mrf.mxu1 }
 0x2b6   : > { %v2646_v43 = vadd.f32 %v2570_v27, %v2520_v58  ;;  %v4257_v58 = vld [vmem:[%s4367_s12 + $0xa8] sm:$0xff] }
 0x2b7   : > { %v2705_v18 = vpop.f32.mrf.mxu2 }
 0x2b8   : > { %v2832_v24 = vpop.f32.mrf.mxu3  ;;  %v2778_v47 = vadd.f32 %v2702_v12, %v2646_v43 }
 0x2b9   : > { %v2909_v31 = vadd.f32 %v2832_v24, %v2777_v2  ;;  %v2449_v38 = vpop.f32.mrf.mxu0 }
 0x2ba   : > { %v2522_v5 = vadd.f32 %v5239_v7, %v2449_v38 }
 0x2bb   : > { %4010 = vst.msk [vmem:[%s4551_s22 + $0x210] sm:$0xff] %vm1092_vm1, %v2909_v31 }
 0x2bd   : > { %v2573_v28 = vpop.f32.mrf.mxu1 }
 0x2be   : > { %v2647_v60 = vadd.f32 %v2573_v28, %v2521_v45 }
 0x2bf   : > { %v2707_v44 = vpop.f32.mrf.mxu2 }
 0x2c0   : > { %v2834_v42 = vpop.f32.mrf.mxu3  ;;  %3964 = vmatmul.msk.bf16.gmra.mxu1 %vm1092_vm1, %v4587_v62  ;;  %v2779_v49 = vadd.f32 %v2705_v18, %v2647_v60 }
 0x2c1   : > { %v2910_v36 = vadd.f32 %v2834_v42, %v2778_v47  ;;  %v2452_v61 = vpop.f32.mrf.mxu0 }
 0x2c2   : > { %v2523_v16 = vadd.f32 %v5239_v7, %v2452_v61 }
 0x2c3   : > { %4011 = vst.msk [vmem:[%s4551_s22 + $0x218] sm:$0xff] %vm1092_vm1, %v2910_v36 }
 0x2c4   : > { %3986 = vmatmul.msk.bf16.gmra.mxu2 %vm1092_vm1, %v4256_v0  ;;  %3948 = vmatmul.msk.bf16.gmra.mxu0 %vm1092_vm1, %v4255_v37 }
 0x2c5   : > { %4002 = vmatmul.msk.bf16.gmra.mxu3 %vm1092_vm1, %v4606_v41  ;;  %v2575_v55 = vpop.f32.mrf.mxu1 }
 0x2c6   : > { %v2648_v17 = vadd.f32 %v2575_v55, %v2522_v5  ;;  %v4258_v5 = vld [vmem:[%s4367_s12 + $0xb4] sm:$0xff] }
 0x2c7   : > { %v2710_v6 = vpop.f32.mrf.mxu2 }
 0x2c8   : > { %v2837_v35 = vpop.f32.mrf.mxu3  ;;  %v2780_v54 = vadd.f32 %v2707_v44, %v2648_v17 }
 0x2c9   : > { %v2911_v8 = vadd.f32 %v2837_v35, %v2779_v49  ;;  %v2454_v12 = vpop.f32.mrf.mxu0 }
 0x2ca   : > { %v2524_v28 = vadd.f32 %v5239_v7, %v2454_v12 }
 0x2cb   : > { %4012 = vst.msk [vmem:[%s4551_s22 + $0x220] sm:$0xff] %vm1092_vm1, %v2911_v8 }
 0x2cd   : > { %v2578_v53 = vpop.f32.mrf.mxu1 }
 0x2ce   : > { %v2649_v18 = vadd.f32 %v2578_v53, %v2523_v16 }
 0x2cf   : > { %v2712_v37 = vpop.f32.mrf.mxu2 }
 0x2d0   : > { %v2839_v2 = vpop.f32.mrf.mxu3  ;;  %3965 = vmatmul.msk.bf16.gmra.mxu1 %vm1092_vm1, %v4606_v41  ;;  %v2781_v31 = vadd.f32 %v2710_v6, %v2649_v18 }
 0x2d1   : > { %v2912_v27 = vadd.f32 %v2839_v2, %v2780_v54  ;;  %v2457_v24 = vpop.f32.mrf.mxu0 }
 0x2d2   : > { %v2525_v36 = vadd.f32 %v5239_v7, %v2457_v24 }
 0x2d3   : > { %4013 = vst.msk [vmem:[%s4551_s22 + $0x228] sm:$0xff] %vm1092_vm1, %v2912_v27 }
 0x2d4   : > { %3987 = vmatmul.msk.bf16.gmra.mxu2 %vm1092_vm1, %v4257_v58  ;;  %3949 = vmatmul.msk.bf16.gmra.mxu0 %vm1092_vm1, %v4256_v0 }
 0x2d5   : > { %4003 = vmatmul.msk.bf16.gmra.mxu3 %vm1092_vm1, %v4631_v32  ;;  %v2580_v38 = vpop.f32.mrf.mxu1 }
 0x2d6   : > { %v2650_v42 = vadd.f32 %v2580_v38, %v2524_v28  ;;  %v4259_v28 = vld [vmem:[%s4662_s15] sm:$0xff] }
 0x2d7   : > { %v2715_v43 = vpop.f32.mrf.mxu2 }
 0x2d8   : > { %v2842_v45 = vpop.f32.mrf.mxu3  ;;  %v2782_v61 = vadd.f32 %v2712_v37, %v2650_v42 }
 0x2d9   : > { %v2913_v47 = vadd.f32 %v2842_v45, %v2781_v31  ;;  %v2459_v44 = vpop.f32.mrf.mxu0 }
 0x2da   : > { %v2526_v53 = vadd.f32 %v5239_v7, %v2459_v44 }
 0x2db   : > { %4014 = vst.msk [vmem:[%s4551_s22 + $0x230] sm:$0xff] %vm1092_vm1, %v2913_v47 }
 0x2dd   : > { %v2583_v60 = vpop.f32.mrf.mxu1 }
 0x2de   : > { %v2651_v6 = vadd.f32 %v2583_v60, %v2525_v36  ;;  %v5320_v36 = vld [vmem:[%s4662_s15 + $0xc] sm:$0xf]  ;;  %v5323_v60 = vld [vmem:[%s4662_s15 + $0x10] sm:$0xf] }
 0x2df   : > { %v2717_v0 = vpop.f32.mrf.mxu2 }
 0x2e0   : > { %v2844_v49 = vpop.f32.mrf.mxu3  ;;  %3966 = vmatmul.msk.bf16.gmra.mxu1 %vm1092_vm1, %v4631_v32  ;;  %v2783_v8 = vadd.f32 %v2715_v43, %v2651_v6  ;;  %v837_v6 = vshrl.u32 %v5320_v36, 16 }
 0x2e1   : > { %v2914_v55 = vadd.f32 %v2844_v49, %v2782_v61  ;;  %v2462_v35 = vpop.f32.mrf.mxu0 }
 0x2e2   : > { %v2527_v27 = vadd.f32 %v5239_v7, %v2462_v35  ;;  %v840_v35 = vshll.u32 %v5320_v36, 16 }
 0x2e3   : > { %4015 = vst.msk [vmem:[%s4551_s22 + $0x238] sm:$0xff] %vm1092_vm1, %v2914_v55 }
 0x2e4   : > { %3988 = vmatmul.msk.bf16.gmra.mxu2 %vm1092_vm1, %v4258_v5  ;;  %3950 = vmatmul.msk.bf16.gmra.mxu0 %vm1092_vm1, %v4257_v58 }
 0x2e5   : > { %4004 = vmatmul.msk.bf16.gmra.mxu3 %vm1092_vm1, %v4657_v23  ;;  %v2585_v12 = vpop.f32.mrf.mxu1 }
 0x2e6   : > { %v2652_v2 = vadd.f32 %v2585_v12, %v2526_v53  ;;  %v839_v53 = vrot.slane %v837_v6, 4 }
 0x2e7   : > { %v2720_v17 = vpop.f32.mrf.mxu2 }
 0x2e8   : > { %v2847_v16 = vpop.f32.mrf.mxu3  ;;  %v2784_v24 = vadd.f32 %v2717_v0, %v2652_v2 }
 0x2e9   : > { %v2915_v54 = vadd.f32 %v2847_v16, %v2783_v8  ;;  %v2464_v37 = vpop.f32.mrf.mxu0  ;;  %v850_v8 = vshrl.u32 %v5323_v60, 16 }
 0x2ea   : > { %v2528_v0 = vadd.f32 %v5239_v7, %v2464_v37 }
 0x2eb   : > { %4016 = vst.msk [vmem:[%s4551_s22 + $0x240] sm:$0xff] %vm1092_vm1, %v2915_v54  ;;  %v842_v54 = vrot.slane %v840_v35, 5  ;;  %v852_v2 = vrot.slane %v850_v8, 4 }
 0x2ed   : > { %v2588_v18 = vpop.f32.mrf.mxu1 }
 0x2ee   : > { %v2653_v43 = vadd.f32 %v2588_v18, %v2527_v27 }
 0x2ef   : > { %v2722_v58 = vpop.f32.mrf.mxu2 }
 0x2f0   : > { %v2849_v31 = vpop.f32.mrf.mxu3  ;;  %3967 = vmatmul.msk.bf16.gmra.mxu1 %vm1092_vm1, %v4657_v23  ;;  %v2785_v47 = vadd.f32 %v2720_v17, %v2653_v43 }
 0x2f1   : > { %v2916_v38 = vadd.f32 %v2849_v31, %v2784_v24  ;;  %v2467_v45 = vpop.f32.mrf.mxu0  ;;  %v5334_v24 = vld [vmem:[%s4662_s15 + $0x14] sm:$0x1] }
 0x2f2   : > { %v2529_v17 = vadd.f32 %v5239_v7, %v2467_v45 }
 0x2f3   : > { %4017 = vst.msk [vmem:[%s4551_s22 + $0x248] sm:$0xff] %vm1092_vm1, %v2916_v38  ;;  %v4162_v38 = vld [vmem:[%s4662_s15 + $0xc] sm:$0xff] }
 0x2f4   : > { %3989 = vmatmul.msk.bf16.gmra.mxu2 %vm1092_vm1, %v4259_v28  ;;  %3951 = vmatmul.msk.bf16.gmra.mxu0 %vm1092_vm1, %v4258_v5  ;;  %v846_v5 = vshll.u32 %v5323_v60, 16 }
 0x2f5   : > { %4005 = vmatmul.msk.bf16.gmra.mxu3 %vm1092_vm1, %v4685_v10  ;;  %v2590_v44 = vpop.f32.mrf.mxu1 }
 0x2f6   : > { %v2654_v12 = vadd.f32 %v2590_v44, %v2528_v0  ;;  %v848_v37 = vrot.slane %v846_v5, 5  ;;  %v856_v0 = vshll.u32 %v5334_v24, 16 }
 0x2f7   : > { %v2725_v42 = vpop.f32.mrf.mxu2 }
 0x2f8   : > { %v2852_v61 = vpop.f32.mrf.mxu3  ;;  %v2786_v27 = vadd.f32 %v2722_v58, %v2654_v12  ;;  %v853_v45 = vor.u32 %v852_v2, %v848_v37  ;;  %v858_v5 = vrot.slane %v856_v0, 5 }
 0x2f9   : > { %v2917_v49 = vadd.f32 %v2852_v61, %v2785_v47  ;;  %v2469_v55 = vpop.f32.mrf.mxu0  ;;  %v843_v61 = vor.u32 %v842_v54, %v839_v53 }
 0x2fa   : > { %v854_v35 = vrot.slane %v853_v45, 4 }
 0x2fb   : > { %4018 = vst.msk [vmem:[%s4551_s22 + $0x250] sm:$0xff] %vm1092_vm1, %v2917_v49  ;;  %v844_v6 = vrot.slane %v843_v61, 4 }
 0x2fd   : > { %v2593_v16 = vpop.f32.mrf.mxu1  ;;  %v849_v54 = vsel %vm4385_vm4, %v844_v6, %v848_v37 }
 0x2fe   : > { %v2655_v47 = vadd.f32 %v2593_v16, %v2529_v17  ;;  %v2530_v17 = vadd.f32 %v5239_v7, %v2469_v55 }
 0x2ff   : > { %v2727_v18 = vpop.f32.mrf.mxu2 }
 0x300   : > { %v2854_v31 = vpop.f32.mrf.mxu3  ;;  %3968 = vmatmul.msk.bf16.gmra.mxu1 %vm1092_vm1, %v4685_v10  ;;  %v2787_v58 = vadd.f32 %v2725_v42, %v2655_v47 }
 0x301   : > { %v2918_v43 = vadd.f32 %v2854_v31, %v2786_v27  ;;  %v2472_v44 = vpop.f32.mrf.mxu0  ;;  %v2809_v27 = vunpack.c.l.b16 %v849_v54 }
 0x302   : > { %v2531_v2 = vadd.f32 %v5239_v7, %v2472_v44 }
 0x303   : > { %4019 = vst.msk [vmem:[%s4551_s22 + $0x258] sm:$0xff] %vm1092_vm1, %v2918_v43 }
 0x304   : > { %3990 = vmatmul.msk.bf16.gmra.mxu2 %vm1092_vm1, %v4162_v38  ;;  %3952 = vmatmul.msk.bf16.gmra.mxu0 %vm1092_vm1, %v4259_v28  ;;  %v859_v28 = vsel %vm4385_vm4, %v854_v35, %v858_v5 }
 0x305   : > { %4006 = vmatmul.msk.bf16.gmra.mxu3 %vm1092_vm1, %v4733_v9  ;;  %v2595_v49 = vpop.f32.mrf.mxu1  ;;  %v2810_v31 = vunpack.c.l.b16 %v859_v28 }
 0x306   : > { %v2656_v42 = vadd.f32 %v2595_v49, %v2530_v17 }
 0x307   : > { %v2730_v8 = vpop.f32.mrf.mxu2  ;;  %v5356_v39 = vpack.c.b16 %v2810_v31, %v2809_v27 }
 0x308   : > { %v2857_v12 = vpop.f32.mrf.mxu3  ;;  %v2788_v43 = vadd.f32 %v2727_v18, %v2656_v42 }
 0x309   : > { %v2919_v16 = vadd.f32 %v2857_v12, %v2787_v58  ;;  %v2474_v53 = vpop.f32.mrf.mxu0 }
 0x30a   : > { %v2532_v49 = vadd.f32 %v5239_v7, %v2474_v53 }
 0x30b   : > { %4020 = vst.msk [vmem:[%s4551_s22 + $0x260] sm:$0xff] %vm1092_vm1, %v2919_v16 }
 0x30d   : > { %v2598_v38 = vpop.f32.mrf.mxu1 }
 0x30e   : > { %v2657_v45 = vadd.f32 %v2598_v38, %v2531_v2 }
 0x30f   : > { %v2732_v47 = vpop.f32.mrf.mxu2 }
 0x310   : > { %v2859_v55 = vpop.f32.mrf.mxu3  ;;  %3969 = vmatmul.msk.bf16.gmra.mxu1 %vm1092_vm1, %v4733_v9  ;;  %v2789_v18 = vadd.f32 %v2730_v8, %v2657_v45 }
 0x311   : > { %v2920_v61 = vadd.f32 %v2859_v55, %v2788_v43  ;;  %v2477_v37 = vpop.f32.mrf.mxu0 }
 0x312   : > { %v2533_v12 = vadd.f32 %v5239_v7, %v2477_v37 }
 0x313   : > { %4021 = vst.msk [vmem:[%s4551_s22 + $0x268] sm:$0xff] %vm1092_vm1, %v2920_v61 }
 0x314   : > { %4075 = vmatmul.msk.bf16.vlgmr.msrb.gmra.mxu2 %vm1092_vm1, %v4421_v33  ;;  %4041 = vmatmul.msk.bf16.vlgmr.msrb.gmra.mxu0 %vm1092_vm1, %v4404_v13 }
 0x315   : > { %4007 = vmatmul.msk.bf16.gmra.mxu3 %vm1092_vm1, %v5356_v39  ;;  %v2600_v44 = vpop.f32.mrf.mxu1 }
 0x316   : > { %v2658_v5 = vadd.f32 %v2600_v44, %v2532_v49 }
 0x317   : > { %v2735_v0 = vpop.f32.mrf.mxu2 }
 0x318   : > { %v2862_v58 = vpop.f32.mrf.mxu3  ;;  %v2790_v16 = vadd.f32 %v2732_v47, %v2658_v5 }
 0x319   : > { %v2921_v6 = vadd.f32 %v2862_v58, %v2789_v18  ;;  %v2479_v35 = vpop.f32.mrf.mxu0 }
 0x31a   : > { %v2534_v38 = vadd.f32 %v5239_v7, %v2479_v35 }
 0x31b   : > { %4022 = vst.msk [vmem:[%s4551_s22 + $0x270] sm:$0xff] %vm1092_vm1, %v2921_v6 }
 0x31d   : > { %v2603_v17 = vpop.f32.mrf.mxu1 }
 0x31e   : > { %v2659_v8 = vadd.f32 %v2603_v17, %v2533_v12 }
 0x31f   : > { %v2737_v13 = vpop.f32.mrf.mxu2 }
 0x320   : > { %v2864_v54 = vpop.f32.mrf.mxu3  ;;  %4058 = vmatmul.msk.bf16.vlgmr.msrb.gmra.mxu1 %vm1092_vm1, %v4756_v51  ;;  %v2791_v53 = vadd.f32 %v2735_v0, %v2659_v8 }
 0x321   : > { %v2922_v28 = vadd.f32 %v2864_v54, %v2790_v16  ;;  %v2482_v42 = vpop.f32.mrf.mxu0 }
 0x322   : > { %v2535_v55 = vadd.f32 %v5239_v7, %v2482_v42 }
 0x323   : > { %4023 = vst.msk [vmem:[%s4551_s22 + $0x278] sm:$0xff] %vm1092_vm1, %v2922_v28 }
 0x324   : > { %4076 = vmatmul.msk.bf16.gmra.mxu2 %vm1092_vm1, %v4437_v57  ;;  %4042 = vmatmul.msk.bf16.gmra.mxu0 %vm1092_vm1, %v4421_v33 }
 0x325   : > { %4092 = vmatmul.msk.bf16.vlgmr.msrb.gmra.mxu3 %vm1092_vm1, %v4779_v30  ;;  %v2605_v2 = vpop.f32.mrf.mxu1 }
 0x326   : > { %v2660_v47 = vadd.f32 %v2605_v2, %v2534_v38 }
 0x327   : > { %v2740_v27 = vpop.f32.mrf.mxu2 }
 0x328   : > { %v2867_v31 = vpop.f32.mrf.mxu3  ;;  %v2792_v45 = vadd.f32 %v2737_v13, %v2660_v47 }
 0x329   : > { %v2923_v51 = vadd.f32 %v2867_v31, %v2791_v53  ;;  %v2484_v43 = vpop.f32.mrf.mxu0 }
 0x32a   : > { %v2536_v5 = vadd.f32 %v5239_v7, %v2484_v43 }
 0x32b   : > { %4024 = vst.msk [vmem:[%s4551_s22 + $0x280] sm:$0xff] %vm1092_vm1, %v2923_v51 }
 0x32d   : > { %v2608_v61 = vpop.f32.mrf.mxu1 }
 0x32e   : > { %v2661_v44 = vadd.f32 %v2608_v61, %v2535_v55 }
 0x32f   : > { %v2742_v33 = vpop.f32.mrf.mxu2 }
 0x330   : > { %v2869_v37 = vpop.f32.mrf.mxu3  ;;  %4059 = vmatmul.msk.bf16.gmra.mxu1 %vm1092_vm1, %v4779_v30  ;;  %v2793_v58 = vadd.f32 %v2740_v27, %v2661_v44 }
 0x331   : > { %v2924_v18 = vadd.f32 %v2869_v37, %v2792_v45  ;;  %v2487_v0 = vpop.f32.mrf.mxu0 }
 0x332   : > { %v2537_v16 = vadd.f32 %v5239_v7, %v2487_v0 }
 0x333   : > { %4025 = vst.msk [vmem:[%s4551_s22 + $0x288] sm:$0xff] %vm1092_vm1, %v2924_v18 }
 0x334   : > { %4077 = vmatmul.msk.bf16.gmra.mxu2 %vm1092_vm1, %v4453_v19  ;;  %4043 = vmatmul.msk.bf16.gmra.mxu0 %vm1092_vm1, %v4437_v57 }
 0x335   : > { %4093 = vmatmul.msk.bf16.gmra.mxu3 %vm1092_vm1, %v4802_v59  ;;  %v2610_v49 = vpop.f32.mrf.mxu1 }
 0x336   : > { %v2662_v17 = vadd.f32 %v2610_v49, %v2536_v5 }
 0x337   : > { %v2745_v6 = vpop.f32.mrf.mxu2 }
 0x338   : > { %v2872_v35 = vpop.f32.mrf.mxu3  ;;  %v2794_v54 = vadd.f32 %v2742_v33, %v2662_v17 }
 0x339   : > { %v2925_v30 = vadd.f32 %v2872_v35, %v2793_v58  ;;  %v2489_v12 = vpop.f32.mrf.mxu0 }
 0x33a   : > { %v2538_v51 = vadd.f32 %v5239_v7, %v2489_v12 }
 0x33b   : > { %4026 = vst.msk [vmem:[%s4551_s22 + $0x290] sm:$0xff] %vm1092_vm1, %v2925_v30 }
 0x33d   : > { %v2613_v13 = vpop.f32.mrf.mxu1 }
 0x33e   : > { %v2663_v42 = vadd.f32 %v2613_v13, %v2537_v16 }
 0x33f   : > { %v2747_v57 = vpop.f32.mrf.mxu2 }
 0x340   : > { %v2874_v28 = vpop.f32.mrf.mxu3  ;;  %4060 = vmatmul.msk.bf16.gmra.mxu1 %vm1092_vm1, %v4802_v59  ;;  %v2795_v2 = vadd.f32 %v2745_v6, %v2663_v42 }
 0x341   : > { %v2926_v8 = vadd.f32 %v2874_v28, %v2794_v54  ;;  %v2492_v53 = vpop.f32.mrf.mxu0 }
 0x342   : > { %v2539_v55 = vadd.f32 %v5239_v7, %v2492_v53 }
 0x343   : > { %4027 = vst.msk [vmem:[%s4551_s22 + $0x298] sm:$0xff] %vm1092_vm1, %v2926_v8 }
 0x344   : > { %4078 = vmatmul.msk.bf16.gmra.mxu2 %vm1092_vm1, %v4469_v46  ;;  %4044 = vmatmul.msk.bf16.gmra.mxu0 %vm1092_vm1, %v4453_v19 }
 0x345   : > { %4094 = vmatmul.msk.bf16.gmra.mxu3 %vm1092_vm1, %v4825_v48  ;;  %v2615_v27 = vpop.f32.mrf.mxu1 }
 0x346   : > { %v2664_v47 = vadd.f32 %v2615_v27, %v2538_v51 }
 0x347   : > { %v2750_v31 = vpop.f32.mrf.mxu2 }
 0x348   : > { %v2877_v38 = vpop.f32.mrf.mxu3  ;;  %v2796_v45 = vadd.f32 %v2747_v57, %v2664_v47 }
 0x349   : > { %v2927_v59 = vadd.f32 %v2877_v38, %v2795_v2  ;;  %v2494_v43 = vpop.f32.mrf.mxu0 }
 0x34a   : > { %v2540_v35 = vadd.f32 %v5239_v7, %v2494_v43 }
 0x34b   : > { %4028 = vst.msk [vmem:[%s4551_s22 + $0x2a0] sm:$0xff] %vm1092_vm1, %v2927_v59 }
 0x34d   : > { %v2618_v61 = vpop.f32.mrf.mxu1 }
 0x34e   : > { %v2665_v18 = vadd.f32 %v2618_v61, %v2539_v55 }
 0x34f   : > { %v2752_v19 = vpop.f32.mrf.mxu2 }
 0x350   : > { %v2879_v33 = vpop.f32.mrf.mxu3  ;;  %4061 = vmatmul.msk.bf16.gmra.mxu1 %vm1092_vm1, %v4825_v48  ;;  %v2797_v0 = vadd.f32 %v2750_v31, %v2665_v18 }
 0x351   : > { %v2928_v37 = vadd.f32 %v2879_v33, %v2796_v45  ;;  %v2497_v44 = vpop.f32.mrf.mxu0 }
 0x352   : > { %v2541_v12 = vadd.f32 %v5239_v7, %v2497_v44 }
 0x353   : > { %4029 = vst.msk [vmem:[%s4551_s22 + $0x2a8] sm:$0xff] %vm1092_vm1, %v2928_v37 }
 0x354   : > { %4079 = vmatmul.msk.bf16.gmra.mxu2 %vm1092_vm1, %v4485_v4  ;;  %4045 = vmatmul.msk.bf16.gmra.mxu0 %vm1092_vm1, %v4469_v46 }
 0x355   : > { %4095 = vmatmul.msk.bf16.gmra.mxu3 %vm1092_vm1, %v4848_v14  ;;  %v2620_v58 = vpop.f32.mrf.mxu1 }
 0x356   : > { %v2666_v30 = vadd.f32 %v2620_v58, %v2540_v35 }
 0x357   : > { %v2755_v49 = vpop.f32.mrf.mxu2 }
 0x358   : > { %v2882_v6 = vpop.f32.mrf.mxu3  ;;  %v2798_v16 = vadd.f32 %v2752_v19, %v2666_v30 }
 0x359   : > { %v2929_v48 = vadd.f32 %v2882_v6, %v2797_v0  ;;  %v2499_v5 = vpop.f32.mrf.mxu0 }
 0x35a   : > { %v2542_v27 = vadd.f32 %v5239_v7, %v2499_v5 }
 0x35b   : > { %4030 = vst.msk [vmem:[%s4551_s22 + $0x2b0] sm:$0xff] %vm1092_vm1, %v2929_v48 }
 0x35d   : > { %v2623_v17 = vpop.f32.mrf.mxu1 }
 0x35e   : > { %v2667_v57 = vadd.f32 %v2623_v17, %v2541_v12 }
 0x35f   : > { %v2757_v46 = vpop.f32.mrf.mxu2 }
 0x360   : > { %v2884_v13 = vpop.f32.mrf.mxu3  ;;  %4062 = vmatmul.msk.bf16.gmra.mxu1 %vm1092_vm1, %v4848_v14  ;;  %v2799_v8 = vadd.f32 %v2755_v49, %v2667_v57 }
 0x361   : > { %v2930_v54 = vadd.f32 %v2884_v13, %v2798_v16  ;;  %v2502_v28 = vpop.f32.mrf.mxu0 }
 0x362   : > { %v2543_v51 = vadd.f32 %v5239_v7, %v2502_v28 }
 0x363   : > { %4031 = vst.msk [vmem:[%s4551_s22 + $0x2b8] sm:$0xff] %vm1092_vm1, %v2930_v54 }
 0x364   : > { %4080 = vmatmul.msk.bf16.gmra.mxu2 %vm1092_vm1, %v4501_v29  ;;  %4046 = vmatmul.msk.bf16.gmra.mxu0 %vm1092_vm1, %v4485_v4 }
 0x365   : > { %4096 = vmatmul.msk.bf16.gmra.mxu3 %vm1092_vm1, %v4876_v3  ;;  %v2625_v42 = vpop.f32.mrf.mxu1 }
 0x366   : > { %v2668_v38 = vadd.f32 %v2625_v42, %v2542_v27 }
 0x367   : > { %v2760_v53 = vpop.f32.mrf.mxu2 }
 0x368   : > { %v2887_v2 = vpop.f32.mrf.mxu3  ;;  %v2800_v43 = vadd.f32 %v2757_v46, %v2668_v38 }
 0x369   : > { %v2931_v14 = vadd.f32 %v2887_v2, %v2799_v8  ;;  %v2504_v31 = vpop.f32.mrf.mxu0 }
 0x36a   : > { %v2544_v44 = vadd.f32 %v5239_v7, %v2504_v31 }
 0x36b   : > { %4032 = vst.msk [vmem:[%s4551_s22 + $0x2c0] sm:$0xff] %vm1092_vm1, %v2931_v14 }
 0x36d   : > { %v2628_v59 = vpop.f32.mrf.mxu1 }
 0x36e   : > { %v2669_v61 = vadd.f32 %v2628_v59, %v2543_v51 }
 0x36f   : > { %v2762_v4 = vpop.f32.mrf.mxu2 }
 0x370   : > { %v2889_v47 = vpop.f32.mrf.mxu3  ;;  %4063 = vmatmul.msk.bf16.gmra.mxu1 %vm1092_vm1, %v4876_v3  ;;  %v2801_v19 = vadd.f32 %v2760_v53, %v2669_v61 }
 0x371   : > { %v2932_v55 = vadd.f32 %v2889_v47, %v2800_v43  ;;  %v2507_v45 = vpop.f32.mrf.mxu0 }
 0x372   : > { %v2545_v49 = vadd.f32 %v5239_v7, %v2507_v45 }
 0x373   : > { %4033 = vst.msk [vmem:[%s4551_s22 + $0x2c8] sm:$0xff] %vm1092_vm1, %v2932_v55 }
 0x374   : > { %4081 = vmatmul.msk.bf16.gmra.mxu2 %vm1092_vm1, %v4517_v56  ;;  %4047 = vmatmul.msk.bf16.gmra.mxu0 %vm1092_vm1, %v4501_v29 }
 0x375   : > { %4097 = vmatmul.msk.bf16.gmra.mxu3 %vm1092_vm1, %v4899_v50  ;;  %v2630_v33 = vpop.f32.mrf.mxu1 }
 0x376   : > { %v2670_v58 = vadd.f32 %v2630_v33, %v2544_v44 }
 0x377   : > { %v2765_v37 = vpop.f32.mrf.mxu2 }
 0x378   : > { %v2892_v18 = vpop.f32.mrf.mxu3  ;;  %v2802_v35 = vadd.f32 %v2762_v4, %v2670_v58 }
 0x379   : > { %v2933_v3 = vadd.f32 %v2892_v18, %v2801_v19  ;;  %v2509_v0 = vpop.f32.mrf.mxu0 }
 0x37a   : > { %v2546_v54 = vadd.f32 %v5239_v7, %v2509_v0 }
 0x37b   : > { %4034 = vst.msk [vmem:[%s4551_s22 + $0x2d0] sm:$0xff] %vm1092_vm1, %v2933_v3 }
 0x37d   : > { %v2633_v6 = vpop.f32.mrf.mxu1 }
 0x37e   : > { %v2671_v30 = vadd.f32 %v2633_v6, %v2545_v49 }
 0x37f   : > { %v2767_v29 = vpop.f32.mrf.mxu2 }
 0x380   : > { %v2894_v48 = vpop.f32.mrf.mxu3  ;;  %4064 = vmatmul.msk.bf16.gmra.mxu1 %vm1092_vm1, %v4899_v50  ;;  %v2803_v17 = vadd.f32 %v2765_v37, %v2671_v30 }
 0x381   : > { %v2934_v5 = vadd.f32 %v2894_v48, %v2802_v35  ;;  %v2512_v12 = vpop.f32.mrf.mxu0 }
 0x382   : > { %v2547_v8 = vadd.f32 %v5239_v7, %v2512_v12 }
 0x383   : > { %4035 = vst.msk [vmem:[%s4551_s22 + $0x2d8] sm:$0xff] %vm1092_vm1, %v2934_v5 }
 0x384   : > { %4082 = vmatmul.msk.bf16.gmra.mxu2 %vm1092_vm1, %v4536_v25  ;;  %4048 = vmatmul.msk.bf16.gmra.mxu0 %vm1092_vm1, %v4517_v56 }
 0x385   : > { %4098 = vmatmul.msk.bf16.gmra.mxu3 %vm1092_vm1, %v4922_v26  ;;  %v2635_v16 = vpop.f32.mrf.mxu1 }
 0x386   : > { %v2672_v28 = vadd.f32 %v2635_v16, %v2546_v54 }
 0x387   : > { %v2770_v46 = vpop.f32.mrf.mxu2 }
 0x388   : > { %v2897_v13 = vpop.f32.mrf.mxu3  ;;  %v2804_v53 = vadd.f32 %v2767_v29, %v2672_v28 }
 0x389   : > { %v2935_v50 = vadd.f32 %v2897_v13, %v2803_v17  ;;  %v2514_v57 = vpop.f32.mrf.mxu0 }
 0x38a   : > { %v2548_v4 = vadd.f32 %v5239_v7, %v2514_v57 }
 0x38b   : > { %4036 = vst.msk [vmem:[%s4551_s22 + $0x2e0] sm:$0xff] %vm1092_vm1, %v2935_v50 }
 0x38d   : > { %v2638_v42 = vpop.f32.mrf.mxu1 }
 0x38e   : > { %v2673_v14 = vadd.f32 %v2638_v42, %v2547_v8 }
 0x38f   : > { %v2772_v56 = vpop.f32.mrf.mxu2 }
 0x390   : > { %v2899_v2 = vpop.f32.mrf.mxu3  ;;  %4065 = vmatmul.msk.bf16.gmra.mxu1 %vm1092_vm1, %v4922_v26  ;;  %v2805_v38 = vadd.f32 %v2770_v46, %v2673_v14 }
 0x391   : > { %v2936_v27 = vadd.f32 %v2899_v2, %v2804_v53  ;;  %v2986_v31 = vpop.f32.mrf.mxu0 }
 0x392   : > { %v3066_v61 = vadd.f32 %v5239_v7, %v2986_v31 }
 0x393   : > { %4037 = vst.msk [vmem:[%s4551_s22 + $0x2e8] sm:$0xff] %vm1092_vm1, %v2936_v27 }
 0x394   : > { %4083 = vmatmul.msk.bf16.gmra.mxu2 %vm1092_vm1, %v4565_v11  ;;  %4049 = vmatmul.msk.bf16.gmra.mxu0 %vm1092_vm1, %v4536_v25 }
 0x395   : > { %4099 = vmatmul.msk.bf16.gmra.mxu3 %vm1092_vm1, %v4945_v20  ;;  %v2640_v51 = vpop.f32.mrf.mxu1 }
 0x396   : > { %v2674_v55 = vadd.f32 %v2640_v51, %v2548_v4 }
 0x397   : > { %v3238_v59 = vpop.f32.mrf.mxu2 }
 0x398   : > { %v2902_v43 = vpop.f32.mrf.mxu3  ;;  %v2806_v19 = vadd.f32 %v2772_v56, %v2674_v55 }
 0x399   : > { %v2937_v26 = vadd.f32 %v2902_v43, %v2805_v38  ;;  %v2988_v47 = vpop.f32.mrf.mxu0 }
 0x39a   : > { %v3067_v6 = vadd.f32 %v5239_v7, %v2988_v47 }
 0x39b   : > { %4038 = vst.msk [vmem:[%s4551_s22 + $0x2f0] sm:$0xff] %vm1092_vm1, %v2937_v26 }
 0x39d   : > { %v3112_v45 = vpop.f32.mrf.mxu1 }
 0x39e   : > { %v3192_v18 = vadd.f32 %v3112_v45, %v3066_v61 }
 0x39f   : > { %v3240_v25 = vpop.f32.mrf.mxu2 }
 0x3a0   : > { %v2904_v33 = vpop.f32.mrf.mxu3  ;;  %4066 = vmatmul.msk.bf16.gmra.mxu1 %vm1092_vm1, %v4945_v20  ;;  %v3318_v3 = vadd.f32 %v3238_v59, %v3192_v18 }
 0x3a1   : > { %v2938_v37 = vadd.f32 %v2904_v33, %v2806_v19  ;;  %v2991_v44 = vpop.f32.mrf.mxu0 }
 0x3a2   : > { %v3068_v48 = vadd.f32 %v5239_v7, %v2991_v44 }
 0x3a3   : > { %4039 = vst.msk [vmem:[%s4551_s22 + $0x2f8] sm:$0xff] %vm1092_vm1, %v2938_v37 }
 0x3a4   : > { %4084 = vmatmul.msk.bf16.gmra.mxu2 %vm1092_vm1, %v4587_v62  ;;  %4050 = vmatmul.msk.bf16.gmra.mxu0 %vm1092_vm1, %v4565_v11 }
 0x3a5   : > { %4100 = vmatmul.msk.bf16.gmra.mxu3 %vm1092_vm1, %v4968_v63  ;;  %v3114_v0 = vpop.f32.mrf.mxu1 }
 0x3a6   : > { %v3193_v29 = vadd.f32 %v3114_v0, %v3067_v6 }
 0x3a7   : > { %v3243_v58 = vpop.f32.mrf.mxu2 }
 0x3a8   : > { %v3370_v49 = vpop.f32.mrf.mxu3  ;;  %v3319_v30 = vadd.f32 %v3240_v25, %v3193_v29 }
 0x3a9   : > { %v3450_v20 = vadd.f32 %v3370_v49, %v3318_v3  ;;  %v2993_v35 = vpop.f32.mrf.mxu0 }
 0x3aa   : > { %v3069_v28 = vadd.f32 %v5239_v7, %v2993_v35 }
 0x3ab   : > { %4108 = vst.msk [vmem:[%s4551_s22 + $0x300] sm:$0xff] %vm1092_vm1, %v3450_v20 }
 0x3ad   : > { %v3117_v5 = vpop.f32.mrf.mxu1 }
 0x3ae   : > { %v3194_v16 = vadd.f32 %v3117_v5, %v3068_v48 }
 0x3af   : > { %v3245_v11 = vpop.f32.mrf.mxu2 }
 0x3b0   : > { %v3372_v12 = vpop.f32.mrf.mxu3  ;;  %4067 = vmatmul.msk.bf16.gmra.mxu1 %vm1092_vm1, %v4968_v63  ;;  %v3320_v13 = vadd.f32 %v3243_v58, %v3194_v16 }
 0x3b1   : > { %v3451_v17 = vadd.f32 %v3372_v12, %v3319_v30  ;;  %v2996_v46 = vpop.f32.mrf.mxu0 }
 0x3b2   : > { %v3070_v53 = vadd.f32 %v5239_v7, %v2996_v46 }
 0x3b3   : > { %4109 = vst.msk [vmem:[%s4551_s22 + $0x308] sm:$0xff] %vm1092_vm1, %v3451_v17 }
 0x3b4   : > { %4085 = vmatmul.msk.bf16.gmra.mxu2 %vm1092_vm1, %v4606_v41  ;;  %4051 = vmatmul.msk.bf16.gmra.mxu0 %vm1092_vm1, %v4587_v62 }
 0x3b5   : > { %4101 = vmatmul.msk.bf16.gmra.mxu3 %vm1092_vm1, %v4991_v52  ;;  %v3119_v54 = vpop.f32.mrf.mxu1 }
 0x3b6   : > { %v3195_v42 = vadd.f32 %v3119_v54, %v3069_v28 }
 0x3b7   : > { %v3248_v50 = vpop.f32.mrf.mxu2 }
 0x3b8   : > { %v3375_v57 = vpop.f32.mrf.mxu3  ;;  %v3321_v2 = vadd.f32 %v3245_v11, %v3195_v42 }
 0x3b9   : > { %v3452_v63 = vadd.f32 %v3375_v57, %v3320_v13  ;;  %v2998_v8 = vpop.f32.mrf.mxu0 }
 0x3ba   : > { %v3071_v26 = vadd.f32 %v5239_v7, %v2998_v8 }
 0x3bb   : > { %4110 = vst.msk [vmem:[%s4551_s22 + $0x310] sm:$0xff] %vm1092_vm1, %v3452_v63 }
 0x3bd   : > { %v3122_v56 = vpop.f32.mrf.mxu1 }
 0x3be   : > { %v3196_v31 = vadd.f32 %v3122_v56, %v3070_v53 }
 0x3bf   : > { %v3250_v62 = vpop.f32.mrf.mxu2 }
 0x3c0   : > { %v3377_v27 = vpop.f32.mrf.mxu3  ;;  %4068 = vmatmul.msk.bf16.gmra.mxu1 %vm1092_vm1, %v4991_v52  ;;  %v3322_v51 = vadd.f32 %v3248_v50, %v3196_v31 }
 0x3c1   : > { %v3453_v14 = vadd.f32 %v3377_v27, %v3321_v2  ;;  %v3001_v38 = vpop.f32.mrf.mxu0 }
 0x3c2   : > { %v3072_v61 = vadd.f32 %v5239_v7, %v3001_v38 }
 0x3c3   : > { %4111 = vst.msk [vmem:[%s4551_s22 + $0x318] sm:$0xff] %vm1092_vm1, %v3453_v14 }
 0x3c4   : > { %4086 = vmatmul.msk.bf16.gmra.mxu2 %vm1092_vm1, %v4631_v32  ;;  %4052 = vmatmul.msk.bf16.gmra.mxu0 %vm1092_vm1, %v4606_v41 }
 0x3c5   : > { %4102 = vmatmul.msk.bf16.gmra.mxu3 %vm1092_vm1, %v5014_v40  ;;  %v3124_v59 = vpop.f32.mrf.mxu1 }
 0x3c6   : > { %v3197_v55 = vadd.f32 %v3124_v59, %v3071_v26 }
 0x3c7   : > { %v3253_v43 = vpop.f32.mrf.mxu2 }
 0x3c8   : > { %v3380_v4 = vpop.f32.mrf.mxu3  ;;  %v3323_v19 = vadd.f32 %v3250_v62, %v3197_v55 }
 0x3c9   : > { %v3454_v52 = vadd.f32 %v3380_v4, %v3322_v51  ;;  %v3003_v47 = vpop.f32.mrf.mxu0 }
 0x3ca   : > { %v3073_v49 = vadd.f32 %v5239_v7, %v3003_v47 }
 0x3cb   : > { %4112 = vst.msk [vmem:[%s4551_s22 + $0x320] sm:$0xff] %vm1092_vm1, %v3454_v52 }
 0x3cd   : > { %v3127_v45 = vpop.f32.mrf.mxu1 }
 0x3ce   : > { %v3198_v37 = vadd.f32 %v3127_v45, %v3072_v61  ;;  %v1038_v45 = vrot.slane %v5323_v60, 5 }
 0x3cf   : > { %v3255_v41 = vpop.f32.mrf.mxu2 }
 0x3d0   : > { %v3382_v25 = vpop.f32.mrf.mxu3  ;;  %4069 = vmatmul.msk.bf16.gmra.mxu1 %vm1092_vm1, %v5014_v40  ;;  %v3324_v44 = vadd.f32 %v3253_v43, %v3198_v37  ;;  %v5568_v43 = vld [vmem:[%s5662_s3] ss:$0 sm:$0xff] }
 0x3d1   : > { %v3455_v33 = vadd.f32 %v3382_v25, %v3323_v19  ;;  %v3006_v18 = vpop.f32.mrf.mxu0  ;;  %v3700_v25 = vrot.slane %v5320_v36, 9 }
 0x3d2   : > { %v3074_v35 = vadd.f32 %v5239_v7, %v3006_v18 }
 0x3d3   : > { %4113 = vst.msk [vmem:[%s4551_s22 + $0x328] sm:$0xff] %vm1092_vm1, %v3455_v33  ;;  %v1041_v33 = vrot.slane %v5334_v24, 5 }
 0x3d4   : > { %4087 = vmatmul.msk.bf16.gmra.mxu2 %vm1092_vm1, %v4657_v23  ;;  %4053 = vmatmul.msk.bf16.gmra.mxu0 %vm1092_vm1, %v4631_v32 }
 0x3d5   : > { %4103 = vmatmul.msk.bf16.gmra.mxu3 %vm1092_vm1, %v5037_v34  ;;  %v3129_v3 = vpop.f32.mrf.mxu1 }
 0x3d6   : > { %v3199_v20 = vadd.f32 %v3129_v3, %v3073_v49 }
 0x3d7   : > { %v3258_v0 = vpop.f32.mrf.mxu2 }
 0x3d8   : > { %v3385_v58 = vpop.f32.mrf.mxu3  ;;  %v3325_v48 = vadd.f32 %v3255_v41, %v3199_v20 }
 0x3d9   : > { %v3456_v40 = vadd.f32 %v3385_v58, %v3324_v44  ;;  %v3008_v6 = vpop.f32.mrf.mxu0 }
 0x3da   : > { %v3075_v54 = vadd.f32 %v5239_v7, %v3008_v6 }
 0x3db   : > { %4114 = vst.msk [vmem:[%s4551_s22 + $0x330] sm:$0xff] %vm1092_vm1, %v3456_v40 }
 0x3dd   : > { %v3132_v29 = vpop.f32.mrf.mxu1 }
 0x3de   : > { %v3200_v11 = vadd.f32 %v3132_v29, %v3074_v35 }
 0x3df   : > { %v3260_v32 = vpop.f32.mrf.mxu2 }
 0x3e0   : > { %v3387_v5 = vpop.f32.mrf.mxu3  ;;  %4070 = vmatmul.msk.bf16.gmra.mxu1 %vm1092_vm1, %v5037_v34  ;;  %v3326_v17 = vadd.f32 %v3258_v0, %v3200_v11 }
 0x3e1   : > { %v3457_v30 = vadd.f32 %v3387_v5, %v3325_v48  ;;  %v3011_v12 = vpop.f32.mrf.mxu0 }
 0x3e2   : > { %v3076_v28 = vadd.f32 %v5239_v7, %v3011_v12 }
 0x3e3   : > { %4115 = vst.msk [vmem:[%s4551_s22 + $0x338] sm:$0xff] %vm1092_vm1, %v3457_v30 }
 0x3e4   : > { %4088 = vmatmul.msk.bf16.gmra.mxu2 %vm1092_vm1, %v4685_v10  ;;  %4054 = vmatmul.msk.bf16.gmra.mxu0 %vm1092_vm1, %v4657_v23 }
 0x3e5   : > { %4104 = vmatmul.msk.bf16.gmra.mxu3 %vm1092_vm1, %v5060_v22  ;;  %v3134_v16 = vpop.f32.mrf.mxu1 }
 0x3e6   : > { %v3201_v57 = vadd.f32 %v3134_v16, %v3075_v54 }
 0x3e7   : > { %v3263_v46 = vpop.f32.mrf.mxu2 }
 0x3e8   : > { %v3390_v13 = vpop.f32.mrf.mxu3  ;;  %v3327_v8 = vadd.f32 %v3260_v32, %v3201_v57 }
 0x3e9   : > { %v3458_v34 = vadd.f32 %v3390_v13, %v3326_v17  ;;  %v3013_v50 = vpop.f32.mrf.mxu0 }
 0x3ea   : > { %v3077_v38 = vadd.f32 %v5239_v7, %v3013_v50 }
 0x3eb   : > { %4116 = vst.msk [vmem:[%s4551_s22 + $0x340] sm:$0xff] %vm1092_vm1, %v3458_v34 }
 0x3ed   : > { %v3137_v63 = vpop.f32.mrf.mxu1 }
 0x3ee   : > { %v3202_v56 = vadd.f32 %v3137_v63, %v3076_v28 }
 0x3ef   : > { %v3265_v23 = vpop.f32.mrf.mxu2 }
 0x3f0   : > { %v3392_v42 = vpop.f32.mrf.mxu3  ;;  %4071 = vmatmul.msk.bf16.gmra.mxu1 %vm1092_vm1, %v5060_v22  ;;  %v3328_v62 = vadd.f32 %v3263_v46, %v3202_v56 }
 0x3f1   : > { %v3459_v53 = vadd.f32 %v3392_v42, %v3327_v8  ;;  %v3016_v2 = vpop.f32.mrf.mxu0 }
 0x3f3   : > { %4117 = vst.msk [vmem:[%s4551_s22 + $0x348] sm:$0xff] %vm1092_vm1, %v3459_v53 }
 0x3f4   : > { %4089 = vmatmul.msk.bf16.gmra.mxu2 %vm1092_vm1, %v4733_v9  ;;  %4055 = vmatmul.msk.bf16.gmra.mxu0 %vm1092_vm1, %v4685_v10  ;;  %v3078_v10 = vadd.f32 %v5568_v43, %v3016_v2 }
 0x3f5   : > { %4105 = vmatmul.msk.bf16.gmra.mxu3 %vm1092_vm1, %v5084_v21  ;;  %v3139_v27 = vpop.f32.mrf.mxu1 }
 0x3f6   : > { %v3203_v59 = vadd.f32 %v3139_v27, %v3077_v38 }
 0x3f7   : > { %v3268_v14 = vpop.f32.mrf.mxu2 }
 0x3f8   : > { %v3395_v31 = vpop.f32.mrf.mxu3  ;;  %v3329_v26 = vadd.f32 %v3265_v23, %v3203_v59 }
 0x3f9   : > { %v3460_v22 = vadd.f32 %v3395_v31, %v3328_v62  ;;  %v3018_v51 = vpop.f32.mrf.mxu0 }
 0x3fa   : > { %v3079_v18 = vadd.f32 %v5568_v43, %v3018_v51 }
 0x3fb   : > { %4118 = vst.msk [vmem:[%s4551_s22 + $0x350] sm:$0xff] %vm1092_vm1, %v3460_v22 }
 0x3fd   : > { %v3142_v4 = vpop.f32.mrf.mxu1 }
 0x3fe   : > { %v3204_v61 = vadd.f32 %v3142_v4, %v3078_v10 }
 0x3ff   : > { %v3270_v52 = vpop.f32.mrf.mxu2 }
 0x400   : > { %v3397_v47 = vpop.f32.mrf.mxu3  ;;  %4072 = vmatmul.msk.bf16.gmra.mxu1 %vm1092_vm1, %v5084_v21  ;;  %v3330_v19 = vadd.f32 %v3268_v14, %v3204_v61  ;;  %v1040_v21 = vrot.slane %v1038_v45, 4 }
 0x401   : > { %v3461_v55 = vadd.f32 %v3397_v47, %v3329_v26  ;;  %v3021_v7 = vpop.f32.mrf.mxu0 }
 0x402   : > { %v3080_v36 = vadd.f32 %v5568_v43, %v3021_v7 }
 0x403   : > { %4119 = vst.msk [vmem:[%s4551_s22 + $0x358] sm:$0xff] %vm1092_vm1, %v3461_v55 }
 0x404   : > { %4090 = vmatmul.msk.bf16.gmra.mxu2 %vm1092_vm1, %v5356_v39  ;;  %4056 = vmatmul.msk.bf16.gmra.mxu0 %vm1092_vm1, %v4733_v9  ;;  %v1039_v39 = vsel %vm4687_vm7, %v3700_v25, %v1038_v45  ;;  %v1042_v9 = vsel %vm4687_vm7, %v1040_v21, %v1041_v33 }
 0x405   : > { %4106 = vmatmul.msk.bf16.gmra.mxu3 %vm1092_vm1, %v5122_v1  ;;  %v3144_v41 = vpop.f32.mrf.mxu1  ;;  %v3352_v58 = vunpack.c.l.b16 %v1039_v39  ;;  %v3353_v24 = vunpack.c.l.b16 %v1042_v9 }
 0x406   : > { %v3205_v0 = vadd.f32 %v3144_v41, %v3079_v18 }
 0x407   : > { %v3273_v60 = vpop.f32.mrf.mxu2  ;;  %v3354_v15 = vpack.c.b16 %v3353_v24, %v3352_v58 }
 0x408   : > { %v3400_v37 = vpop.f32.mrf.mxu3  ;;  %v3331_v40 = vadd.f32 %v3270_v52, %v3205_v0 }
 0x409   : > { %v3462_v44 = vadd.f32 %v3400_v37, %v3330_v19  ;;  %v3023_v3 = vpop.f32.mrf.mxu0 }
 0x40a   : > { %v3081_v12 = vadd.f32 %v5568_v43, %v3023_v3 }
 0x40b   : > { %4120 = vst.msk [vmem:[%s4551_s22 + $0x360] sm:$0xff] %vm1092_vm1, %v3462_v44 }
 0x40d   : > { %v3147_v49 = vpop.f32.mrf.mxu1 }
 0x40e   : > { %v3206_v29 = vadd.f32 %v3147_v49, %v3080_v36 }
 0x40f   : > { %v3275_v6 = vpop.f32.mrf.mxu2 }
 0x410   : > { %v3402_v20 = vpop.f32.mrf.mxu3  ;;  %4073 = vmatmul.msk.bf16.gmra.mxu1 %vm1092_vm1, %v5122_v1  ;;  %v3332_v32 = vadd.f32 %v3273_v60, %v3206_v29 }
 0x411   : > { %v3463_v35 = vadd.f32 %v3402_v20, %v3331_v40  ;;  %v3026_v48 = vpop.f32.mrf.mxu0 }
 0x412   : > { %v3082_v1 = vadd.f32 %v5568_v43, %v3026_v48 }
 0x413   : > { %4121 = vst.msk [vmem:[%s4551_s22 + $0x368] sm:$0xff] %vm1092_vm1, %v3463_v35 }
 0x415   : > { %4107 = vmatmul.msk.bf16.gmra.mxu3 %vm1092_vm1, %v3354_v15  ;;  %v3149_v5 = vpop.f32.mrf.mxu1 }
 0x416   : > { %v3207_v46 = vadd.f32 %v3149_v5, %v3081_v12 }
 0x417   : > { %v3278_v30 = vpop.f32.mrf.mxu2 }
 0x418   : > { %v3405_v11 = vpop.f32.mrf.mxu3  ;;  %v3333_v54 = vadd.f32 %v3275_v6, %v3207_v46 }
 0x419   : > { %v3464_v17 = vadd.f32 %v3405_v11, %v3332_v32  ;;  %v3028_v16 = vpop.f32.mrf.mxu0 }
 0x41a   : > { %v3083_v56 = vadd.f32 %v5568_v43, %v3028_v16 }
 0x41b   : > { %4122 = vst.msk [vmem:[%s4551_s22 + $0x370] sm:$0xff] %vm1092_vm1, %v3464_v17 }
 0x41d   : > { %v3152_v13 = vpop.f32.mrf.mxu1 }
 0x41e   : > { %v3208_v28 = vadd.f32 %v3152_v13, %v3082_v1 }
 0x41f   : > { %v3280_v34 = vpop.f32.mrf.mxu2 }
 0x420   : > { %v3407_v50 = vpop.f32.mrf.mxu3  ;;  %v3334_v8 = vadd.f32 %v3278_v30, %v3208_v28 }
 0x421   : > { %v3465_v57 = vadd.f32 %v3407_v50, %v3333_v54  ;;  %v3031_v63 = vpop.f32.mrf.mxu0 }
 0x422   : > { %v3084_v14 = vadd.f32 %v5568_v43, %v3031_v63 }
 0x423   : > { %4123 = vst.msk [vmem:[%s4551_s22 + $0x378] sm:$0xff] %vm1092_vm1, %v3465_v57 }
 0x425   : > { %v3154_v23 = vpop.f32.mrf.mxu1 }
 0x426   : > { %v3209_v27 = vadd.f32 %v3154_v23, %v3083_v56 }
 0x427   : > { %v3283_v42 = vpop.f32.mrf.mxu2 }
 0x428   : > { %v3410_v53 = vpop.f32.mrf.mxu3  ;;  %v3335_v38 = vadd.f32 %v3280_v34, %v3209_v27 }
 0x429   : > { %v3466_v2 = vadd.f32 %v3410_v53, %v3334_v8  ;;  %v3033_v62 = vpop.f32.mrf.mxu0 }
 0x42a   : > { %v3085_v61 = vadd.f32 %v5568_v43, %v3033_v62 }
 0x42b   : > { %4124 = vst.msk [vmem:[%s4551_s22 + $0x380] sm:$0xff] %vm1092_vm1, %v3466_v2 }
 0x42d   : > { %v3157_v31 = vpop.f32.mrf.mxu1 }
 0x42e   : > { %v3210_v10 = vadd.f32 %v3157_v31, %v3084_v14 }
 0x42f   : > { %v3285_v22 = vpop.f32.mrf.mxu2 }
 0x430   : > { %v3412_v51 = vpop.f32.mrf.mxu3  ;;  %v3336_v26 = vadd.f32 %v3283_v42, %v3210_v10 }
 0x431   : > { %v3467_v59 = vadd.f32 %v3412_v51, %v3335_v38  ;;  %v3036_v4 = vpop.f32.mrf.mxu0 }
 0x432   : > { %v3086_v41 = vadd.f32 %v5568_v43, %v3036_v4 }
 0x433   : > { %4125 = vst.msk [vmem:[%s4551_s22 + $0x388] sm:$0xff] %vm1092_vm1, %v3467_v59 }
 0x435   : > { %v3159_v52 = vpop.f32.mrf.mxu1 }
 0x436   : > { %v3211_v19 = vadd.f32 %v3159_v52, %v3085_v61 }
 0x437   : > { %v3288_v47 = vpop.f32.mrf.mxu2 }
 0x438   : > { %v3415_v55 = vpop.f32.mrf.mxu3  ;;  %v3337_v21 = vadd.f32 %v3285_v22, %v3211_v19 }
 0x439   : > { %v3468_v7 = vadd.f32 %v3415_v55, %v3336_v26  ;;  %v3038_v45 = vpop.f32.mrf.mxu0 }
 0x43a   : > { %v3087_v36 = vadd.f32 %v5568_v43, %v3038_v45 }
 0x43b   : > { %4126 = vst.msk [vmem:[%s4551_s22 + $0x390] sm:$0xff] %vm1092_vm1, %v3468_v7 }
 0x43d   : > { %v3162_v25 = vpop.f32.mrf.mxu1 }
 0x43e   : > { %v3212_v18 = vadd.f32 %v3162_v25, %v3086_v41 }
 0x43f   : > { %v3290_v33 = vpop.f32.mrf.mxu2 }
 0x440   : > { %v3417_v60 = vpop.f32.mrf.mxu3  ;;  %v3338_v3 = vadd.f32 %v3288_v47, %v3212_v18 }
 0x441   : > { %v3469_v37 = vadd.f32 %v3417_v60, %v3337_v21  ;;  %v3041_v44 = vpop.f32.mrf.mxu0 }
 0x442   : > { %v3088_v40 = vadd.f32 %v5568_v43, %v3041_v44 }
 0x443   : > { %4127 = vst.msk [vmem:[%s4551_s22 + $0x398] sm:$0xff] %vm1092_vm1, %v3469_v37 }
 0x445   : > { %v3164_v39 = vpop.f32.mrf.mxu1 }
 0x446   : > { %v3213_v49 = vadd.f32 %v3164_v39, %v3087_v36 }
 0x447   : > { %v3293_v9 = vpop.f32.mrf.mxu2 }
 0x448   : > { %v3420_v0 = vpop.f32.mrf.mxu3  ;;  %v3339_v20 = vadd.f32 %v3290_v33, %v3213_v49 }
 0x449   : > { %v3470_v58 = vadd.f32 %v3420_v0, %v3338_v3  ;;  %v3043_v24 = vpop.f32.mrf.mxu0 }
 0x44a   : > { %v3089_v17 = vadd.f32 %v5568_v43, %v3043_v24 }
 0x44b   : > { %4128 = vst.msk [vmem:[%s4551_s22 + $0x3a0] sm:$0xff] %vm1092_vm1, %v3470_v58 }
 0x44d   : > { %v3167_v6 = vpop.f32.mrf.mxu1 }
 0x44e   : > { %v3214_v48 = vadd.f32 %v3167_v6, %v3088_v40 }
 0x44f   : > { %v3295_v35 = vpop.f32.mrf.mxu2 }
 0x450   : > { %v3422_v29 = vpop.f32.mrf.mxu3  ;;  %v3340_v5 = vadd.f32 %v3293_v9, %v3214_v48 }
 0x451   : > { %v3471_v15 = vadd.f32 %v3422_v29, %v3339_v20  ;;  %v3046_v32 = vpop.f32.mrf.mxu0 }
 0x452   : > { %v3090_v13 = vadd.f32 %v5568_v43, %v3046_v32 }
 0x453   : > { %4129 = vst.msk [vmem:[%s4551_s22 + $0x3a8] sm:$0xff] %vm1092_vm1, %v3471_v15 }
 0x455   : > { %v3169_v30 = vpop.f32.mrf.mxu1 }
 0x456   : > { %v3215_v1 = vadd.f32 %v3169_v30, %v3089_v17 }
 0x457   : > { %v3298_v12 = vpop.f32.mrf.mxu2 }
 0x458   : > { %v3425_v11 = vpop.f32.mrf.mxu3  ;;  %v3341_v34 = vadd.f32 %v3295_v35, %v3215_v1 }
 0x459   : > { %v3472_v16 = vadd.f32 %v3425_v11, %v3340_v5  ;;  %v3048_v46 = vpop.f32.mrf.mxu0 }
 0x45a   : > { %v3091_v56 = vadd.f32 %v5568_v43, %v3048_v46 }
 0x45b   : > { %4130 = vst.msk [vmem:[%s4551_s22 + $0x3b0] sm:$0xff] %vm1092_vm1, %v3472_v16 }
 0x45d   : > { %v3172_v54 = vpop.f32.mrf.mxu1 }
 0x45e   : > { %v3216_v28 = vadd.f32 %v3172_v54, %v3090_v13 }
 0x45f   : > { %v3300_v63 = vpop.f32.mrf.mxu2 }
 0x460   : > { %v3427_v50 = vpop.f32.mrf.mxu3  ;;  %v3342_v23 = vadd.f32 %v3298_v12, %v3216_v28 }
 0x461   : > { %v3473_v57 = vadd.f32 %v3427_v50, %v3341_v34  ;;  %v3051_v8 = vpop.f32.mrf.mxu0 }
 0x462   : > { %v3092_v14 = vadd.f32 %v5568_v43, %v3051_v8 }
 0x463   : > { %4131 = vst.msk [vmem:[%s4551_s22 + $0x3b8] sm:$0xff] %vm1092_vm1, %v3473_v57 }
 0x465   : > { %v3174_v42 = vpop.f32.mrf.mxu1 }
 0x466   : > { %v3217_v62 = vadd.f32 %v3174_v42, %v3091_v56 }
 0x467   : > { %v3303_v27 = vpop.f32.mrf.mxu2 }
 0x468   : > { %v3430_v53 = vpop.f32.mrf.mxu3  ;;  %v3343_v22 = vadd.f32 %v3300_v63, %v3217_v62 }
 0x469   : > { %v3474_v2 = vadd.f32 %v3430_v53, %v3342_v23  ;;  %v3053_v31 = vpop.f32.mrf.mxu0 }
 0x46a   : > { %v3093_v61 = vadd.f32 %v5568_v43, %v3053_v31 }
 0x46b   : > { %4132 = vst.msk [vmem:[%s4551_s22 + $0x3c0] sm:$0xff] %vm1092_vm1, %v3474_v2 }
 0x46d   : > { %v3177_v38 = vpop.f32.mrf.mxu1 }
 0x46e   : > { %v3218_v10 = vadd.f32 %v3177_v38, %v3092_v14 }
 0x46f   : > { %v3305_v26 = vpop.f32.mrf.mxu2 }
 0x470   : > { %v3432_v51 = vpop.f32.mrf.mxu3  ;;  %v3344_v4 = vadd.f32 %v3303_v27, %v3218_v10 }
 0x471   : > { %v3475_v59 = vadd.f32 %v3432_v51, %v3343_v22  ;;  %v3056_v55 = vpop.f32.mrf.mxu0 }
 0x472   : > { %v3094_v19 = vadd.f32 %v5568_v43, %v3056_v55 }
 0x473   : > { %4133 = vst.msk [vmem:[%s4551_s22 + $0x3c8] sm:$0xff] %vm1092_vm1, %v3475_v59 }
 0x475   : > { %v3179_v52 = vpop.f32.mrf.mxu1 }
 0x476   : > { %v3219_v45 = vadd.f32 %v3179_v52, %v3093_v61 }
 0x477   : > { %v3308_v21 = vpop.f32.mrf.mxu2 }
 0x478   : > { %v3435_v47 = vpop.f32.mrf.mxu3  ;;  %v3345_v25 = vadd.f32 %v3305_v26, %v3219_v45 }
 0x479   : > { %v3476_v7 = vadd.f32 %v3435_v47, %v3344_v4  ;;  %v3058_v18 = vpop.f32.mrf.mxu0 }
 0x47a   : > { %v3095_v9 = vadd.f32 %v5568_v43, %v3058_v18 }
 0x47b   : > { %4134 = vst.msk [vmem:[%s4551_s22 + $0x3d0] sm:$0xff] %vm1092_vm1, %v3476_v7 }
 0x47d   : > { %v3182_v41 = vpop.f32.mrf.mxu1 }
 0x47e   : > { %v3220_v37 = vadd.f32 %v3182_v41, %v3094_v19 }
 0x47f   : > { %v3310_v36 = vpop.f32.mrf.mxu2 }
 0x480   : > { %v3437_v33 = vpop.f32.mrf.mxu3  ;;  %v3346_v44 = vadd.f32 %v3308_v21, %v3220_v37 }
 0x481   : > { %v3477_v60 = vadd.f32 %v3437_v33, %v3345_v25  ;;  %v3061_v24 = vpop.f32.mrf.mxu0 }
 0x482   : > { %v3096_v49 = vadd.f32 %v5568_v43, %v3061_v24 }
 0x483   : > { %4135 = vst.msk [vmem:[%s4551_s22 + $0x3d8] sm:$0xff] %vm1092_vm1, %v3477_v60 }
 0x485   : > { %v3184_v3 = vpop.f32.mrf.mxu1 }
 0x486   : > { %v3221_v58 = vadd.f32 %v3184_v3, %v3095_v9 }
 0x487   : > { %v3313_v15 = vpop.f32.mrf.mxu2 }
 0x488   : > { %v3440_v39 = vpop.f32.mrf.mxu3  ;;  %v3347_v6 = vadd.f32 %v3310_v36, %v3221_v58 }
 0x489   : > { %v3478_v0 = vadd.f32 %v3440_v39, %v3346_v44  ;;  %v3063_v32 = vpop.f32.mrf.mxu0 }
 0x48a   : > { %v3097_v11 = vadd.f32 %v5568_v43, %v3063_v32 }
 0x48b   : > { %4136 = vst.msk [vmem:[%s4551_s22 + $0x3e0] sm:$0xff] %vm1092_vm1, %v3478_v0 }
 0x48d   : > { %v3187_v40 = vpop.f32.mrf.mxu1 }
 0x48e   : > { %v3222_v29 = vadd.f32 %v3187_v40, %v3096_v49 }
 0x48f   : > { %v3315_v16 = vpop.f32.mrf.mxu2 }
 0x490   : > { %v3442_v20 = vpop.f32.mrf.mxu3  ;;  %v3348_v48 = vadd.f32 %v3313_v15, %v3222_v29 }
 0x491   : > { %v3479_v35 = vadd.f32 %v3442_v20, %v3347_v6 }
 0x493   : > { %4137 = vst.msk [vmem:[%s4551_s22 + $0x3e8] sm:$0xff] %vm1092_vm1, %v3479_v35 }
 0x495   : > { %v3189_v30 = vpop.f32.mrf.mxu1 }
 0x496   : > { %v3223_v17 = vadd.f32 %v3189_v30, %v3097_v11 }
 0x498   : > { %v3445_v5 = vpop.f32.mrf.mxu3  ;;  %v3349_v46 = vadd.f32 %v3315_v16, %v3223_v17 }
 0x499   : > { %v3480_v12 = vadd.f32 %v3445_v5, %v3348_v48 }
 0x49b   : > { %4138 = vst.msk [vmem:[%s4551_s22 + $0x3f0] sm:$0xff] %vm1092_vm1, %v3480_v12 }
 0x4a0   : > { %v3447_v1 = vpop.f32.mrf.mxu3 }
 0x4a1   : > { %v3481_v13 = vadd.f32 %v3447_v1, %v3349_v46 }
 0x4a3   : > { %4139 = vst.msk [vmem:[%s4551_s22 + $0x3f8] sm:$0xff] %vm1092_vm1, %v3481_v13 }
 0x4a4 PF: > { %s14_s17 = sadd.s32 1, %s4283_s17   ;;  %s5668_s15 = smov %s4279_s16 }
 0x4a5   : > { %p11_p5 = scmp.ge.s32.totalorder %s14_s17, 4   ;;  %s5669_s16 = smov %s5671_s18 }
 0x4a7   :  { %13 = sbr.rel (!%p11_p5) target bundleno = 2 (0x2), region = 93 }

</bundles_post_ra>
